<compile_context>
chip_gen: v7x
topology: tpu7x:2x2x1
jax: 0.10.0
libtpu: 0.0.40
codegen_flags: <defaults>
</compile_context>

<pallas_src>
import functools

import jax
import jax.numpy as jnp
from jax import lax
from jax.experimental import pallas as pl
from jax.experimental.pallas import tpu as pltpu

# Large finite negative instead of -inf: avoids any inf-inf / NaN edge cases in the
# online-softmax rescaling while still underflowing exp() to exactly 0.
_NEG_INF = float(-1e30)


def _layernorm(x, g, b, eps=1e-5):
    mu = jnp.mean(x, axis=-1, keepdims=True)
    var = jnp.mean((x - mu) ** 2, axis=-1, keepdims=True)
    return (x - mu) * lax.rsqrt(var + eps) * g + b


def block_kernel(n_heads, scale,
                 xq_ref, xkv_ref,
                 wq_ref, wkv_ref, wproj_ref, bproj_ref,
                 ln1g_ref, ln1b_ref, ln2g_ref, ln2b_ref,
                 w1_ref, b1_ref, w2_ref, b2_ref,
                 o_ref,
                 q_scr, m_scr, l_scr, acc_scr):
    H = n_heads
    TQ, C = xq_ref.shape[1], xq_ref.shape[2]
    TK = xkv_ref.shape[1]
    hs = C // H
    cdt = wq_ref.dtype                       # matmul-input dtype (bf16 or f32)

    qi = pl.program_id(1)                    # query-tile index
    ki = pl.program_id(2)                    # key/value-tile index (innermost)

    # ---- once per query tile: LN1 + fused Q projection for all heads --------------
    @pl.when(ki == 0)
    def _init():
        h1q = _layernorm(xq_ref[0], ln1g_ref[...], ln1b_ref[...])          # (TQ, C)
        q = jnp.dot(h1q.astype(cdt), wq_ref[...],
                    preferred_element_type=jnp.float32)                    # (TQ, C)
        # Fold the softmax scale into q (VPU work on (TQ,C), not on (TQ,TK) scores).
        q_scr[...] = (q * scale).astype(q_scr.dtype)
        m_scr[...] = jnp.full(m_scr.shape, _NEG_INF, m_scr.dtype)
        l_scr[...] = jnp.zeros(l_scr.shape, l_scr.dtype)
        acc_scr[...] = jnp.zeros(acc_scr.shape, acc_scr.dtype)

    # ---- per kv tile: fused K|V projection + per-head online softmax --------------
    # Tiles strictly above the causal diagonal are skipped (a production kernel
    # would additionally skip their grid steps / DMAs via scalar-prefetch schedules).
    @pl.when(ki <= qi)
    def _attend():
        h1k = _layernorm(xkv_ref[0], ln1g_ref[...], ln1b_ref[...])         # (TK, C)
        kv = jnp.dot(h1k.astype(cdt), wkv_ref[...],
                     preferred_element_type=jnp.float32)                   # (TK, 2C) = [K | V]

        # Causal mask in global coordinates, shared by all heads (hoisted out of
        # the head loop).  For ki < qi it is all-True; only the diagonal tile masks.
        q_pos = qi * TQ + lax.broadcasted_iota(jnp.int32, (TQ, TK), 0)
        k_pos = ki * TK + lax.broadcasted_iota(jnp.int32, (TQ, TK), 1)
        mask = q_pos >= k_pos

        # Only the inherently per-head part of attention lives in this (static,
        # unrolled) loop; every projection above/below is a fused full-width matmul.
        # Head h owns lane block [h*hs, (h+1)*hs) of q / k / v / acc -> no concat,
        # no transposes, no relayouts.
        for h in range(H):
            sl = slice(h * hs, (h + 1) * hs)
            q_h = q_scr[:, sl]                                             # (TQ, hs)
            k_h = kv[:, sl].astype(cdt)                                    # (TK, hs)
            v_h = kv[:, C + h * hs:C + (h + 1) * hs].astype(cdt)           # (TK, hs)

            # Contract on the last dim of both -> q @ k^T without materializing k^T.
            s = lax.dot_general(q_h, k_h, (((1,), (1,)), ((), ())),
                                preferred_element_type=jnp.float32)        # (TQ, TK)
            s = jnp.where(mask, s, _NEG_INF)

            m_prev = m_scr[:, h:h + 1]                                     # (TQ, 1)
            m_new = jnp.maximum(m_prev, jnp.max(s, axis=-1, keepdims=True))
            alpha = jnp.exp(m_prev - m_new)
            p = jnp.exp(s - m_new)                                         # (TQ, TK)

            l_scr[:, h:h + 1] = alpha * l_scr[:, h:h + 1] + jnp.sum(
                p, axis=-1, keepdims=True)
            acc_scr[:, sl] = alpha * acc_scr[:, sl] + jnp.dot(
                p.astype(cdt), v_h, preferred_element_type=jnp.float32)
            m_scr[:, h:h + 1] = m_new

    # ---- diagonal kv tile = last needed tile: project + residual + FFN ------------
    @pl.when(ki == qi)
    def _finalize():
        xq = xq_ref[0]                                                     # (TQ, C) f32

        # Normalize each head's accumulator lanes in place (EUP reciprocal, ~free).
        for h in range(H):
            sl = slice(h * hs, (h + 1) * hs)
            acc_scr[:, sl] = acc_scr[:, sl] * pl.reciprocal(
                l_scr[:, h:h + 1], approx=True)

        # Heads are already lane-concatenated in acc_scr -> single output projection.
        sa = jnp.dot(acc_scr[...].astype(cdt), wproj_ref[...],
                     preferred_element_type=jnp.float32) + bproj_ref[...]
        x1 = sa + xq                                                       # residual 1

        h2 = _layernorm(x1, ln2g_ref[...], ln2b_ref[...])
        ff = jnp.dot(h2.astype(cdt), w1_ref[...],
                     preferred_element_type=jnp.float32) + b1_ref[...]
        ff = jnp.maximum(ff, 0.0)                                          # ReLU
        ff = jnp.dot(ff.astype(cdt), w2_ref[...],
                     preferred_element_type=jnp.float32) + b2_ref[...]

        o_ref[0] = (ff + x1).astype(o_ref.dtype)                           # residual 2


def _nbytes(a):
    return int(a.size) * jnp.dtype(a.dtype).itemsize


def transformer_block(x, params, n_heads, *,
                      compute_dtype=jnp.bfloat16,
                      seq_tile=128,
                      single_buffer_weights=True):
    """Forward pass of the transformer Block as a single Pallas TPU kernel."""
    B, T, C = x.shape
    H = n_heads
    assert C % H == 0
    hs = C // H
    tile = min(seq_tile, T)
    assert T % tile == 0 and (tile % 8 == 0 or tile == T)
    n_t = T // tile
    scale = float(C) ** -0.5            # PyTorch quirk: weight.shape[1] == n_embd

    # ---- host-side weight packing (one-time layout work, outside the kernel) ------
    def pack_heads(w):                  # (H, C, hs) -> (C, H*hs); column index = h*hs + d
        return jnp.transpose(w, (1, 0, 2)).reshape(C, H * hs)

    wq_p = pack_heads(params["wq"]).astype(compute_dtype)                  # (C, C)
    wkv_p = jnp.concatenate(
        [pack_heads(params["wk"]), pack_heads(params["wv"])],
        axis=1).astype(compute_dtype)                                      # (C, 2C)
    wproj_c = params["wproj"].astype(compute_dtype)                        # (C, C)
    w1_c = params["w1"].astype(compute_dtype)                              # (C, 4C)
    w2_c = params["w2"].astype(compute_dtype)                              # (4C, C)
    bproj, b1, b2 = params["bproj"], params["b1"], params["b2"]
    ln1g, ln1b = params["ln1g"], params["ln1b"]
    ln2g, ln2b = params["ln2g"], params["ln2b"]

    def w_spec(shape):
        idx = lambda *_: (0,) * len(shape)
        if single_buffer_weights:
            # Constant across the whole grid -> double-buffering only burns VMEM.
            return pl.BlockSpec(shape, idx, pipeline_mode=pl.Buffered(1))
        return pl.BlockSpec(shape, idx)

    in_specs = [
        pl.BlockSpec((1, tile, C), lambda b, qi, ki: (b, qi, 0)),   # x: query rows
        pl.BlockSpec((1, tile, C), lambda b, qi, ki: (b, ki, 0)),   # x: key/value rows
        w_spec(wq_p.shape), w_spec(wkv_p.shape), w_spec(wproj_c.shape),
        w_spec(bproj.shape),
        w_spec(ln1g.shape), w_spec(ln1b.shape),
        w_spec(ln2g.shape), w_spec(ln2b.shape),
        w_spec(w1_c.shape), w_spec(b1.shape),
        w_spec(w2_c.shape), w_spec(b2.shape),
    ]
    out_specs = pl.BlockSpec((1, tile, C), lambda b, qi, ki: (b, qi, 0))

    scratch_shapes = [
        pltpu.VMEM((tile, C), compute_dtype),     # scaled Q for the current q tile
        pltpu.VMEM((tile, H), jnp.float32),       # online-softmax running max (per head)
        pltpu.VMEM((tile, H), jnp.float32),       # online-softmax running sum (per head)
        pltpu.VMEM((tile, C), jnp.float32),       # attention output accumulator
    ]

    # Explicit scoped-VMEM budget: resident weights + pipelined activation blocks +
    # scratch, with 2x slack, clamped to [32 MiB, 96 MiB].  (At production sizes on
    # v7x (64 MiB VMEM) the big FFN weights would have to be streamed instead.)
    wbuf = 1 if single_buffer_weights else 2
    weight_bytes = wbuf * sum(map(_nbytes, (wq_p, wkv_p, wproj_c, w1_c, w2_c)))
    small_bytes = 2 * sum(map(_nbytes, (bproj, b1, b2, ln1g, ln1b, ln2g, ln2b)))
    act_bytes = 3 * 2 * tile * C * 4              # x_q, x_kv, out blocks, double-buffered
    scr_bytes = (tile * C * (jnp.dtype(compute_dtype).itemsize + 4)
                 + 2 * tile * H * 4)
    vmem_limit = int(min(96 << 20,
                         max(32 << 20,
                             2 * (weight_bytes + small_bytes + act_bytes + scr_bytes))))

    kernel = functools.partial(block_kernel, H, scale)
    return pl.pallas_call(
        kernel,
        out_shape=jax.ShapeDtypeStruct((B, T, C), x.dtype),
        grid=(B, n_t, n_t),
        in_specs=in_specs,
        out_specs=out_specs,
        scratch_shapes=scratch_shapes,
        compiler_params=pltpu.CompilerParams(
            dimension_semantics=("parallel", "parallel", "arbitrary"),
            vmem_limit_bytes=vmem_limit),
    )(x, x,
      wq_p, wkv_p, wproj_c, bproj, ln1g, ln1b, ln2g, ln2b,
      w1_c, b1, w2_c, b2)


def reference_block(x, p, n_heads):
    """Pure-JAX f32 reference mirroring the PyTorch forward (eval mode)."""
    def ln(t, g, b):
        mu = t.mean(-1, keepdims=True)
        var = ((t - mu) ** 2).mean(-1, keepdims=True)
        return (t - mu) / jnp.sqrt(var + 1e-5) * g + b

    B, T, C = x.shape
    h1 = ln(x, p["ln1g"], p["ln1b"])
    mask = jnp.tril(jnp.ones((T, T), bool))
    heads = []
    for h in range(n_heads):
        q = h1 @ p["wq"][h]
        k = h1 @ p["wk"][h]
        v = h1 @ p["wv"][h]
        att = (q @ jnp.swapaxes(k, -1, -2)) * (C ** -0.5)
        att = jnp.where(mask, att, -jnp.inf)
        att = jax.nn.softmax(att, axis=-1)
        heads.append(att @ v)
    sa = jnp.concatenate(heads, -1) @ p["wproj"] + p["bproj"]
    x1 = sa + x
    h2 = ln(x1, p["ln2g"], p["ln2b"])
    ff = jax.nn.relu(h2 @ p["w1"] + p["b1"]) @ p["w2"] + p["b2"]
    return ff + x1


def init_params(key, C, n_heads):
    H = n_heads
    hs = C // H
    ks = jax.random.split(key, 8)
    s = 0.02
    return {
        "wq": s * jax.random.normal(ks[0], (H, C, hs), jnp.float32),
        "wk": s * jax.random.normal(ks[1], (H, C, hs), jnp.float32),
        "wv": s * jax.random.normal(ks[2], (H, C, hs), jnp.float32),
        "wproj": s * jax.random.normal(ks[3], (C, C), jnp.float32),
        "bproj": s * jax.random.normal(ks[4], (1, C), jnp.float32),
        "ln1g": jnp.ones((1, C), jnp.float32),
        "ln1b": jnp.zeros((1, C), jnp.float32),
        "ln2g": jnp.ones((1, C), jnp.float32),
        "ln2b": jnp.zeros((1, C), jnp.float32),
        "w1": s * jax.random.normal(ks[5], (C, 4 * C), jnp.float32),
        "b1": s * jax.random.normal(ks[6], (1, 4 * C), jnp.float32),
        "w2": s * jax.random.normal(ks[7], (4 * C, C), jnp.float32),
        "b2": jnp.zeros((1, C), jnp.float32),
    }


if __name__ == "__main__":
    B, T, C, H = 2, 8, 32, 4           # batch, seq, n_embd, n_heads

    key = jax.random.PRNGKey(0)
    kx, kp = jax.random.split(key)
    x = jax.random.normal(kx, (B, T, C), jnp.float32)
    params = init_params(kp, C, H)

    ref = reference_block(x, params, H)

    def run(dtype, single_buffer):
        return jax.block_until_ready(
            transformer_block(x, params, H, compute_dtype=dtype,
                              single_buffer_weights=single_buffer))

    single_buffer = True
    try:
        out_f32 = run(jnp.float32, single_buffer)
    except Exception:
        # Compatibility guard: if this jax build rejects pl.Buffered(1), fall back to
        # default double-buffered weight blocks (identical math, just more VMEM).
        single_buffer = False
        out_f32 = run(jnp.float32, single_buffer)

    # f32 compute path: strict check of the flash/online-softmax algorithm itself.
    assert out_f32.shape == (B, T, C)
    assert jnp.allclose(out_f32, ref, atol=1e-3, rtol=1e-3), "f32 kernel mismatch"

    # bf16-MXU-input path (the optimized configuration): looser tolerance accounts
    # for bf16 rounding of matmul inputs (accumulation stays f32).
    out_bf16 = run(jnp.bfloat16, single_buffer)
    assert out_bf16.shape == (B, T, C)
    assert jnp.allclose(out_bf16, ref, atol=1e-2, rtol=1e-2), "bf16 kernel mismatch"

    print("KERNEL_OK")
</pallas_src>

<mosaic_0001>
module attributes {stable_mosaic.version = 11 : i64} {
  func.func @block_kernel(%arg0: i32, %arg1: i32, %arg2: i32, %arg3: memref<1x8x32xf32, #tpu.memory_space<vmem>>, %arg4: memref<1x8x32xf32, #tpu.memory_space<vmem>>, %arg5: memref<32x32xf32, #tpu.memory_space<vmem>>, %arg6: memref<32x64xf32, #tpu.memory_space<vmem>>, %arg7: memref<32x32xf32, #tpu.memory_space<vmem>>, %arg8: memref<1x32xf32, #tpu.memory_space<vmem>>, %arg9: memref<1x32xf32, #tpu.memory_space<vmem>>, %arg10: memref<1x32xf32, #tpu.memory_space<vmem>>, %arg11: memref<1x32xf32, #tpu.memory_space<vmem>>, %arg12: memref<1x32xf32, #tpu.memory_space<vmem>>, %arg13: memref<32x128xf32, #tpu.memory_space<vmem>>, %arg14: memref<1x128xf32, #tpu.memory_space<vmem>>, %arg15: memref<128x32xf32, #tpu.memory_space<vmem>>, %arg16: memref<1x32xf32, #tpu.memory_space<vmem>>, %arg17: memref<1x8x32xf32, #tpu.memory_space<vmem>>, %arg18: memref<8x32xf32, #tpu.memory_space<vmem>>, %arg19: memref<8x4xf32, #tpu.memory_space<vmem>>, %arg20: memref<8x4xf32, #tpu.memory_space<vmem>>, %arg21: memref<8x32xf32, #tpu.memory_space<vmem>>) attributes {dimension_semantics = [#tpu.dimension_semantics<parallel>, #tpu.dimension_semantics<parallel>, #tpu.dimension_semantics<arbitrary>], iteration_bounds = array<i64: 2, 1, 1>, scalar_prefetch = 0 : i64, scratch_operands = 4 : i64, tpu.core_type = #tpu.core_type<tc>, window_params = [{transform_indices = @transform_0, window_bounds = array<i64: 1, 8, 32>}, {transform_indices = @transform_1, window_bounds = array<i64: 1, 8, 32>}, {pipeline_mode = #tpu.pipeline_mode<synchronous>, transform_indices = @transform_2, window_bounds = array<i64: 32, 32>}, {pipeline_mode = #tpu.pipeline_mode<synchronous>, transform_indices = @transform_3, window_bounds = array<i64: 32, 64>}, {pipeline_mode = #tpu.pipeline_mode<synchronous>, transform_indices = @transform_4, window_bounds = array<i64: 32, 32>}, {pipeline_mode = #tpu.pipeline_mode<synchronous>, transform_indices = @transform_5, window_bounds = array<i64: 1, 32>}, {pipeline_mode = #tpu.pipeline_mode<synchronous>, transform_indices = @transform_6, window_bounds = array<i64: 1, 32>}, {pipeline_mode = #tpu.pipeline_mode<synchronous>, transform_indices = @transform_7, window_bounds = array<i64: 1, 32>}, {pipeline_mode = #tpu.pipeline_mode<synchronous>, transform_indices = @transform_8, window_bounds = array<i64: 1, 32>}, {pipeline_mode = #tpu.pipeline_mode<synchronous>, transform_indices = @transform_9, window_bounds = array<i64: 1, 32>}, {pipeline_mode = #tpu.pipeline_mode<synchronous>, transform_indices = @transform_10, window_bounds = array<i64: 32, 128>}, {pipeline_mode = #tpu.pipeline_mode<synchronous>, transform_indices = @transform_11, window_bounds = array<i64: 1, 128>}, {pipeline_mode = #tpu.pipeline_mode<synchronous>, transform_indices = @transform_12, window_bounds = array<i64: 128, 32>}, {pipeline_mode = #tpu.pipeline_mode<synchronous>, transform_indices = @transform_13, window_bounds = array<i64: 1, 32>}, {transform_indices = @transform_14, window_bounds = array<i64: 1, 8, 32>}]} {
    %c0_i32 = arith.constant 0 : i32
    %0 = arith.cmpi eq, %arg2, %c0_i32 : i32
    %1 = arith.extui %0 : i1 to i32
    %c0_i32_0 = arith.constant 0 : i32
    %2 = arith.cmpi ne, %1, %c0_i32_0 : i32
    scf.if %2 {
      %c0 = arith.constant 0 : index
      %c0_3 = arith.constant 0 : index
      %c0_4 = arith.constant 0 : index
      %9 = vector.load %arg3[%c0, %c0_3, %c0_4] : memref<1x8x32xf32, #tpu.memory_space<vmem>>, vector<1x8x32xf32>
      %10 = vector.shape_cast %9 : vector<1x8x32xf32> to vector<8x32xf32>
      %c0_5 = arith.constant 0 : index
      %c0_6 = arith.constant 0 : index
      %11 = vector.load %arg9[%c0_5, %c0_6] : memref<1x32xf32, #tpu.memory_space<vmem>>, vector<1x32xf32>
      %c0_7 = arith.constant 0 : index
      %c0_8 = arith.constant 0 : index
      %12 = vector.load %arg10[%c0_7, %c0_8] : memref<1x32xf32, #tpu.memory_space<vmem>>, vector<1x32xf32>
      %cst = arith.constant dense<0.000000e+00> : vector<8xf32>
      %13 = vector.multi_reduction <add>, %10, %cst [1] : vector<8x32xf32> to vector<8xf32>
      %14 = vector.shape_cast %13 : vector<8xf32> to vector<8x1xf32>
      %cst_9 = arith.constant 3.200000e+01 : f32
      %15 = vector.broadcast %cst_9 : f32 to vector<8x1xf32>
      %16 = arith.divf %14, %15 : vector<8x1xf32>
      %17 = vector.broadcast %16 : vector<8x1xf32> to vector<8x32xf32>
      %18 = arith.subf %10, %17 : vector<8x32xf32>
      %19 = arith.mulf %18, %18 : vector<8x32xf32>
      %cst_10 = arith.constant dense<0.000000e+00> : vector<8xf32>
      %20 = vector.multi_reduction <add>, %19, %cst_10 [1] : vector<8x32xf32> to vector<8xf32>
      %21 = vector.shape_cast %20 : vector<8xf32> to vector<8x1xf32>
      %cst_11 = arith.constant 3.200000e+01 : f32
      %22 = vector.broadcast %cst_11 : f32 to vector<8x1xf32>
      %23 = arith.divf %21, %22 : vector<8x1xf32>
      %24 = vector.broadcast %16 : vector<8x1xf32> to vector<8x32xf32>
      %25 = arith.subf %10, %24 : vector<8x32xf32>
      %cst_12 = arith.constant 9.99999974E-6 : f32
      %26 = vector.broadcast %cst_12 : f32 to vector<8x1xf32>
      %27 = arith.addf %23, %26 : vector<8x1xf32>
      %28 = math.rsqrt %27 : vector<8x1xf32>
      %29 = vector.broadcast %28 : vector<8x1xf32> to vector<8x32xf32>
      %30 = arith.mulf %25, %29 : vector<8x32xf32>
      %31 = vector.broadcast %11 : vector<1x32xf32> to vector<8x32xf32>
      %32 = arith.mulf %30, %31 : vector<8x32xf32>
      %33 = vector.broadcast %12 : vector<1x32xf32> to vector<8x32xf32>
      %34 = arith.addf %32, %33 : vector<8x32xf32>
      %c0_13 = arith.constant 0 : index
      %c0_14 = arith.constant 0 : index
      %35 = vector.load %arg5[%c0_13, %c0_14] : memref<32x32xf32, #tpu.memory_space<vmem>>, vector<32x32xf32>
      %cst_15 = arith.constant dense<0.000000e+00> : vector<8x32xf32>
      %36 = tpu.matmul %34, %35, %cst_15 {dimension_numbers = #tpu.dot_dimension_numbers<[1], [0], [0], [1], [0, 0, 1, 1], [], []>} : vector<8x32xf32>, vector<32x32xf32>, vector<8x32xf32> -> vector<8x32xf32>
      %cst_16 = arith.constant 0.176776692 : f32
      %37 = vector.broadcast %cst_16 : f32 to vector<8x32xf32>
      %38 = arith.mulf %36, %37 : vector<8x32xf32>
      %c0_17 = arith.constant 0 : index
      %c0_18 = arith.constant 0 : index
      %39 = vector.load %arg18[%c0_17, %c0_18] : memref<8x32xf32, #tpu.memory_space<vmem>>, vector<8x32xf32>
      tpu.vector_store %arg18[%c0_17, %c0_18], %38 {strides = array<i32>} : memref<8x32xf32, #tpu.memory_space<vmem>>, vector<8x32xf32>,
      %cst_19 = arith.constant -1.000000e+30 : f32
      %40 = vector.broadcast %cst_19 : f32 to vector<8x4xf32>
      %c0_20 = arith.constant 0 : index
      %c0_21 = arith.constant 0 : index
      %41 = vector.load %arg19[%c0_20, %c0_21] : memref<8x4xf32, #tpu.memory_space<vmem>>, vector<8x4xf32>
      tpu.vector_store %arg19[%c0_20, %c0_21], %40 {strides = array<i32>} : memref<8x4xf32, #tpu.memory_space<vmem>>, vector<8x4xf32>,
      %cst_22 = arith.constant 0.000000e+00 : f32
      %42 = vector.broadcast %cst_22 : f32 to vector<8x4xf32>
      %c0_23 = arith.constant 0 : index
      %c0_24 = arith.constant 0 : index
      %43 = vector.load %arg20[%c0_23, %c0_24] : memref<8x4xf32, #tpu.memory_space<vmem>>, vector<8x4xf32>
      tpu.vector_store %arg20[%c0_23, %c0_24], %42 {strides = array<i32>} : memref<8x4xf32, #tpu.memory_space<vmem>>, vector<8x4xf32>,
      %cst_25 = arith.constant 0.000000e+00 : f32
      %44 = vector.broadcast %cst_25 : f32 to vector<8x32xf32>
      %c0_26 = arith.constant 0 : index
      %c0_27 = arith.constant 0 : index
      %45 = vector.load %arg21[%c0_26, %c0_27] : memref<8x32xf32, #tpu.memory_space<vmem>>, vector<8x32xf32>
      tpu.vector_store %arg21[%c0_26, %c0_27], %44 {strides = array<i32>} : memref<8x32xf32, #tpu.memory_space<vmem>>, vector<8x32xf32>,
    } else {
    }
    %3 = arith.cmpi sle, %arg2, %arg1 : i32
    %4 = arith.extui %3 : i1 to i32
    %c0_i32_1 = arith.constant 0 : i32
    %5 = arith.cmpi ne, %4, %c0_i32_1 : i32
    scf.if %5 {
      %c0 = arith.constant 0 : index
      %c0_3 = arith.constant 0 : index
      %c0_4 = arith.constant 0 : index
      %9 = vector.load %arg4[%c0, %c0_3, %c0_4] : memref<1x8x32xf32, #tpu.memory_space<vmem>>, vector<1x8x32xf32>
      %10 = vector.shape_cast %9 : vector<1x8x32xf32> to vector<8x32xf32>
      %c0_5 = arith.constant 0 : index
      %c0_6 = arith.constant 0 : index
      %11 = vector.load %arg9[%c0_5, %c0_6] : memref<1x32xf32, #tpu.memory_space<vmem>>, vector<1x32xf32>
      %c0_7 = arith.constant 0 : index
      %c0_8 = arith.constant 0 : index
      %12 = vector.load %arg10[%c0_7, %c0_8] : memref<1x32xf32, #tpu.memory_space<vmem>>, vector<1x32xf32>
      %cst = arith.constant dense<0.000000e+00> : vector<8xf32>
      %13 = vector.multi_reduction <add>, %10, %cst [1] : vector<8x32xf32> to vector<8xf32>
      %14 = vector.shape_cast %13 : vector<8xf32> to vector<8x1xf32>
      %cst_9 = arith.constant 3.200000e+01 : f32
      %15 = vector.broadcast %cst_9 : f32 to vector<8x1xf32>
      %16 = arith.divf %14, %15 : vector<8x1xf32>
      %17 = vector.broadcast %16 : vector<8x1xf32> to vector<8x32xf32>
      %18 = arith.subf %10, %17 : vector<8x32xf32>
      %19 = arith.mulf %18, %18 : vector<8x32xf32>
      %cst_10 = arith.constant dense<0.000000e+00> : vector<8xf32>
      %20 = vector.multi_reduction <add>, %19, %cst_10 [1] : vector<8x32xf32> to vector<8xf32>
      %21 = vector.shape_cast %20 : vector<8xf32> to vector<8x1xf32>
      %cst_11 = arith.constant 3.200000e+01 : f32
      %22 = vector.broadcast %cst_11 : f32 to vector<8x1xf32>
      %23 = arith.divf %21, %22 : vector<8x1xf32>
      %24 = vector.broadcast %16 : vector<8x1xf32> to vector<8x32xf32>
      %25 = arith.subf %10, %24 : vector<8x32xf32>
      %cst_12 = arith.constant 9.99999974E-6 : f32
      %26 = vector.broadcast %cst_12 : f32 to vector<8x1xf32>
      %27 = arith.addf %23, %26 : vector<8x1xf32>
      %28 = math.rsqrt %27 : vector<8x1xf32>
      %29 = vector.broadcast %28 : vector<8x1xf32> to vector<8x32xf32>
      %30 = arith.mulf %25, %29 : vector<8x32xf32>
      %31 = vector.broadcast %11 : vector<1x32xf32> to vector<8x32xf32>
      %32 = arith.mulf %30, %31 : vector<8x32xf32>
      %33 = vector.broadcast %12 : vector<1x32xf32> to vector<8x32xf32>
      %34 = arith.addf %32, %33 : vector<8x32xf32>
      %c0_13 = arith.constant 0 : index
      %c0_14 = arith.constant 0 : index
      %35 = vector.load %arg6[%c0_13, %c0_14] : memref<32x64xf32, #tpu.memory_space<vmem>>, vector<32x64xf32>
      %cst_15 = arith.constant dense<0.000000e+00> : vector<8x64xf32>
      %36 = tpu.matmul %34, %35, %cst_15 {dimension_numbers = #tpu.dot_dimension_numbers<[1], [0], [0], [1], [0, 0, 1, 1], [], []>} : vector<8x32xf32>, vector<32x64xf32>, vector<8x64xf32> -> vector<8x64xf32>
      %c8_i32 = arith.constant 8 : i32
      %37 = arith.muli %arg1, %c8_i32 : i32
      %38 = tpu.iota {dimensions = array<i32: 0>} : vector<8x8xi32>
      %39 = vector.broadcast %37 : i32 to vector<8x8xi32>
      %40 = arith.addi %39, %38 : vector<8x8xi32>
      %c8_i32_16 = arith.constant 8 : i32
      %41 = arith.muli %arg2, %c8_i32_16 : i32
      %42 = tpu.iota {dimensions = array<i32: 1>} : vector<8x8xi32>
      %43 = vector.broadcast %41 : i32 to vector<8x8xi32>
      %44 = arith.addi %43, %42 : vector<8x8xi32>
      %45 = arith.cmpi sge, %40, %44 : vector<8x8xi32>
      %c0_17 = arith.constant 0 : index
      %c0_18 = arith.constant 0 : index
      %46 = vector.load %arg18[%c0_17, %c0_18] : memref<8x32xf32, #tpu.memory_space<vmem>>, vector<8x8xf32>
      %47 = vector.extract_strided_slice %36 {offsets = [0, 0], sizes = [8, 8], strides = [1, 1]} : vector<8x64xf32> to vector<8x8xf32>
      %48 = vector.extract_strided_slice %36 {offsets = [0, 32], sizes = [8, 8], strides = [1, 1]} : vector<8x64xf32> to vector<8x8xf32>
      %cst_19 = arith.constant dense<0.000000e+00> : vector<8x8xf32>
      %49 = tpu.matmul %46, %47, %cst_19 {dimension_numbers = #tpu.dot_dimension_numbers<[1], [1], [0], [0], [0, 0, 1, 0], [], []>} : vector<8x8xf32>, vector<8x8xf32>, vector<8x8xf32> -> vector<8x8xf32>
      %cst_20 = arith.constant -1.000000e+30 : f32
      %50 = vector.broadcast %cst_20 : f32 to vector<8x8xf32>
      %51 = arith.select %45, %49, %50 : vector<8x8xi1>, vector<8x8xf32>
      %c0_21 = arith.constant 0 : index
      %c0_22 = arith.constant 0 : index
      %52 = vector.load %arg19[%c0_21, %c0_22] : memref<8x4xf32, #tpu.memory_space<vmem>>, vector<8x1xf32>
      %cst_23 = arith.constant dense<0xFF800000> : vector<8xf32>
      %53 = vector.multi_reduction <maximumf>, %51, %cst_23 [1] : vector<8x8xf32> to vector<8xf32>
      %54 = vector.shape_cast %53 : vector<8xf32> to vector<8x1xf32>
      %55 = arith.maximumf %52, %54 : vector<8x1xf32>
      %56 = arith.subf %52, %55 : vector<8x1xf32>
      %57 = math.exp %56 : vector<8x1xf32>
      %58 = vector.broadcast %55 : vector<8x1xf32> to vector<8x8xf32>
      %59 = arith.subf %51, %58 : vector<8x8xf32>
      %60 = math.exp %59 : vector<8x8xf32>
      %c0_24 = arith.constant 0 : index
      %c0_25 = arith.constant 0 : index
      %61 = vector.load %arg20[%c0_24, %c0_25] : memref<8x4xf32, #tpu.memory_space<vmem>>, vector<8x1xf32>
      %62 = arith.mulf %57, %61 : vector<8x1xf32>
      %cst_26 = arith.constant dense<0.000000e+00> : vector<8xf32>
      %63 = vector.multi_reduction <add>, %60, %cst_26 [1] : vector<8x8xf32> to vector<8xf32>
      %64 = vector.shape_cast %63 : vector<8xf32> to vector<8x1xf32>
      %65 = arith.addf %62, %64 : vector<8x1xf32>
      %c0_27 = arith.constant 0 : index
      %c0_28 = arith.constant 0 : index
      %66 = vector.load %arg20[%c0_27, %c0_28] : memref<8x4xf32, #tpu.memory_space<vmem>>, vector<8x1xf32>
      tpu.vector_store %arg20[%c0_27, %c0_28], %65 {strides = array<i32>} : memref<8x4xf32, #tpu.memory_space<vmem>>, vector<8x1xf32>,
      %c0_29 = arith.constant 0 : index
      %c0_30 = arith.constant 0 : index
      %67 = vector.load %arg21[%c0_29, %c0_30] : memref<8x32xf32, #tpu.memory_space<vmem>>, vector<8x8xf32>
      %68 = vector.broadcast %57 : vector<8x1xf32> to vector<8x8xf32>
      %69 = arith.mulf %68, %67 : vector<8x8xf32>
      %cst_31 = arith.constant dense<0.000000e+00> : vector<8x8xf32>
      %70 = tpu.matmul %60, %48, %cst_31 {dimension_numbers = #tpu.dot_dimension_numbers<[1], [0], [0], [1], [0, 0, 1, 1], [], []>} : vector<8x8xf32>, vector<8x8xf32>, vector<8x8xf32> -> vector<8x8xf32>
      %71 = arith.addf %69, %70 : vector<8x8xf32>
      %c0_32 = arith.constant 0 : index
      %c0_33 = arith.constant 0 : index
      %72 = vector.load %arg21[%c0_32, %c0_33] : memref<8x32xf32, #tpu.memory_space<vmem>>, vector<8x8xf32>
      tpu.vector_store %arg21[%c0_32, %c0_33], %71 {strides = array<i32>} : memref<8x32xf32, #tpu.memory_space<vmem>>, vector<8x8xf32>,
      %c0_34 = arith.constant 0 : index
      %c0_35 = arith.constant 0 : index
      %73 = vector.load %arg19[%c0_34, %c0_35] : memref<8x4xf32, #tpu.memory_space<vmem>>, vector<8x1xf32>
      tpu.vector_store %arg19[%c0_34, %c0_35], %55 {strides = array<i32>} : memref<8x4xf32, #tpu.memory_space<vmem>>, vector<8x1xf32>,
      %c0_36 = arith.constant 0 : index
      %c8 = arith.constant 8 : index
      %74 = vector.load %arg18[%c0_36, %c8] : memref<8x32xf32, #tpu.memory_space<vmem>>, vector<8x8xf32>
      %75 = vector.extract_strided_slice %36 {offsets = [0, 8], sizes = [8, 8], strides = [1, 1]} : vector<8x64xf32> to vector<8x8xf32>
      %76 = vector.extract_strided_slice %36 {offsets = [0, 40], sizes = [8, 8], strides = [1, 1]} : vector<8x64xf32> to vector<8x8xf32>
      %cst_37 = arith.constant dense<0.000000e+00> : vector<8x8xf32>
      %77 = tpu.matmul %74, %75, %cst_37 {dimension_numbers = #tpu.dot_dimension_numbers<[1], [1], [0], [0], [0, 0, 1, 0], [], []>} : vector<8x8xf32>, vector<8x8xf32>, vector<8x8xf32> -> vector<8x8xf32>
      %cst_38 = arith.constant -1.000000e+30 : f32
      %78 = vector.broadcast %cst_38 : f32 to vector<8x8xf32>
      %79 = arith.select %45, %77, %78 : vector<8x8xi1>, vector<8x8xf32>
      %c0_39 = arith.constant 0 : index
      %c1 = arith.constant 1 : index
      %80 = vector.load %arg19[%c0_39, %c1] : memref<8x4xf32, #tpu.memory_space<vmem>>, vector<8x1xf32>
      %cst_40 = arith.constant dense<0xFF800000> : vector<8xf32>
      %81 = vector.multi_reduction <maximumf>, %79, %cst_40 [1] : vector<8x8xf32> to vector<8xf32>
      %82 = vector.shape_cast %81 : vector<8xf32> to vector<8x1xf32>
      %83 = arith.maximumf %80, %82 : vector<8x1xf32>
      %84 = arith.subf %80, %83 : vector<8x1xf32>
      %85 = math.exp %84 : vector<8x1xf32>
      %86 = vector.broadcast %83 : vector<8x1xf32> to vector<8x8xf32>
      %87 = arith.subf %79, %86 : vector<8x8xf32>
      %88 = math.exp %87 : vector<8x8xf32>
      %c0_41 = arith.constant 0 : index
      %c1_42 = arith.constant 1 : index
      %89 = vector.load %arg20[%c0_41, %c1_42] : memref<8x4xf32, #tpu.memory_space<vmem>>, vector<8x1xf32>
      %90 = arith.mulf %85, %89 : vector<8x1xf32>
      %cst_43 = arith.constant dense<0.000000e+00> : vector<8xf32>
      %91 = vector.multi_reduction <add>, %88, %cst_43 [1] : vector<8x8xf32> to vector<8xf32>
      %92 = vector.shape_cast %91 : vector<8xf32> to vector<8x1xf32>
      %93 = arith.addf %90, %92 : vector<8x1xf32>
      %c0_44 = arith.constant 0 : index
      %c1_45 = arith.constant 1 : index
      %94 = vector.load %arg20[%c0_44, %c1_45] : memref<8x4xf32, #tpu.memory_space<vmem>>, vector<8x1xf32>
      tpu.vector_store %arg20[%c0_44, %c1_45], %93 {strides = array<i32>} : memref<8x4xf32, #tpu.memory_space<vmem>>, vector<8x1xf32>,
      %c0_46 = arith.constant 0 : index
      %c8_47 = arith.constant 8 : index
      %95 = vector.load %arg21[%c0_46, %c8_47] : memref<8x32xf32, #tpu.memory_space<vmem>>, vector<8x8xf32>
      %96 = vector.broadcast %85 : vector<8x1xf32> to vector<8x8xf32>
      %97 = arith.mulf %96, %95 : vector<8x8xf32>
      %cst_48 = arith.constant dense<0.000000e+00> : vector<8x8xf32>
      %98 = tpu.matmul %88, %76, %cst_48 {dimension_numbers = #tpu.dot_dimension_numbers<[1], [0], [0], [1], [0, 0, 1, 1], [], []>} : vector<8x8xf32>, vector<8x8xf32>, vector<8x8xf32> -> vector<8x8xf32>
      %99 = arith.addf %97, %98 : vector<8x8xf32>
      %c0_49 = arith.constant 0 : index
      %c8_50 = arith.constant 8 : index
      %100 = vector.load %arg21[%c0_49, %c8_50] : memref<8x32xf32, #tpu.memory_space<vmem>>, vector<8x8xf32>
      tpu.vector_store %arg21[%c0_49, %c8_50], %99 {strides = array<i32>} : memref<8x32xf32, #tpu.memory_space<vmem>>, vector<8x8xf32>,
      %c0_51 = arith.constant 0 : index
      %c1_52 = arith.constant 1 : index
      %101 = vector.load %arg19[%c0_51, %c1_52] : memref<8x4xf32, #tpu.memory_space<vmem>>, vector<8x1xf32>
      tpu.vector_store %arg19[%c0_51, %c1_52], %83 {strides = array<i32>} : memref<8x4xf32, #tpu.memory_space<vmem>>, vector<8x1xf32>,
      %c0_53 = arith.constant 0 : index
      %c16 = arith.constant 16 : index
      %102 = vector.load %arg18[%c0_53, %c16] : memref<8x32xf32, #tpu.memory_space<vmem>>, vector<8x8xf32>
      %103 = vector.extract_strided_slice %36 {offsets = [0, 16], sizes = [8, 8], strides = [1, 1]} : vector<8x64xf32> to vector<8x8xf32>
      %104 = vector.extract_strided_slice %36 {offsets = [0, 48], sizes = [8, 8], strides = [1, 1]} : vector<8x64xf32> to vector<8x8xf32>
      %cst_54 = arith.constant dense<0.000000e+00> : vector<8x8xf32>
      %105 = tpu.matmul %102, %103, %cst_54 {dimension_numbers = #tpu.dot_dimension_numbers<[1], [1], [0], [0], [0, 0, 1, 0], [], []>} : vector<8x8xf32>, vector<8x8xf32>, vector<8x8xf32> -> vector<8x8xf32>
      %cst_55 = arith.constant -1.000000e+30 : f32
      %106 = vector.broadcast %cst_55 : f32 to vector<8x8xf32>
      %107 = arith.select %45, %105, %106 : vector<8x8xi1>, vector<8x8xf32>
      %c0_56 = arith.constant 0 : index
      %c2 = arith.constant 2 : index
      %108 = vector.load %arg19[%c0_56, %c2] : memref<8x4xf32, #tpu.memory_space<vmem>>, vector<8x1xf32>
      %cst_57 = arith.constant dense<0xFF800000> : vector<8xf32>
      %109 = vector.multi_reduction <maximumf>, %107, %cst_57 [1] : vector<8x8xf32> to vector<8xf32>
      %110 = vector.shape_cast %109 : vector<8xf32> to vector<8x1xf32>
      %111 = arith.maximumf %108, %110 : vector<8x1xf32>
      %112 = arith.subf %108, %111 : vector<8x1xf32>
      %113 = math.exp %112 : vector<8x1xf32>
      %114 = vector.broadcast %111 : vector<8x1xf32> to vector<8x8xf32>
      %115 = arith.subf %107, %114 : vector<8x8xf32>
      %116 = math.exp %115 : vector<8x8xf32>
      %c0_58 = arith.constant 0 : index
      %c2_59 = arith.constant 2 : index
      %117 = vector.load %arg20[%c0_58, %c2_59] : memref<8x4xf32, #tpu.memory_space<vmem>>, vector<8x1xf32>
      %118 = arith.mulf %113, %117 : vector<8x1xf32>
      %cst_60 = arith.constant dense<0.000000e+00> : vector<8xf32>
      %119 = vector.multi_reduction <add>, %116, %cst_60 [1] : vector<8x8xf32> to vector<8xf32>
      %120 = vector.shape_cast %119 : vector<8xf32> to vector<8x1xf32>
      %121 = arith.addf %118, %120 : vector<8x1xf32>
      %c0_61 = arith.constant 0 : index
      %c2_62 = arith.constant 2 : index
      %122 = vector.load %arg20[%c0_61, %c2_62] : memref<8x4xf32, #tpu.memory_space<vmem>>, vector<8x1xf32>
      tpu.vector_store %arg20[%c0_61, %c2_62], %121 {strides = array<i32>} : memref<8x4xf32, #tpu.memory_space<vmem>>, vector<8x1xf32>,
      %c0_63 = arith.constant 0 : index
      %c16_64 = arith.constant 16 : index
      %123 = vector.load %arg21[%c0_63, %c16_64] : memref<8x32xf32, #tpu.memory_space<vmem>>, vector<8x8xf32>
      %124 = vector.broadcast %113 : vector<8x1xf32> to vector<8x8xf32>
      %125 = arith.mulf %124, %123 : vector<8x8xf32>
      %cst_65 = arith.constant dense<0.000000e+00> : vector<8x8xf32>
      %126 = tpu.matmul %116, %104, %cst_65 {dimension_numbers = #tpu.dot_dimension_numbers<[1], [0], [0], [1], [0, 0, 1, 1], [], []>} : vector<8x8xf32>, vector<8x8xf32>, vector<8x8xf32> -> vector<8x8xf32>
      %127 = arith.addf %125, %126 : vector<8x8xf32>
      %c0_66 = arith.constant 0 : index
      %c16_67 = arith.constant 16 : index
      %128 = vector.load %arg21[%c0_66, %c16_67] : memref<8x32xf32, #tpu.memory_space<vmem>>, vector<8x8xf32>
      tpu.vector_store %arg21[%c0_66, %c16_67], %127 {strides = array<i32>} : memref<8x32xf32, #tpu.memory_space<vmem>>, vector<8x8xf32>,
      %c0_68 = arith.constant 0 : index
      %c2_69 = arith.constant 2 : index
      %129 = vector.load %arg19[%c0_68, %c2_69] : memref<8x4xf32, #tpu.memory_space<vmem>>, vector<8x1xf32>
      tpu.vector_store %arg19[%c0_68, %c2_69], %111 {strides = array<i32>} : memref<8x4xf32, #tpu.memory_space<vmem>>, vector<8x1xf32>,
      %c0_70 = arith.constant 0 : index
      %c24 = arith.constant 24 : index
      %130 = vector.load %arg18[%c0_70, %c24] : memref<8x32xf32, #tpu.memory_space<vmem>>, vector<8x8xf32>
      %131 = vector.extract_strided_slice %36 {offsets = [0, 24], sizes = [8, 8], strides = [1, 1]} : vector<8x64xf32> to vector<8x8xf32>
      %132 = vector.extract_strided_slice %36 {offsets = [0, 56], sizes = [8, 8], strides = [1, 1]} : vector<8x64xf32> to vector<8x8xf32>
      %cst_71 = arith.constant dense<0.000000e+00> : vector<8x8xf32>
      %133 = tpu.matmul %130, %131, %cst_71 {dimension_numbers = #tpu.dot_dimension_numbers<[1], [1], [0], [0], [0, 0, 1, 0], [], []>} : vector<8x8xf32>, vector<8x8xf32>, vector<8x8xf32> -> vector<8x8xf32>
      %cst_72 = arith.constant -1.000000e+30 : f32
      %134 = vector.broadcast %cst_72 : f32 to vector<8x8xf32>
      %135 = arith.select %45, %133, %134 : vector<8x8xi1>, vector<8x8xf32>
      %c0_73 = arith.constant 0 : index
      %c3 = arith.constant 3 : index
      %136 = vector.load %arg19[%c0_73, %c3] : memref<8x4xf32, #tpu.memory_space<vmem>>, vector<8x1xf32>
      %cst_74 = arith.constant dense<0xFF800000> : vector<8xf32>
      %137 = vector.multi_reduction <maximumf>, %135, %cst_74 [1] : vector<8x8xf32> to vector<8xf32>
      %138 = vector.shape_cast %137 : vector<8xf32> to vector<8x1xf32>
      %139 = arith.maximumf %136, %138 : vector<8x1xf32>
      %140 = arith.subf %136, %139 : vector<8x1xf32>
      %141 = math.exp %140 : vector<8x1xf32>
      %142 = vector.broadcast %139 : vector<8x1xf32> to vector<8x8xf32>
      %143 = arith.subf %135, %142 : vector<8x8xf32>
      %144 = math.exp %143 : vector<8x8xf32>
      %c0_75 = arith.constant 0 : index
      %c3_76 = arith.constant 3 : index
      %145 = vector.load %arg20[%c0_75, %c3_76] : memref<8x4xf32, #tpu.memory_space<vmem>>, vector<8x1xf32>
      %146 = arith.mulf %141, %145 : vector<8x1xf32>
      %cst_77 = arith.constant dense<0.000000e+00> : vector<8xf32>
      %147 = vector.multi_reduction <add>, %144, %cst_77 [1] : vector<8x8xf32> to vector<8xf32>
      %148 = vector.shape_cast %147 : vector<8xf32> to vector<8x1xf32>
      %149 = arith.addf %146, %148 : vector<8x1xf32>
      %c0_78 = arith.constant 0 : index
      %c3_79 = arith.constant 3 : index
      %150 = vector.load %arg20[%c0_78, %c3_79] : memref<8x4xf32, #tpu.memory_space<vmem>>, vector<8x1xf32>
      tpu.vector_store %arg20[%c0_78, %c3_79], %149 {strides = array<i32>} : memref<8x4xf32, #tpu.memory_space<vmem>>, vector<8x1xf32>,
      %c0_80 = arith.constant 0 : index
      %c24_81 = arith.constant 24 : index
      %151 = vector.load %arg21[%c0_80, %c24_81] : memref<8x32xf32, #tpu.memory_space<vmem>>, vector<8x8xf32>
      %152 = vector.broadcast %141 : vector<8x1xf32> to vector<8x8xf32>
      %153 = arith.mulf %152, %151 : vector<8x8xf32>
      %cst_82 = arith.constant dense<0.000000e+00> : vector<8x8xf32>
      %154 = tpu.matmul %144, %132, %cst_82 {dimension_numbers = #tpu.dot_dimension_numbers<[1], [0], [0], [1], [0, 0, 1, 1], [], []>} : vector<8x8xf32>, vector<8x8xf32>, vector<8x8xf32> -> vector<8x8xf32>
      %155 = arith.addf %153, %154 : vector<8x8xf32>
      %c0_83 = arith.constant 0 : index
      %c24_84 = arith.constant 24 : index
      %156 = vector.load %arg21[%c0_83, %c24_84] : memref<8x32xf32, #tpu.memory_space<vmem>>, vector<8x8xf32>
      tpu.vector_store %arg21[%c0_83, %c24_84], %155 {strides = array<i32>} : memref<8x32xf32, #tpu.memory_space<vmem>>, vector<8x8xf32>,
      %c0_85 = arith.constant 0 : index
      %c3_86 = arith.constant 3 : index
      %157 = vector.load %arg19[%c0_85, %c3_86] : memref<8x4xf32, #tpu.memory_space<vmem>>, vector<8x1xf32>
      tpu.vector_store %arg19[%c0_85, %c3_86], %139 {strides = array<i32>} : memref<8x4xf32, #tpu.memory_space<vmem>>, vector<8x1xf32>,
    } else {
    }
    %6 = arith.cmpi eq, %arg2, %arg1 : i32
    %7 = arith.extui %6 : i1 to i32
    %c0_i32_2 = arith.constant 0 : i32
    %8 = arith.cmpi ne, %7, %c0_i32_2 : i32
    scf.if %8 {
      %c0 = arith.constant 0 : index
      %c0_3 = arith.constant 0 : index
      %c0_4 = arith.constant 0 : index
      %9 = vector.load %arg3[%c0, %c0_3, %c0_4] : memref<1x8x32xf32, #tpu.memory_space<vmem>>, vector<1x8x32xf32>
      %10 = vector.shape_cast %9 : vector<1x8x32xf32> to vector<8x32xf32>
      %c0_5 = arith.constant 0 : index
      %c0_6 = arith.constant 0 : index
      %11 = vector.load %arg21[%c0_5, %c0_6] : memref<8x32xf32, #tpu.memory_space<vmem>>, vector<8x8xf32>
      %c0_7 = arith.constant 0 : index
      %c0_8 = arith.constant 0 : index
      %12 = vector.load %arg20[%c0_7, %c0_8] : memref<8x4xf32, #tpu.memory_space<vmem>>, vector<8x1xf32>
      %13 = tpu.reciprocal %12 {approx = true} : vector<8x1xf32> -> vector<8x1xf32>
      %14 = vector.broadcast %13 : vector<8x1xf32> to vector<8x8xf32>
      %15 = arith.mulf %11, %14 : vector<8x8xf32>
      %c0_9 = arith.constant 0 : index
      %c0_10 = arith.constant 0 : index
      %16 = vector.load %arg21[%c0_9, %c0_10] : memref<8x32xf32, #tpu.memory_space<vmem>>, vector<8x8xf32>
      tpu.vector_store %arg21[%c0_9, %c0_10], %15 {strides = array<i32>} : memref<8x32xf32, #tpu.memory_space<vmem>>, vector<8x8xf32>,
      %c0_11 = arith.constant 0 : index
      %c8 = arith.constant 8 : index
      %17 = vector.load %arg21[%c0_11, %c8] : memref<8x32xf32, #tpu.memory_space<vmem>>, vector<8x8xf32>
      %c0_12 = arith.constant 0 : index
      %c1 = arith.constant 1 : index
      %18 = vector.load %arg20[%c0_12, %c1] : memref<8x4xf32, #tpu.memory_space<vmem>>, vector<8x1xf32>
      %19 = tpu.reciprocal %18 {approx = true} : vector<8x1xf32> -> vector<8x1xf32>
      %20 = vector.broadcast %19 : vector<8x1xf32> to vector<8x8xf32>
      %21 = arith.mulf %17, %20 : vector<8x8xf32>
      %c0_13 = arith.constant 0 : index
      %c8_14 = arith.constant 8 : index
      %22 = vector.load %arg21[%c0_13, %c8_14] : memref<8x32xf32, #tpu.memory_space<vmem>>, vector<8x8xf32>
      tpu.vector_store %arg21[%c0_13, %c8_14], %21 {strides = array<i32>} : memref<8x32xf32, #tpu.memory_space<vmem>>, vector<8x8xf32>,
      %c0_15 = arith.constant 0 : index
      %c16 = arith.constant 16 : index
      %23 = vector.load %arg21[%c0_15, %c16] : memref<8x32xf32, #tpu.memory_space<vmem>>, vector<8x8xf32>
      %c0_16 = arith.constant 0 : index
      %c2 = arith.constant 2 : index
      %24 = vector.load %arg20[%c0_16, %c2] : memref<8x4xf32, #tpu.memory_space<vmem>>, vector<8x1xf32>
      %25 = tpu.reciprocal %24 {approx = true} : vector<8x1xf32> -> vector<8x1xf32>
      %26 = vector.broadcast %25 : vector<8x1xf32> to vector<8x8xf32>
      %27 = arith.mulf %23, %26 : vector<8x8xf32>
      %c0_17 = arith.constant 0 : index
      %c16_18 = arith.constant 16 : index
      %28 = vector.load %arg21[%c0_17, %c16_18] : memref<8x32xf32, #tpu.memory_space<vmem>>, vector<8x8xf32>
      tpu.vector_store %arg21[%c0_17, %c16_18], %27 {strides = array<i32>} : memref<8x32xf32, #tpu.memory_space<vmem>>, vector<8x8xf32>,
      %c0_19 = arith.constant 0 : index
      %c24 = arith.constant 24 : index
      %29 = vector.load %arg21[%c0_19, %c24] : memref<8x32xf32, #tpu.memory_space<vmem>>, vector<8x8xf32>
      %c0_20 = arith.constant 0 : index
      %c3 = arith.constant 3 : index
      %30 = vector.load %arg20[%c0_20, %c3] : memref<8x4xf32, #tpu.memory_space<vmem>>, vector<8x1xf32>
      %31 = tpu.reciprocal %30 {approx = true} : vector<8x1xf32> -> vector<8x1xf32>
      %32 = vector.broadcast %31 : vector<8x1xf32> to vector<8x8xf32>
      %33 = arith.mulf %29, %32 : vector<8x8xf32>
      %c0_21 = arith.constant 0 : index
      %c24_22 = arith.constant 24 : index
      %34 = vector.load %arg21[%c0_21, %c24_22] : memref<8x32xf32, #tpu.memory_space<vmem>>, vector<8x8xf32>
      tpu.vector_store %arg21[%c0_21, %c24_22], %33 {strides = array<i32>} : memref<8x32xf32, #tpu.memory_space<vmem>>, vector<8x8xf32>,
      %c0_23 = arith.constant 0 : index
      %c0_24 = arith.constant 0 : index
      %35 = vector.load %arg21[%c0_23, %c0_24] : memref<8x32xf32, #tpu.memory_space<vmem>>, vector<8x32xf32>
      %c0_25 = arith.constant 0 : index
      %c0_26 = arith.constant 0 : index
      %36 = vector.load %arg7[%c0_25, %c0_26] : memref<32x32xf32, #tpu.memory_space<vmem>>, vector<32x32xf32>
      %cst = arith.constant dense<0.000000e+00> : vector<8x32xf32>
      %37 = tpu.matmul %35, %36, %cst {dimension_numbers = #tpu.dot_dimension_numbers<[1], [0], [0], [1], [0, 0, 1, 1], [], []>} : vector<8x32xf32>, vector<32x32xf32>, vector<8x32xf32> -> vector<8x32xf32>
      %c0_27 = arith.constant 0 : index
      %c0_28 = arith.constant 0 : index
      %38 = vector.load %arg8[%c0_27, %c0_28] : memref<1x32xf32, #tpu.memory_space<vmem>>, vector<1x32xf32>
      %39 = vector.broadcast %38 : vector<1x32xf32> to vector<8x32xf32>
      %40 = arith.addf %37, %39 : vector<8x32xf32>
      %41 = arith.addf %40, %10 : vector<8x32xf32>
      %c0_29 = arith.constant 0 : index
      %c0_30 = arith.constant 0 : index
      %42 = vector.load %arg11[%c0_29, %c0_30] : memref<1x32xf32, #tpu.memory_space<vmem>>, vector<1x32xf32>
      %c0_31 = arith.constant 0 : index
      %c0_32 = arith.constant 0 : index
      %43 = vector.load %arg12[%c0_31, %c0_32] : memref<1x32xf32, #tpu.memory_space<vmem>>, vector<1x32xf32>
      %cst_33 = arith.constant dense<0.000000e+00> : vector<8xf32>
      %44 = vector.multi_reduction <add>, %41, %cst_33 [1] : vector<8x32xf32> to vector<8xf32>
      %45 = vector.shape_cast %44 : vector<8xf32> to vector<8x1xf32>
      %cst_34 = arith.constant 3.200000e+01 : f32
      %46 = vector.broadcast %cst_34 : f32 to vector<8x1xf32>
      %47 = arith.divf %45, %46 : vector<8x1xf32>
      %48 = vector.broadcast %47 : vector<8x1xf32> to vector<8x32xf32>
      %49 = arith.subf %41, %48 : vector<8x32xf32>
      %50 = arith.mulf %49, %49 : vector<8x32xf32>
      %cst_35 = arith.constant dense<0.000000e+00> : vector<8xf32>
      %51 = vector.multi_reduction <add>, %50, %cst_35 [1] : vector<8x32xf32> to vector<8xf32>
      %52 = vector.shape_cast %51 : vector<8xf32> to vector<8x1xf32>
      %cst_36 = arith.constant 3.200000e+01 : f32
      %53 = vector.broadcast %cst_36 : f32 to vector<8x1xf32>
      %54 = arith.divf %52, %53 : vector<8x1xf32>
      %55 = vector.broadcast %47 : vector<8x1xf32> to vector<8x32xf32>
      %56 = arith.subf %41, %55 : vector<8x32xf32>
      %cst_37 = arith.constant 9.99999974E-6 : f32
      %57 = vector.broadcast %cst_37 : f32 to vector<8x1xf32>
      %58 = arith.addf %54, %57 : vector<8x1xf32>
      %59 = math.rsqrt %58 : vector<8x1xf32>
      %60 = vector.broadcast %59 : vector<8x1xf32> to vector<8x32xf32>
      %61 = arith.mulf %56, %60 : vector<8x32xf32>
      %62 = vector.broadcast %42 : vector<1x32xf32> to vector<8x32xf32>
      %63 = arith.mulf %61, %62 : vector<8x32xf32>
      %64 = vector.broadcast %43 : vector<1x32xf32> to vector<8x32xf32>
      %65 = arith.addf %63, %64 : vector<8x32xf32>
      %c0_38 = arith.constant 0 : index
      %c0_39 = arith.constant 0 : index
      %66 = vector.load %arg13[%c0_38, %c0_39] : memref<32x128xf32, #tpu.memory_space<vmem>>, vector<32x128xf32>
      %cst_40 = arith.constant dense<0.000000e+00> : vector<8x128xf32>
      %67 = tpu.matmul %65, %66, %cst_40 {dimension_numbers = #tpu.dot_dimension_numbers<[1], [0], [0], [1], [0, 0, 1, 1], [], []>} : vector<8x32xf32>, vector<32x128xf32>, vector<8x128xf32> -> vector<8x128xf32>
      %c0_41 = arith.constant 0 : index
      %c0_42 = arith.constant 0 : index
      %68 = vector.load %arg14[%c0_41, %c0_42] : memref<1x128xf32, #tpu.memory_space<vmem>>, vector<1x128xf32>
      %69 = vector.broadcast %68 : vector<1x128xf32> to vector<8x128xf32>
      %70 = arith.addf %67, %69 : vector<8x128xf32>
      %cst_43 = arith.constant 0.000000e+00 : f32
      %71 = vector.broadcast %cst_43 : f32 to vector<8x128xf32>
      %72 = arith.maximumf %70, %71 : vector<8x128xf32>
      %c0_44 = arith.constant 0 : index
      %c0_45 = arith.constant 0 : index
      %73 = vector.load %arg15[%c0_44, %c0_45] : memref<128x32xf32, #tpu.memory_space<vmem>>, vector<128x32xf32>
      %cst_46 = arith.constant dense<0.000000e+00> : vector<8x32xf32>
      %74 = tpu.matmul %72, %73, %cst_46 {dimension_numbers = #tpu.dot_dimension_numbers<[1], [0], [0], [1], [0, 0, 1, 1], [], []>} : vector<8x128xf32>, vector<128x32xf32>, vector<8x32xf32> -> vector<8x32xf32>
      %c0_47 = arith.constant 0 : index
      %c0_48 = arith.constant 0 : index
      %75 = vector.load %arg16[%c0_47, %c0_48] : memref<1x32xf32, #tpu.memory_space<vmem>>, vector<1x32xf32>
      %76 = vector.broadcast %75 : vector<1x32xf32> to vector<8x32xf32>
      %77 = arith.addf %74, %76 : vector<8x32xf32>
      %78 = arith.addf %77, %41 : vector<8x32xf32>
      %c0_49 = arith.constant 0 : index
      %c0_50 = arith.constant 0 : index
      %c0_51 = arith.constant 0 : index
      %79 = vector.load %arg17[%c0_49, %c0_50, %c0_51] : memref<1x8x32xf32, #tpu.memory_space<vmem>>, vector<1x8x32xf32>
      %80 = vector.shape_cast %79 : vector<1x8x32xf32> to vector<8x32xf32>
      %81 = vector.shape_cast %78 : vector<8x32xf32> to vector<1x8x32xf32>
      tpu.vector_store %arg17[%c0_49, %c0_50, %c0_51], %81 {strides = array<i32>} : memref<1x8x32xf32, #tpu.memory_space<vmem>>, vector<1x8x32xf32>,
    } else {
    }
    return
  }
  func.func @transform_0(%arg0: i32, %arg1: i32, %arg2: i32) -> (i32, i32, i32) {
    %c0_i32 = arith.constant 0 : i32
    %c0_i32_0 = arith.constant 0 : i32
    return %arg0, %arg1, %c0_i32 : i32, i32, i32
  }
  func.func @transform_1(%arg0: i32, %arg1: i32, %arg2: i32) -> (i32, i32, i32) {
    %c0_i32 = arith.constant 0 : i32
    %c0_i32_0 = arith.constant 0 : i32
    return %arg0, %arg2, %c0_i32 : i32, i32, i32
  }
  func.func @transform_2(%arg0: i32, %arg1: i32, %arg2: i32) -> (i32, i32) {
    %c0_i32 = arith.constant 0 : i32
    %c0_i32_0 = arith.constant 0 : i32
    %c0_i32_1 = arith.constant 0 : i32
    return %c0_i32, %c0_i32_0 : i32, i32
  }
  func.func @transform_3(%arg0: i32, %arg1: i32, %arg2: i32) -> (i32, i32) {
    %c0_i32 = arith.constant 0 : i32
    %c0_i32_0 = arith.constant 0 : i32
    %c0_i32_1 = arith.constant 0 : i32
    return %c0_i32, %c0_i32_0 : i32, i32
  }
  func.func @transform_4(%arg0: i32, %arg1: i32, %arg2: i32) -> (i32, i32) {
    %c0_i32 = arith.constant 0 : i32
    %c0_i32_0 = arith.constant 0 : i32
    %c0_i32_1 = arith.constant 0 : i32
    return %c0_i32, %c0_i32_0 : i32, i32
  }
  func.func @transform_5(%arg0: i32, %arg1: i32, %arg2: i32) -> (i32, i32) {
    %c0_i32 = arith.constant 0 : i32
    %c0_i32_0 = arith.constant 0 : i32
    %c0_i32_1 = arith.constant 0 : i32
    return %c0_i32, %c0_i32_0 : i32, i32
  }
  func.func @transform_6(%arg0: i32, %arg1: i32, %arg2: i32) -> (i32, i32) {
    %c0_i32 = arith.constant 0 : i32
    %c0_i32_0 = arith.constant 0 : i32
    %c0_i32_1 = arith.constant 0 : i32
    return %c0_i32, %c0_i32_0 : i32, i32
  }
  func.func @transform_7(%arg0: i32, %arg1: i32, %arg2: i32) -> (i32, i32) {
    %c0_i32 = arith.constant 0 : i32
    %c0_i32_0 = arith.constant 0 : i32
    %c0_i32_1 = arith.constant 0 : i32
    return %c0_i32, %c0_i32_0 : i32, i32
  }
  func.func @transform_8(%arg0: i32, %arg1: i32, %arg2: i32) -> (i32, i32) {
    %c0_i32 = arith.constant 0 : i32
    %c0_i32_0 = arith.constant 0 : i32
    %c0_i32_1 = arith.constant 0 : i32
    return %c0_i32, %c0_i32_0 : i32, i32
  }
  func.func @transform_9(%arg0: i32, %arg1: i32, %arg2: i32) -> (i32, i32) {
    %c0_i32 = arith.constant 0 : i32
    %c0_i32_0 = arith.constant 0 : i32
    %c0_i32_1 = arith.constant 0 : i32
    return %c0_i32, %c0_i32_0 : i32, i32
  }
  func.func @transform_10(%arg0: i32, %arg1: i32, %arg2: i32) -> (i32, i32) {
    %c0_i32 = arith.constant 0 : i32
    %c0_i32_0 = arith.constant 0 : i32
    %c0_i32_1 = arith.constant 0 : i32
    return %c0_i32, %c0_i32_0 : i32, i32
  }
  func.func @transform_11(%arg0: i32, %arg1: i32, %arg2: i32) -> (i32, i32) {
    %c0_i32 = arith.constant 0 : i32
    %c0_i32_0 = arith.constant 0 : i32
    %c0_i32_1 = arith.constant 0 : i32
    return %c0_i32, %c0_i32_0 : i32, i32
  }
  func.func @transform_12(%arg0: i32, %arg1: i32, %arg2: i32) -> (i32, i32) {
    %c0_i32 = arith.constant 0 : i32
    %c0_i32_0 = arith.constant 0 : i32
    %c0_i32_1 = arith.constant 0 : i32
    return %c0_i32, %c0_i32_0 : i32, i32
  }
  func.func @transform_13(%arg0: i32, %arg1: i32, %arg2: i32) -> (i32, i32) {
    %c0_i32 = arith.constant 0 : i32
    %c0_i32_0 = arith.constant 0 : i32
    %c0_i32_1 = arith.constant 0 : i32
    return %c0_i32, %c0_i32_0 : i32, i32
  }
  func.func @transform_14(%arg0: i32, %arg1: i32, %arg2: i32) -> (i32, i32, i32) {
    %c0_i32 = arith.constant 0 : i32
    %c0_i32_0 = arith.constant 0 : i32
    return %arg0, %arg1, %c0_i32 : i32, i32, i32
  }
}

module attributes {stable_mosaic.version = 11 : i64} {
  func.func @block_kernel(%arg0: i32, %arg1: i32, %arg2: i32, %arg3: memref<1x8x32xf32, #tpu.memory_space<vmem>>, %arg4: memref<1x8x32xf32, #tpu.memory_space<vmem>>, %arg5: memref<32x32xf32, #tpu.memory_space<vmem>>, %arg6: memref<32x64xf32, #tpu.memory_space<vmem>>, %arg7: memref<32x32xf32, #tpu.memory_space<vmem>>, %arg8: memref<1x32xf32, #tpu.memory_space<vmem>>, %arg9: memref<1x32xf32, #tpu.memory_space<vmem>>, %arg10: memref<1x32xf32, #tpu.memory_space<vmem>>, %arg11: memref<1x32xf32, #tpu.memory_space<vmem>>, %arg12: memref<1x32xf32, #tpu.memory_space<vmem>>, %arg13: memref<32x128xf32, #tpu.memory_space<vmem>>, %arg14: memref<1x128xf32, #tpu.memory_space<vmem>>, %arg15: memref<128x32xf32, #tpu.memory_space<vmem>>, %arg16: memref<1x32xf32, #tpu.memory_space<vmem>>, %arg17: memref<1x8x32xf32, #tpu.memory_space<vmem>>, %arg18: memref<8x32xf32, #tpu.memory_space<vmem>>, %arg19: memref<8x4xf32, #tpu.memory_space<vmem>>, %arg20: memref<8x4xf32, #tpu.memory_space<vmem>>, %arg21: memref<8x32xf32, #tpu.memory_space<vmem>>) attributes {dimension_semantics = [#tpu.dimension_semantics<parallel>, #tpu.dimension_semantics<parallel>, #tpu.dimension_semantics<arbitrary>], iteration_bounds = array<i64: 2, 1, 1>, scalar_prefetch = 0 : i64, scratch_operands = 4 : i64, tpu.core_type = #tpu.core_type<tc>, window_params = [{transform_indices = @transform_0, window_bounds = array<i64: 1, 8, 32>}, {transform_indices = @transform_1, window_bounds = array<i64: 1, 8, 32>}, {pipeline_mode = #tpu.pipeline_mode<synchronous>, transform_indices = @transform_2, window_bounds = array<i64: 32, 32>}, {pipeline_mode = #tpu.pipeline_mode<synchronous>, transform_indices = @transform_3, window_bounds = array<i64: 32, 64>}, {pipeline_mode = #tpu.pipeline_mode<synchronous>, transform_indices = @transform_4, window_bounds = array<i64: 32, 32>}, {pipeline_mode = #tpu.pipeline_mode<synchronous>, transform_indices = @transform_5, window_bounds = array<i64: 1, 32>}, {pipeline_mode = #tpu.pipeline_mode<synchronous>, transform_indices = @transform_6, window_bounds = array<i64: 1, 32>}, {pipeline_mode = #tpu.pipeline_mode<synchronous>, transform_indices = @transform_7, window_bounds = array<i64: 1, 32>}, {pipeline_mode = #tpu.pipeline_mode<synchronous>, transform_indices = @transform_8, window_bounds = array<i64: 1, 32>}, {pipeline_mode = #tpu.pipeline_mode<synchronous>, transform_indices = @transform_9, window_bounds = array<i64: 1, 32>}, {pipeline_mode = #tpu.pipeline_mode<synchronous>, transform_indices = @transform_10, window_bounds = array<i64: 32, 128>}, {pipeline_mode = #tpu.pipeline_mode<synchronous>, transform_indices = @transform_11, window_bounds = array<i64: 1, 128>}, {pipeline_mode = #tpu.pipeline_mode<synchronous>, transform_indices = @transform_12, window_bounds = array<i64: 128, 32>}, {pipeline_mode = #tpu.pipeline_mode<synchronous>, transform_indices = @transform_13, window_bounds = array<i64: 1, 32>}, {transform_indices = @transform_14, window_bounds = array<i64: 1, 8, 32>}]} {
    %c0_i32 = arith.constant 0 : i32
    %0 = arith.cmpi eq, %arg2, %c0_i32 : i32
    %1 = arith.extui %0 : i1 to i32
    %c0_i32_0 = arith.constant 0 : i32
    %2 = arith.cmpi ne, %1, %c0_i32_0 : i32
    scf.if %2 {
      %c0 = arith.constant 0 : index
      %c0_3 = arith.constant 0 : index
      %c0_4 = arith.constant 0 : index
      %9 = vector.load %arg3[%c0, %c0_3, %c0_4] : memref<1x8x32xf32, #tpu.memory_space<vmem>>, vector<1x8x32xf32>
      %10 = vector.shape_cast %9 : vector<1x8x32xf32> to vector<8x32xf32>
      %c0_5 = arith.constant 0 : index
      %c0_6 = arith.constant 0 : index
      %11 = vector.load %arg9[%c0_5, %c0_6] : memref<1x32xf32, #tpu.memory_space<vmem>>, vector<1x32xf32>
      %c0_7 = arith.constant 0 : index
      %c0_8 = arith.constant 0 : index
      %12 = vector.load %arg10[%c0_7, %c0_8] : memref<1x32xf32, #tpu.memory_space<vmem>>, vector<1x32xf32>
      %cst = arith.constant dense<0.000000e+00> : vector<8xf32>
      %13 = vector.multi_reduction <add>, %10, %cst [1] : vector<8x32xf32> to vector<8xf32>
      %14 = vector.shape_cast %13 : vector<8xf32> to vector<8x1xf32>
      %cst_9 = arith.constant 3.200000e+01 : f32
      %15 = vector.broadcast %cst_9 : f32 to vector<8x1xf32>
      %16 = arith.divf %14, %15 : vector<8x1xf32>
      %17 = vector.broadcast %16 : vector<8x1xf32> to vector<8x32xf32>
      %18 = arith.subf %10, %17 : vector<8x32xf32>
      %19 = arith.mulf %18, %18 : vector<8x32xf32>
      %cst_10 = arith.constant dense<0.000000e+00> : vector<8xf32>
      %20 = vector.multi_reduction <add>, %19, %cst_10 [1] : vector<8x32xf32> to vector<8xf32>
      %21 = vector.shape_cast %20 : vector<8xf32> to vector<8x1xf32>
      %cst_11 = arith.constant 3.200000e+01 : f32
      %22 = vector.broadcast %cst_11 : f32 to vector<8x1xf32>
      %23 = arith.divf %21, %22 : vector<8x1xf32>
      %24 = vector.broadcast %16 : vector<8x1xf32> to vector<8x32xf32>
      %25 = arith.subf %10, %24 : vector<8x32xf32>
      %cst_12 = arith.constant 9.99999974E-6 : f32
      %26 = vector.broadcast %cst_12 : f32 to vector<8x1xf32>
      %27 = arith.addf %23, %26 : vector<8x1xf32>
      %28 = math.rsqrt %27 : vector<8x1xf32>
      %29 = vector.broadcast %28 : vector<8x1xf32> to vector<8x32xf32>
      %30 = arith.mulf %25, %29 : vector<8x32xf32>
      %31 = vector.broadcast %11 : vector<1x32xf32> to vector<8x32xf32>
      %32 = arith.mulf %30, %31 : vector<8x32xf32>
      %33 = vector.broadcast %12 : vector<1x32xf32> to vector<8x32xf32>
      %34 = arith.addf %32, %33 : vector<8x32xf32>
      %c0_13 = arith.constant 0 : index
      %c0_14 = arith.constant 0 : index
      %35 = vector.load %arg5[%c0_13, %c0_14] : memref<32x32xf32, #tpu.memory_space<vmem>>, vector<32x32xf32>
      %cst_15 = arith.constant dense<0.000000e+00> : vector<8x32xf32>
      %36 = tpu.matmul %34, %35, %cst_15 {dimension_numbers = #tpu.dot_dimension_numbers<[1], [0], [0], [1], [0, 0, 1, 1], [], []>} : vector<8x32xf32>, vector<32x32xf32>, vector<8x32xf32> -> vector<8x32xf32>
      %cst_16 = arith.constant 0.176776692 : f32
      %37 = vector.broadcast %cst_16 : f32 to vector<8x32xf32>
      %38 = arith.mulf %36, %37 : vector<8x32xf32>
      %c0_17 = arith.constant 0 : index
      %c0_18 = arith.constant 0 : index
      %39 = vector.load %arg18[%c0_17, %c0_18] : memref<8x32xf32, #tpu.memory_space<vmem>>, vector<8x32xf32>
      tpu.vector_store %arg18[%c0_17, %c0_18], %38 {strides = array<i32>} : memref<8x32xf32, #tpu.memory_space<vmem>>, vector<8x32xf32>,
      %cst_19 = arith.constant -1.000000e+30 : f32
      %40 = vector.broadcast %cst_19 : f32 to vector<8x4xf32>
      %c0_20 = arith.constant 0 : index
      %c0_21 = arith.constant 0 : index
      %41 = vector.load %arg19[%c0_20, %c0_21] : memref<8x4xf32, #tpu.memory_space<vmem>>, vector<8x4xf32>
      tpu.vector_store %arg19[%c0_20, %c0_21], %40 {strides = array<i32>} : memref<8x4xf32, #tpu.memory_space<vmem>>, vector<8x4xf32>,
      %cst_22 = arith.constant 0.000000e+00 : f32
      %42 = vector.broadcast %cst_22 : f32 to vector<8x4xf32>
      %c0_23 = arith.constant 0 : index
      %c0_24 = arith.constant 0 : index
      %43 = vector.load %arg20[%c0_23, %c0_24] : memref<8x4xf32, #tpu.memory_space<vmem>>, vector<8x4xf32>
      tpu.vector_store %arg20[%c0_23, %c0_24], %42 {strides = array<i32>} : memref<8x4xf32, #tpu.memory_space<vmem>>, vector<8x4xf32>,
      %cst_25 = arith.constant 0.000000e+00 : f32
      %44 = vector.broadcast %cst_25 : f32 to vector<8x32xf32>
      %c0_26 = arith.constant 0 : index
      %c0_27 = arith.constant 0 : index
      %45 = vector.load %arg21[%c0_26, %c0_27] : memref<8x32xf32, #tpu.memory_space<vmem>>, vector<8x32xf32>
      tpu.vector_store %arg21[%c0_26, %c0_27], %44 {strides = array<i32>} : memref<8x32xf32, #tpu.memory_space<vmem>>, vector<8x32xf32>,
    } else {
    }
    %3 = arith.cmpi sle, %arg2, %arg1 : i32
    %4 = arith.extui %3 : i1 to i32
    %c0_i32_1 = arith.constant 0 : i32
    %5 = arith.cmpi ne, %4, %c0_i32_1 : i32
    scf.if %5 {
      %c0 = arith.constant 0 : index
      %c0_3 = arith.constant 0 : index
      %c0_4 = arith.constant 0 : index
      %9 = vector.load %arg4[%c0, %c0_3, %c0_4] : memref<1x8x32xf32, #tpu.memory_space<vmem>>, vector<1x8x32xf32>
      %10 = vector.shape_cast %9 : vector<1x8x32xf32> to vector<8x32xf32>
      %c0_5 = arith.constant 0 : index
      %c0_6 = arith.constant 0 : index
      %11 = vector.load %arg9[%c0_5, %c0_6] : memref<1x32xf32, #tpu.memory_space<vmem>>, vector<1x32xf32>
      %c0_7 = arith.constant 0 : index
      %c0_8 = arith.constant 0 : index
      %12 = vector.load %arg10[%c0_7, %c0_8] : memref<1x32xf32, #tpu.memory_space<vmem>>, vector<1x32xf32>
      %cst = arith.constant dense<0.000000e+00> : vector<8xf32>
      %13 = vector.multi_reduction <add>, %10, %cst [1] : vector<8x32xf32> to vector<8xf32>
      %14 = vector.shape_cast %13 : vector<8xf32> to vector<8x1xf32>
      %cst_9 = arith.constant 3.200000e+01 : f32
      %15 = vector.broadcast %cst_9 : f32 to vector<8x1xf32>
      %16 = arith.divf %14, %15 : vector<8x1xf32>
      %17 = vector.broadcast %16 : vector<8x1xf32> to vector<8x32xf32>
      %18 = arith.subf %10, %17 : vector<8x32xf32>
      %19 = arith.mulf %18, %18 : vector<8x32xf32>
      %cst_10 = arith.constant dense<0.000000e+00> : vector<8xf32>
      %20 = vector.multi_reduction <add>, %19, %cst_10 [1] : vector<8x32xf32> to vector<8xf32>
      %21 = vector.shape_cast %20 : vector<8xf32> to vector<8x1xf32>
      %cst_11 = arith.constant 3.200000e+01 : f32
      %22 = vector.broadcast %cst_11 : f32 to vector<8x1xf32>
      %23 = arith.divf %21, %22 : vector<8x1xf32>
      %24 = vector.broadcast %16 : vector<8x1xf32> to vector<8x32xf32>
      %25 = arith.subf %10, %24 : vector<8x32xf32>
      %cst_12 = arith.constant 9.99999974E-6 : f32
      %26 = vector.broadcast %cst_12 : f32 to vector<8x1xf32>
      %27 = arith.addf %23, %26 : vector<8x1xf32>
      %28 = math.rsqrt %27 : vector<8x1xf32>
      %29 = vector.broadcast %28 : vector<8x1xf32> to vector<8x32xf32>
      %30 = arith.mulf %25, %29 : vector<8x32xf32>
      %31 = vector.broadcast %11 : vector<1x32xf32> to vector<8x32xf32>
      %32 = arith.mulf %30, %31 : vector<8x32xf32>
      %33 = vector.broadcast %12 : vector<1x32xf32> to vector<8x32xf32>
      %34 = arith.addf %32, %33 : vector<8x32xf32>
      %c0_13 = arith.constant 0 : index
      %c0_14 = arith.constant 0 : index
      %35 = vector.load %arg6[%c0_13, %c0_14] : memref<32x64xf32, #tpu.memory_space<vmem>>, vector<32x64xf32>
      %cst_15 = arith.constant dense<0.000000e+00> : vector<8x64xf32>
      %36 = tpu.matmul %34, %35, %cst_15 {dimension_numbers = #tpu.dot_dimension_numbers<[1], [0], [0], [1], [0, 0, 1, 1], [], []>} : vector<8x32xf32>, vector<32x64xf32>, vector<8x64xf32> -> vector<8x64xf32>
      %c8_i32 = arith.constant 8 : i32
      %37 = arith.muli %arg1, %c8_i32 : i32
      %38 = tpu.iota {dimensions = array<i32: 0>} : vector<8x8xi32>
      %39 = vector.broadcast %37 : i32 to vector<8x8xi32>
      %40 = arith.addi %39, %38 : vector<8x8xi32>
      %c8_i32_16 = arith.constant 8 : i32
      %41 = arith.muli %arg2, %c8_i32_16 : i32
      %42 = tpu.iota {dimensions = array<i32: 1>} : vector<8x8xi32>
      %43 = vector.broadcast %41 : i32 to vector<8x8xi32>
      %44 = arith.addi %43, %42 : vector<8x8xi32>
      %45 = arith.cmpi sge, %40, %44 : vector<8x8xi32>
      %c0_17 = arith.constant 0 : index
      %c0_18 = arith.constant 0 : index
      %46 = vector.load %arg18[%c0_17, %c0_18] : memref<8x32xf32, #tpu.memory_space<vmem>>, vector<8x8xf32>
      %47 = vector.extract_strided_slice %36 {offsets = [0, 0], sizes = [8, 8], strides = [1, 1]} : vector<8x64xf32> to vector<8x8xf32>
      %48 = vector.extract_strided_slice %36 {offsets = [0, 32], sizes = [8, 8], strides = [1, 1]} : vector<8x64xf32> to vector<8x8xf32>
      %cst_19 = arith.constant dense<0.000000e+00> : vector<8x8xf32>
      %49 = tpu.matmul %46, %47, %cst_19 {dimension_numbers = #tpu.dot_dimension_numbers<[1], [1], [0], [0], [0, 0, 1, 0], [], []>} : vector<8x8xf32>, vector<8x8xf32>, vector<8x8xf32> -> vector<8x8xf32>
      %cst_20 = arith.constant -1.000000e+30 : f32
      %50 = vector.broadcast %cst_20 : f32 to vector<8x8xf32>
      %51 = arith.select %45, %49, %50 : vector<8x8xi1>, vector<8x8xf32>
      %c0_21 = arith.constant 0 : index
      %c0_22 = arith.constant 0 : index
      %52 = vector.load %arg19[%c0_21, %c0_22] : memref<8x4xf32, #tpu.memory_space<vmem>>, vector<8x1xf32>
      %cst_23 = arith.constant dense<0xFF800000> : vector<8xf32>
      %53 = vector.multi_reduction <maximumf>, %51, %cst_23 [1] : vector<8x8xf32> to vector<8xf32>
      %54 = vector.shape_cast %53 : vector<8xf32> to vector<8x1xf32>
      %55 = arith.maximumf %52, %54 : vector<8x1xf32>
      %56 = arith.subf %52, %55 : vector<8x1xf32>
      %57 = math.exp %56 : vector<8x1xf32>
      %58 = vector.broadcast %55 : vector<8x1xf32> to vector<8x8xf32>
      %59 = arith.subf %51, %58 : vector<8x8xf32>
      %60 = math.exp %59 : vector<8x8xf32>
      %c0_24 = arith.constant 0 : index
      %c0_25 = arith.constant 0 : index
      %61 = vector.load %arg20[%c0_24, %c0_25] : memref<8x4xf32, #tpu.memory_space<vmem>>, vector<8x1xf32>
      %62 = arith.mulf %57, %61 : vector<8x1xf32>
      %cst_26 = arith.constant dense<0.000000e+00> : vector<8xf32>
      %63 = vector.multi_reduction <add>, %60, %cst_26 [1] : vector<8x8xf32> to vector<8xf32>
      %64 = vector.shape_cast %63 : vector<8xf32> to vector<8x1xf32>
      %65 = arith.addf %62, %64 : vector<8x1xf32>
      %c0_27 = arith.constant 0 : index
      %c0_28 = arith.constant 0 : index
      %66 = vector.load %arg20[%c0_27, %c0_28] : memref<8x4xf32, #tpu.memory_space<vmem>>, vector<8x1xf32>
      tpu.vector_store %arg20[%c0_27, %c0_28], %65 {strides = array<i32>} : memref<8x4xf32, #tpu.memory_space<vmem>>, vector<8x1xf32>,
      %c0_29 = arith.constant 0 : index
      %c0_30 = arith.constant 0 : index
      %67 = vector.load %arg21[%c0_29, %c0_30] : memref<8x32xf32, #tpu.memory_space<vmem>>, vector<8x8xf32>
      %68 = vector.broadcast %57 : vector<8x1xf32> to vector<8x8xf32>
      %69 = arith.mulf %68, %67 : vector<8x8xf32>
      %cst_31 = arith.constant dense<0.000000e+00> : vector<8x8xf32>
      %70 = tpu.matmul %60, %48, %cst_31 {dimension_numbers = #tpu.dot_dimension_numbers<[1], [0], [0], [1], [0, 0, 1, 1], [], []>} : vector<8x8xf32>, vector<8x8xf32>, vector<8x8xf32> -> vector<8x8xf32>
      %71 = arith.addf %69, %70 : vector<8x8xf32>
      %c0_32 = arith.constant 0 : index
      %c0_33 = arith.constant 0 : index
      %72 = vector.load %arg21[%c0_32, %c0_33] : memref<8x32xf32, #tpu.memory_space<vmem>>, vector<8x8xf32>
      tpu.vector_store %arg21[%c0_32, %c0_33], %71 {strides = array<i32>} : memref<8x32xf32, #tpu.memory_space<vmem>>, vector<8x8xf32>,
      %c0_34 = arith.constant 0 : index
      %c0_35 = arith.constant 0 : index
      %73 = vector.load %arg19[%c0_34, %c0_35] : memref<8x4xf32, #tpu.memory_space<vmem>>, vector<8x1xf32>
      tpu.vector_store %arg19[%c0_34, %c0_35], %55 {strides = array<i32>} : memref<8x4xf32, #tpu.memory_space<vmem>>, vector<8x1xf32>,
      %c0_36 = arith.constant 0 : index
      %c8 = arith.constant 8 : index
      %74 = vector.load %arg18[%c0_36, %c8] : memref<8x32xf32, #tpu.memory_space<vmem>>, vector<8x8xf32>
      %75 = vector.extract_strided_slice %36 {offsets = [0, 8], sizes = [8, 8], strides = [1, 1]} : vector<8x64xf32> to vector<8x8xf32>
      %76 = vector.extract_strided_slice %36 {offsets = [0, 40], sizes = [8, 8], strides = [1, 1]} : vector<8x64xf32> to vector<8x8xf32>
      %cst_37 = arith.constant dense<0.000000e+00> : vector<8x8xf32>
      %77 = tpu.matmul %74, %75, %cst_37 {dimension_numbers = #tpu.dot_dimension_numbers<[1], [1], [0], [0], [0, 0, 1, 0], [], []>} : vector<8x8xf32>, vector<8x8xf32>, vector<8x8xf32> -> vector<8x8xf32>
      %cst_38 = arith.constant -1.000000e+30 : f32
      %78 = vector.broadcast %cst_38 : f32 to vector<8x8xf32>
      %79 = arith.select %45, %77, %78 : vector<8x8xi1>, vector<8x8xf32>
      %c0_39 = arith.constant 0 : index
      %c1 = arith.constant 1 : index
      %80 = vector.load %arg19[%c0_39, %c1] : memref<8x4xf32, #tpu.memory_space<vmem>>, vector<8x1xf32>
      %cst_40 = arith.constant dense<0xFF800000> : vector<8xf32>
      %81 = vector.multi_reduction <maximumf>, %79, %cst_40 [1] : vector<8x8xf32> to vector<8xf32>
      %82 = vector.shape_cast %81 : vector<8xf32> to vector<8x1xf32>
      %83 = arith.maximumf %80, %82 : vector<8x1xf32>
      %84 = arith.subf %80, %83 : vector<8x1xf32>
      %85 = math.exp %84 : vector<8x1xf32>
      %86 = vector.broadcast %83 : vector<8x1xf32> to vector<8x8xf32>
      %87 = arith.subf %79, %86 : vector<8x8xf32>
      %88 = math.exp %87 : vector<8x8xf32>
      %c0_41 = arith.constant 0 : index
      %c1_42 = arith.constant 1 : index
      %89 = vector.load %arg20[%c0_41, %c1_42] : memref<8x4xf32, #tpu.memory_space<vmem>>, vector<8x1xf32>
      %90 = arith.mulf %85, %89 : vector<8x1xf32>
      %cst_43 = arith.constant dense<0.000000e+00> : vector<8xf32>
      %91 = vector.multi_reduction <add>, %88, %cst_43 [1] : vector<8x8xf32> to vector<8xf32>
      %92 = vector.shape_cast %91 : vector<8xf32> to vector<8x1xf32>
      %93 = arith.addf %90, %92 : vector<8x1xf32>
      %c0_44 = arith.constant 0 : index
      %c1_45 = arith.constant 1 : index
      %94 = vector.load %arg20[%c0_44, %c1_45] : memref<8x4xf32, #tpu.memory_space<vmem>>, vector<8x1xf32>
      tpu.vector_store %arg20[%c0_44, %c1_45], %93 {strides = array<i32>} : memref<8x4xf32, #tpu.memory_space<vmem>>, vector<8x1xf32>,
      %c0_46 = arith.constant 0 : index
      %c8_47 = arith.constant 8 : index
      %95 = vector.load %arg21[%c0_46, %c8_47] : memref<8x32xf32, #tpu.memory_space<vmem>>, vector<8x8xf32>
      %96 = vector.broadcast %85 : vector<8x1xf32> to vector<8x8xf32>
      %97 = arith.mulf %96, %95 : vector<8x8xf32>
      %cst_48 = arith.constant dense<0.000000e+00> : vector<8x8xf32>
      %98 = tpu.matmul %88, %76, %cst_48 {dimension_numbers = #tpu.dot_dimension_numbers<[1], [0], [0], [1], [0, 0, 1, 1], [], []>} : vector<8x8xf32>, vector<8x8xf32>, vector<8x8xf32> -> vector<8x8xf32>
      %99 = arith.addf %97, %98 : vector<8x8xf32>
      %c0_49 = arith.constant 0 : index
      %c8_50 = arith.constant 8 : index
      %100 = vector.load %arg21[%c0_49, %c8_50] : memref<8x32xf32, #tpu.memory_space<vmem>>, vector<8x8xf32>
      tpu.vector_store %arg21[%c0_49, %c8_50], %99 {strides = array<i32>} : memref<8x32xf32, #tpu.memory_space<vmem>>, vector<8x8xf32>,
      %c0_51 = arith.constant 0 : index
      %c1_52 = arith.constant 1 : index
      %101 = vector.load %arg19[%c0_51, %c1_52] : memref<8x4xf32, #tpu.memory_space<vmem>>, vector<8x1xf32>
      tpu.vector_store %arg19[%c0_51, %c1_52], %83 {strides = array<i32>} : memref<8x4xf32, #tpu.memory_space<vmem>>, vector<8x1xf32>,
      %c0_53 = arith.constant 0 : index
      %c16 = arith.constant 16 : index
      %102 = vector.load %arg18[%c0_53, %c16] : memref<8x32xf32, #tpu.memory_space<vmem>>, vector<8x8xf32>
      %103 = vector.extract_strided_slice %36 {offsets = [0, 16], sizes = [8, 8], strides = [1, 1]} : vector<8x64xf32> to vector<8x8xf32>
      %104 = vector.extract_strided_slice %36 {offsets = [0, 48], sizes = [8, 8], strides = [1, 1]} : vector<8x64xf32> to vector<8x8xf32>
      %cst_54 = arith.constant dense<0.000000e+00> : vector<8x8xf32>
      %105 = tpu.matmul %102, %103, %cst_54 {dimension_numbers = #tpu.dot_dimension_numbers<[1], [1], [0], [0], [0, 0, 1, 0], [], []>} : vector<8x8xf32>, vector<8x8xf32>, vector<8x8xf32> -> vector<8x8xf32>
      %cst_55 = arith.constant -1.000000e+30 : f32
      %106 = vector.broadcast %cst_55 : f32 to vector<8x8xf32>
      %107 = arith.select %45, %105, %106 : vector<8x8xi1>, vector<8x8xf32>
      %c0_56 = arith.constant 0 : index
      %c2 = arith.constant 2 : index
      %108 = vector.load %arg19[%c0_56, %c2] : memref<8x4xf32, #tpu.memory_space<vmem>>, vector<8x1xf32>
      %cst_57 = arith.constant dense<0xFF800000> : vector<8xf32>
      %109 = vector.multi_reduction <maximumf>, %107, %cst_57 [1] : vector<8x8xf32> to vector<8xf32>
      %110 = vector.shape_cast %109 : vector<8xf32> to vector<8x1xf32>
      %111 = arith.maximumf %108, %110 : vector<8x1xf32>
      %112 = arith.subf %108, %111 : vector<8x1xf32>
      %113 = math.exp %112 : vector<8x1xf32>
      %114 = vector.broadcast %111 : vector<8x1xf32> to vector<8x8xf32>
      %115 = arith.subf %107, %114 : vector<8x8xf32>
      %116 = math.exp %115 : vector<8x8xf32>
      %c0_58 = arith.constant 0 : index
      %c2_59 = arith.constant 2 : index
      %117 = vector.load %arg20[%c0_58, %c2_59] : memref<8x4xf32, #tpu.memory_space<vmem>>, vector<8x1xf32>
      %118 = arith.mulf %113, %117 : vector<8x1xf32>
      %cst_60 = arith.constant dense<0.000000e+00> : vector<8xf32>
      %119 = vector.multi_reduction <add>, %116, %cst_60 [1] : vector<8x8xf32> to vector<8xf32>
      %120 = vector.shape_cast %119 : vector<8xf32> to vector<8x1xf32>
      %121 = arith.addf %118, %120 : vector<8x1xf32>
      %c0_61 = arith.constant 0 : index
      %c2_62 = arith.constant 2 : index
      %122 = vector.load %arg20[%c0_61, %c2_62] : memref<8x4xf32, #tpu.memory_space<vmem>>, vector<8x1xf32>
      tpu.vector_store %arg20[%c0_61, %c2_62], %121 {strides = array<i32>} : memref<8x4xf32, #tpu.memory_space<vmem>>, vector<8x1xf32>,
      %c0_63 = arith.constant 0 : index
      %c16_64 = arith.constant 16 : index
      %123 = vector.load %arg21[%c0_63, %c16_64] : memref<8x32xf32, #tpu.memory_space<vmem>>, vector<8x8xf32>
      %124 = vector.broadcast %113 : vector<8x1xf32> to vector<8x8xf32>
      %125 = arith.mulf %124, %123 : vector<8x8xf32>
      %cst_65 = arith.constant dense<0.000000e+00> : vector<8x8xf32>
      %126 = tpu.matmul %116, %104, %cst_65 {dimension_numbers = #tpu.dot_dimension_numbers<[1], [0], [0], [1], [0, 0, 1, 1], [], []>} : vector<8x8xf32>, vector<8x8xf32>, vector<8x8xf32> -> vector<8x8xf32>
      %127 = arith.addf %125, %126 : vector<8x8xf32>
      %c0_66 = arith.constant 0 : index
      %c16_67 = arith.constant 16 : index
      %128 = vector.load %arg21[%c0_66, %c16_67] : memref<8x32xf32, #tpu.memory_space<vmem>>, vector<8x8xf32>
      tpu.vector_store %arg21[%c0_66, %c16_67], %127 {strides = array<i32>} : memref<8x32xf32, #tpu.memory_space<vmem>>, vector<8x8xf32>,
      %c0_68 = arith.constant 0 : index
      %c2_69 = arith.constant 2 : index
      %129 = vector.load %arg19[%c0_68, %c2_69] : memref<8x4xf32, #tpu.memory_space<vmem>>, vector<8x1xf32>
      tpu.vector_store %arg19[%c0_68, %c2_69], %111 {strides = array<i32>} : memref<8x4xf32, #tpu.memory_space<vmem>>, vector<8x1xf32>,
      %c0_70 = arith.constant 0 : index
      %c24 = arith.constant 24 : index
      %130 = vector.load %arg18[%c0_70, %c24] : memref<8x32xf32, #tpu.memory_space<vmem>>, vector<8x8xf32>
      %131 = vector.extract_strided_slice %36 {offsets = [0, 24], sizes = [8, 8], strides = [1, 1]} : vector<8x64xf32> to vector<8x8xf32>
      %132 = vector.extract_strided_slice %36 {offsets = [0, 56], sizes = [8, 8], strides = [1, 1]} : vector<8x64xf32> to vector<8x8xf32>
      %cst_71 = arith.constant dense<0.000000e+00> : vector<8x8xf32>
      %133 = tpu.matmul %130, %131, %cst_71 {dimension_numbers = #tpu.dot_dimension_numbers<[1], [1], [0], [0], [0, 0, 1, 0], [], []>} : vector<8x8xf32>, vector<8x8xf32>, vector<8x8xf32> -> vector<8x8xf32>
      %cst_72 = arith.constant -1.000000e+30 : f32
      %134 = vector.broadcast %cst_72 : f32 to vector<8x8xf32>
      %135 = arith.select %45, %133, %134 : vector<8x8xi1>, vector<8x8xf32>
      %c0_73 = arith.constant 0 : index
      %c3 = arith.constant 3 : index
      %136 = vector.load %arg19[%c0_73, %c3] : memref<8x4xf32, #tpu.memory_space<vmem>>, vector<8x1xf32>
      %cst_74 = arith.constant dense<0xFF800000> : vector<8xf32>
      %137 = vector.multi_reduction <maximumf>, %135, %cst_74 [1] : vector<8x8xf32> to vector<8xf32>
      %138 = vector.shape_cast %137 : vector<8xf32> to vector<8x1xf32>
      %139 = arith.maximumf %136, %138 : vector<8x1xf32>
      %140 = arith.subf %136, %139 : vector<8x1xf32>
      %141 = math.exp %140 : vector<8x1xf32>
      %142 = vector.broadcast %139 : vector<8x1xf32> to vector<8x8xf32>
      %143 = arith.subf %135, %142 : vector<8x8xf32>
      %144 = math.exp %143 : vector<8x8xf32>
      %c0_75 = arith.constant 0 : index
      %c3_76 = arith.constant 3 : index
      %145 = vector.load %arg20[%c0_75, %c3_76] : memref<8x4xf32, #tpu.memory_space<vmem>>, vector<8x1xf32>
      %146 = arith.mulf %141, %145 : vector<8x1xf32>
      %cst_77 = arith.constant dense<0.000000e+00> : vector<8xf32>
      %147 = vector.multi_reduction <add>, %144, %cst_77 [1] : vector<8x8xf32> to vector<8xf32>
      %148 = vector.shape_cast %147 : vector<8xf32> to vector<8x1xf32>
      %149 = arith.addf %146, %148 : vector<8x1xf32>
      %c0_78 = arith.constant 0 : index
      %c3_79 = arith.constant 3 : index
      %150 = vector.load %arg20[%c0_78, %c3_79] : memref<8x4xf32, #tpu.memory_space<vmem>>, vector<8x1xf32>
      tpu.vector_store %arg20[%c0_78, %c3_79], %149 {strides = array<i32>} : memref<8x4xf32, #tpu.memory_space<vmem>>, vector<8x1xf32>,
      %c0_80 = arith.constant 0 : index
      %c24_81 = arith.constant 24 : index
      %151 = vector.load %arg21[%c0_80, %c24_81] : memref<8x32xf32, #tpu.memory_space<vmem>>, vector<8x8xf32>
      %152 = vector.broadcast %141 : vector<8x1xf32> to vector<8x8xf32>
      %153 = arith.mulf %152, %151 : vector<8x8xf32>
      %cst_82 = arith.constant dense<0.000000e+00> : vector<8x8xf32>
      %154 = tpu.matmul %144, %132, %cst_82 {dimension_numbers = #tpu.dot_dimension_numbers<[1], [0], [0], [1], [0, 0, 1, 1], [], []>} : vector<8x8xf32>, vector<8x8xf32>, vector<8x8xf32> -> vector<8x8xf32>
      %155 = arith.addf %153, %154 : vector<8x8xf32>
      %c0_83 = arith.constant 0 : index
      %c24_84 = arith.constant 24 : index
      %156 = vector.load %arg21[%c0_83, %c24_84] : memref<8x32xf32, #tpu.memory_space<vmem>>, vector<8x8xf32>
      tpu.vector_store %arg21[%c0_83, %c24_84], %155 {strides = array<i32>} : memref<8x32xf32, #tpu.memory_space<vmem>>, vector<8x8xf32>,
      %c0_85 = arith.constant 0 : index
      %c3_86 = arith.constant 3 : index
      %157 = vector.load %arg19[%c0_85, %c3_86] : memref<8x4xf32, #tpu.memory_space<vmem>>, vector<8x1xf32>
      tpu.vector_store %arg19[%c0_85, %c3_86], %139 {strides = array<i32>} : memref<8x4xf32, #tpu.memory_space<vmem>>, vector<8x1xf32>,
    } else {
    }
    %6 = arith.cmpi eq, %arg2, %arg1 : i32
    %7 = arith.extui %6 : i1 to i32
    %c0_i32_2 = arith.constant 0 : i32
    %8 = arith.cmpi ne, %7, %c0_i32_2 : i32
    scf.if %8 {
      %c0 = arith.constant 0 : index
      %c0_3 = arith.constant 0 : index
      %c0_4 = arith.constant 0 : index
      %9 = vector.load %arg3[%c0, %c0_3, %c0_4] : memref<1x8x32xf32, #tpu.memory_space<vmem>>, vector<1x8x32xf32>
      %10 = vector.shape_cast %9 : vector<1x8x32xf32> to vector<8x32xf32>
      %c0_5 = arith.constant 0 : index
      %c0_6 = arith.constant 0 : index
      %11 = vector.load %arg21[%c0_5, %c0_6] : memref<8x32xf32, #tpu.memory_space<vmem>>, vector<8x8xf32>
      %c0_7 = arith.constant 0 : index
      %c0_8 = arith.constant 0 : index
      %12 = vector.load %arg20[%c0_7, %c0_8] : memref<8x4xf32, #tpu.memory_space<vmem>>, vector<8x1xf32>
      %13 = tpu.reciprocal %12 {approx = true} : vector<8x1xf32> -> vector<8x1xf32>
      %14 = vector.broadcast %13 : vector<8x1xf32> to vector<8x8xf32>
      %15 = arith.mulf %11, %14 : vector<8x8xf32>
      %c0_9 = arith.constant 0 : index
      %c0_10 = arith.constant 0 : index
      %16 = vector.load %arg21[%c0_9, %c0_10] : memref<8x32xf32, #tpu.memory_space<vmem>>, vector<8x8xf32>
      tpu.vector_store %arg21[%c0_9, %c0_10], %15 {strides = array<i32>} : memref<8x32xf32, #tpu.memory_space<vmem>>, vector<8x8xf32>,
      %c0_11 = arith.constant 0 : index
      %c8 = arith.constant 8 : index
      %17 = vector.load %arg21[%c0_11, %c8] : memref<8x32xf32, #tpu.memory_space<vmem>>, vector<8x8xf32>
      %c0_12 = arith.constant 0 : index
      %c1 = arith.constant 1 : index
      %18 = vector.load %arg20[%c0_12, %c1] : memref<8x4xf32, #tpu.memory_space<vmem>>, vector<8x1xf32>
      %19 = tpu.reciprocal %18 {approx = true} : vector<8x1xf32> -> vector<8x1xf32>
      %20 = vector.broadcast %19 : vector<8x1xf32> to vector<8x8xf32>
      %21 = arith.mulf %17, %20 : vector<8x8xf32>
      %c0_13 = arith.constant 0 : index
      %c8_14 = arith.constant 8 : index
      %22 = vector.load %arg21[%c0_13, %c8_14] : memref<8x32xf32, #tpu.memory_space<vmem>>, vector<8x8xf32>
      tpu.vector_store %arg21[%c0_13, %c8_14], %21 {strides = array<i32>} : memref<8x32xf32, #tpu.memory_space<vmem>>, vector<8x8xf32>,
      %c0_15 = arith.constant 0 : index
      %c16 = arith.constant 16 : index
      %23 = vector.load %arg21[%c0_15, %c16] : memref<8x32xf32, #tpu.memory_space<vmem>>, vector<8x8xf32>
      %c0_16 = arith.constant 0 : index
      %c2 = arith.constant 2 : index
      %24 = vector.load %arg20[%c0_16, %c2] : memref<8x4xf32, #tpu.memory_space<vmem>>, vector<8x1xf32>
      %25 = tpu.reciprocal %24 {approx = true} : vector<8x1xf32> -> vector<8x1xf32>
      %26 = vector.broadcast %25 : vector<8x1xf32> to vector<8x8xf32>
      %27 = arith.mulf %23, %26 : vector<8x8xf32>
      %c0_17 = arith.constant 0 : index
      %c16_18 = arith.constant 16 : index
      %28 = vector.load %arg21[%c0_17, %c16_18] : memref<8x32xf32, #tpu.memory_space<vmem>>, vector<8x8xf32>
      tpu.vector_store %arg21[%c0_17, %c16_18], %27 {strides = array<i32>} : memref<8x32xf32, #tpu.memory_space<vmem>>, vector<8x8xf32>,
      %c0_19 = arith.constant 0 : index
      %c24 = arith.constant 24 : index
      %29 = vector.load %arg21[%c0_19, %c24] : memref<8x32xf32, #tpu.memory_space<vmem>>, vector<8x8xf32>
      %c0_20 = arith.constant 0 : index
      %c3 = arith.constant 3 : index
      %30 = vector.load %arg20[%c0_20, %c3] : memref<8x4xf32, #tpu.memory_space<vmem>>, vector<8x1xf32>
      %31 = tpu.reciprocal %30 {approx = true} : vector<8x1xf32> -> vector<8x1xf32>
      %32 = vector.broadcast %31 : vector<8x1xf32> to vector<8x8xf32>
      %33 = arith.mulf %29, %32 : vector<8x8xf32>
      %c0_21 = arith.constant 0 : index
      %c24_22 = arith.constant 24 : index
      %34 = vector.load %arg21[%c0_21, %c24_22] : memref<8x32xf32, #tpu.memory_space<vmem>>, vector<8x8xf32>
      tpu.vector_store %arg21[%c0_21, %c24_22], %33 {strides = array<i32>} : memref<8x32xf32, #tpu.memory_space<vmem>>, vector<8x8xf32>,
      %c0_23 = arith.constant 0 : index
      %c0_24 = arith.constant 0 : index
      %35 = vector.load %arg21[%c0_23, %c0_24] : memref<8x32xf32, #tpu.memory_space<vmem>>, vector<8x32xf32>
      %c0_25 = arith.constant 0 : index
      %c0_26 = arith.constant 0 : index
      %36 = vector.load %arg7[%c0_25, %c0_26] : memref<32x32xf32, #tpu.memory_space<vmem>>, vector<32x32xf32>
      %cst = arith.constant dense<0.000000e+00> : vector<8x32xf32>
      %37 = tpu.matmul %35, %36, %cst {dimension_numbers = #tpu.dot_dimension_numbers<[1], [0], [0], [1], [0, 0, 1, 1], [], []>} : vector<8x32xf32>, vector<32x32xf32>, vector<8x32xf32> -> vector<8x32xf32>
      %c0_27 = arith.constant 0 : index
      %c0_28 = arith.constant 0 : index
      %38 = vector.load %arg8[%c0_27, %c0_28] : memref<1x32xf32, #tpu.memory_space<vmem>>, vector<1x32xf32>
      %39 = vector.broadcast %38 : vector<1x32xf32> to vector<8x32xf32>
      %40 = arith.addf %37, %39 : vector<8x32xf32>
      %41 = arith.addf %40, %10 : vector<8x32xf32>
      %c0_29 = arith.constant 0 : index
      %c0_30 = arith.constant 0 : index
      %42 = vector.load %arg11[%c0_29, %c0_30] : memref<1x32xf32, #tpu.memory_space<vmem>>, vector<1x32xf32>
      %c0_31 = arith.constant 0 : index
      %c0_32 = arith.constant 0 : index
      %43 = vector.load %arg12[%c0_31, %c0_32] : memref<1x32xf32, #tpu.memory_space<vmem>>, vector<1x32xf32>
      %cst_33 = arith.constant dense<0.000000e+00> : vector<8xf32>
      %44 = vector.multi_reduction <add>, %41, %cst_33 [1] : vector<8x32xf32> to vector<8xf32>
      %45 = vector.shape_cast %44 : vector<8xf32> to vector<8x1xf32>
      %cst_34 = arith.constant 3.200000e+01 : f32
      %46 = vector.broadcast %cst_34 : f32 to vector<8x1xf32>
      %47 = arith.divf %45, %46 : vector<8x1xf32>
      %48 = vector.broadcast %47 : vector<8x1xf32> to vector<8x32xf32>
      %49 = arith.subf %41, %48 : vector<8x32xf32>
      %50 = arith.mulf %49, %49 : vector<8x32xf32>
      %cst_35 = arith.constant dense<0.000000e+00> : vector<8xf32>
      %51 = vector.multi_reduction <add>, %50, %cst_35 [1] : vector<8x32xf32> to vector<8xf32>
      %52 = vector.shape_cast %51 : vector<8xf32> to vector<8x1xf32>
      %cst_36 = arith.constant 3.200000e+01 : f32
      %53 = vector.broadcast %cst_36 : f32 to vector<8x1xf32>
      %54 = arith.divf %52, %53 : vector<8x1xf32>
      %55 = vector.broadcast %47 : vector<8x1xf32> to vector<8x32xf32>
      %56 = arith.subf %41, %55 : vector<8x32xf32>
      %cst_37 = arith.constant 9.99999974E-6 : f32
      %57 = vector.broadcast %cst_37 : f32 to vector<8x1xf32>
      %58 = arith.addf %54, %57 : vector<8x1xf32>
      %59 = math.rsqrt %58 : vector<8x1xf32>
      %60 = vector.broadcast %59 : vector<8x1xf32> to vector<8x32xf32>
      %61 = arith.mulf %56, %60 : vector<8x32xf32>
      %62 = vector.broadcast %42 : vector<1x32xf32> to vector<8x32xf32>
      %63 = arith.mulf %61, %62 : vector<8x32xf32>
      %64 = vector.broadcast %43 : vector<1x32xf32> to vector<8x32xf32>
      %65 = arith.addf %63, %64 : vector<8x32xf32>
      %c0_38 = arith.constant 0 : index
      %c0_39 = arith.constant 0 : index
      %66 = vector.load %arg13[%c0_38, %c0_39] : memref<32x128xf32, #tpu.memory_space<vmem>>, vector<32x128xf32>
      %cst_40 = arith.constant dense<0.000000e+00> : vector<8x128xf32>
      %67 = tpu.matmul %65, %66, %cst_40 {dimension_numbers = #tpu.dot_dimension_numbers<[1], [0], [0], [1], [0, 0, 1, 1], [], []>} : vector<8x32xf32>, vector<32x128xf32>, vector<8x128xf32> -> vector<8x128xf32>
      %c0_41 = arith.constant 0 : index
      %c0_42 = arith.constant 0 : index
      %68 = vector.load %arg14[%c0_41, %c0_42] : memref<1x128xf32, #tpu.memory_space<vmem>>, vector<1x128xf32>
      %69 = vector.broadcast %68 : vector<1x128xf32> to vector<8x128xf32>
      %70 = arith.addf %67, %69 : vector<8x128xf32>
      %cst_43 = arith.constant 0.000000e+00 : f32
      %71 = vector.broadcast %cst_43 : f32 to vector<8x128xf32>
      %72 = arith.maximumf %70, %71 : vector<8x128xf32>
      %c0_44 = arith.constant 0 : index
      %c0_45 = arith.constant 0 : index
      %73 = vector.load %arg15[%c0_44, %c0_45] : memref<128x32xf32, #tpu.memory_space<vmem>>, vector<128x32xf32>
      %cst_46 = arith.constant dense<0.000000e+00> : vector<8x32xf32>
      %74 = tpu.matmul %72, %73, %cst_46 {dimension_numbers = #tpu.dot_dimension_numbers<[1], [0], [0], [1], [0, 0, 1, 1], [], []>} : vector<8x128xf32>, vector<128x32xf32>, vector<8x32xf32> -> vector<8x32xf32>
      %c0_47 = arith.constant 0 : index
      %c0_48 = arith.constant 0 : index
      %75 = vector.load %arg16[%c0_47, %c0_48] : memref<1x32xf32, #tpu.memory_space<vmem>>, vector<1x32xf32>
      %76 = vector.broadcast %75 : vector<1x32xf32> to vector<8x32xf32>
      %77 = arith.addf %74, %76 : vector<8x32xf32>
      %78 = arith.addf %77, %41 : vector<8x32xf32>
      %c0_49 = arith.constant 0 : index
      %c0_50 = arith.constant 0 : index
      %c0_51 = arith.constant 0 : index
      %79 = vector.load %arg17[%c0_49, %c0_50, %c0_51] : memref<1x8x32xf32, #tpu.memory_space<vmem>>, vector<1x8x32xf32>
      %80 = vector.shape_cast %79 : vector<1x8x32xf32> to vector<8x32xf32>
      %81 = vector.shape_cast %78 : vector<8x32xf32> to vector<1x8x32xf32>
      tpu.vector_store %arg17[%c0_49, %c0_50, %c0_51], %81 {strides = array<i32>} : memref<1x8x32xf32, #tpu.memory_space<vmem>>, vector<1x8x32xf32>,
    } else {
    }
    return
  }
  func.func @transform_0(%arg0: i32, %arg1: i32, %arg2: i32) -> (i32, i32, i32) {
    %c0_i32 = arith.constant 0 : i32
    %c0_i32_0 = arith.constant 0 : i32
    return %arg0, %arg1, %c0_i32 : i32, i32, i32
  }
  func.func @transform_1(%arg0: i32, %arg1: i32, %arg2: i32) -> (i32, i32, i32) {
    %c0_i32 = arith.constant 0 : i32
    %c0_i32_0 = arith.constant 0 : i32
    return %arg0, %arg2, %c0_i32 : i32, i32, i32
  }
  func.func @transform_2(%arg0: i32, %arg1: i32, %arg2: i32) -> (i32, i32) {
    %c0_i32 = arith.constant 0 : i32
    %c0_i32_0 = arith.constant 0 : i32
    %c0_i32_1 = arith.constant 0 : i32
    return %c0_i32, %c0_i32_0 : i32, i32
  }
  func.func @transform_3(%arg0: i32, %arg1: i32, %arg2: i32) -> (i32, i32) {
    %c0_i32 = arith.constant 0 : i32
    %c0_i32_0 = arith.constant 0 : i32
    %c0_i32_1 = arith.constant 0 : i32
    return %c0_i32, %c0_i32_0 : i32, i32
  }
  func.func @transform_4(%arg0: i32, %arg1: i32, %arg2: i32) -> (i32, i32) {
    %c0_i32 = arith.constant 0 : i32
    %c0_i32_0 = arith.constant 0 : i32
    %c0_i32_1 = arith.constant 0 : i32
    return %c0_i32, %c0_i32_0 : i32, i32
  }
  func.func @transform_5(%arg0: i32, %arg1: i32, %arg2: i32) -> (i32, i32) {
    %c0_i32 = arith.constant 0 : i32
    %c0_i32_0 = arith.constant 0 : i32
    %c0_i32_1 = arith.constant 0 : i32
    return %c0_i32, %c0_i32_0 : i32, i32
  }
  func.func @transform_6(%arg0: i32, %arg1: i32, %arg2: i32) -> (i32, i32) {
    %c0_i32 = arith.constant 0 : i32
    %c0_i32_0 = arith.constant 0 : i32
    %c0_i32_1 = arith.constant 0 : i32
    return %c0_i32, %c0_i32_0 : i32, i32
  }
  func.func @transform_7(%arg0: i32, %arg1: i32, %arg2: i32) -> (i32, i32) {
    %c0_i32 = arith.constant 0 : i32
    %c0_i32_0 = arith.constant 0 : i32
    %c0_i32_1 = arith.constant 0 : i32
    return %c0_i32, %c0_i32_0 : i32, i32
  }
  func.func @transform_8(%arg0: i32, %arg1: i32, %arg2: i32) -> (i32, i32) {
    %c0_i32 = arith.constant 0 : i32
    %c0_i32_0 = arith.constant 0 : i32
    %c0_i32_1 = arith.constant 0 : i32
    return %c0_i32, %c0_i32_0 : i32, i32
  }
  func.func @transform_9(%arg0: i32, %arg1: i32, %arg2: i32) -> (i32, i32) {
    %c0_i32 = arith.constant 0 : i32
    %c0_i32_0 = arith.constant 0 : i32
    %c0_i32_1 = arith.constant 0 : i32
    return %c0_i32, %c0_i32_0 : i32, i32
  }
  func.func @transform_10(%arg0: i32, %arg1: i32, %arg2: i32) -> (i32, i32) {
    %c0_i32 = arith.constant 0 : i32
    %c0_i32_0 = arith.constant 0 : i32
    %c0_i32_1 = arith.constant 0 : i32
    return %c0_i32, %c0_i32_0 : i32, i32
  }
  func.func @transform_11(%arg0: i32, %arg1: i32, %arg2: i32) -> (i32, i32) {
    %c0_i32 = arith.constant 0 : i32
    %c0_i32_0 = arith.constant 0 : i32
    %c0_i32_1 = arith.constant 0 : i32
    return %c0_i32, %c0_i32_0 : i32, i32
  }
  func.func @transform_12(%arg0: i32, %arg1: i32, %arg2: i32) -> (i32, i32) {
    %c0_i32 = arith.constant 0 : i32
    %c0_i32_0 = arith.constant 0 : i32
    %c0_i32_1 = arith.constant 0 : i32
    return %c0_i32, %c0_i32_0 : i32, i32
  }
  func.func @transform_13(%arg0: i32, %arg1: i32, %arg2: i32) -> (i32, i32) {
    %c0_i32 = arith.constant 0 : i32
    %c0_i32_0 = arith.constant 0 : i32
    %c0_i32_1 = arith.constant 0 : i32
    return %c0_i32, %c0_i32_0 : i32, i32
  }
  func.func @transform_14(%arg0: i32, %arg1: i32, %arg2: i32) -> (i32, i32, i32) {
    %c0_i32 = arith.constant 0 : i32
    %c0_i32_0 = arith.constant 0 : i32
    return %arg0, %arg1, %c0_i32 : i32, i32, i32
  }
}

</mosaic_0001>

<bundles_post_ra>
// kernel: tpu_custom_call.1
= control target key start
LH: loop header
LB: loop body
LE: loop exit
PB: predicated region body
PF: predicated region fallthrough
CT: control target
= control target key end

     0   :  { %s2966_s0 = inlined_call_operand.vmem [shape: f32[2,8,32], index: 0, kind: input, shape index: {}]   ;;  %s2967_s1 = inlined_call_operand.vmem [shape: f32[2,8,32], index: 1, kind: input, shape index: {}]   ;;  %s2968_s2 = inlined_call_operand.vmem [shape: f32[32,32], index: 2, kind: input, shape index: {}]   ;;  %s2969_s3 = inlined_call_operand.vmem [shape: f32[32,64], index: 3, kind: input, shape index: {}]   ;;  %s2970_s4 = inlined_call_operand.vmem [shape: f32[32,32], index: 4, kind: input, shape index: {}]   ;;  %s2971_s5 = inlined_call_operand.vmem [shape: f32[1,32], index: 5, kind: input, shape index: {}]   ;;  %s2972_s6 = inlined_call_operand.vmem [shape: f32[1,32], index: 6, kind: input, shape index: {}]   ;;  %s2973_s7 = inlined_call_operand.vmem [shape: f32[1,32], index: 7, kind: input, shape index: {}]   ;;  %s2974_s8 = inlined_call_operand.vmem [shape: f32[1,32], index: 8, kind: input, shape index: {}]   ;;  %s2975_s9 = inlined_call_operand.vmem [shape: f32[1,32], index: 9, kind: input, shape index: {}]   ;;  %s2976_s10 = inlined_call_operand.vmem [shape: f32[32,128], index: 10, kind: input, shape index: {}]   ;;  %s2977_s11 = inlined_call_operand.vmem [shape: f32[1,128], index: 11, kind: input, shape index: {}]   ;;  %s2978_s12 = inlined_call_operand.vmem [shape: f32[128,32], index: 12, kind: input, shape index: {}]   ;;  %s2979_s13 = inlined_call_operand.vmem [shape: f32[1,32], index: 13, kind: input, shape index: {}]   ;;  %s2980_s14 = inlined_call_operand.hbm [shape: f32[2,8,32], index: 14, kind: output, shape index: {}]  }
   0x1   :  { %2984 = sst [smem:[#allocation12_spill]] %s2966_s0 }
   0x2   :  { %2985 = sst [smem:[#allocation13_spill]] %s2967_s1 }
   0x3   :  { %19 = vsyncpa [#allocation7], 0 }
   0x4   :  { %21 = vsyncpa [#allocation7 + $0x1], 0  ;;  %s2533_s29 = smov 0   ;;  %s2535_s30 = smov 0  }
   0x5   :  { %s2537_s15 = smov 0   ;;  %s2539_s16 = smov 0  }
   0x6   :  { %s2541_s17 = smov 0   ;;  %s2543_s18 = smov 0  }
   0x7 LB: > { %2986 = sst [smem:[#allocation9_spill]] %s2417_s29  ;;  %s1993_s19 = sadd.s32 4294967295, %s2437_s18   ;;  %s2437_s18 = sphi %s2543_s18, %s27_s18   ;;  %s2433_s17 = sphi %s2541_s17, %s2995_s17   ;;  %s2429_s16 = sphi %s2539_s16, %s2994_s16   ;;  %s2425_s15 = sphi %s2537_s15, %s2998_s15   ;;  %s2421_s30 = sphi %s2535_s30, %s2997_s30   ;;  %s2417_s29 = sphi %s2533_s29, %s2996_s29  }
   0x8   : > { %2987 = sst [smem:[#allocation10_spill]] %s2433_s17  ;;  %s1994_s20 = sadd.s32 4294967294, %s2437_s18  }
   0x9   : > { %s46_s21 = sadd.s32 1, %s2433_s17  ;;  %s363_s22 = sadd.s32 1, %s2425_s15 }
   0xa   : > { %p48_p0 = scmp.ge.s32.totalorder %s46_s21, 2  ;;  %p373_p1 = scmp.ne.s32.totalorder %s2425_s15, %s2421_s30 }
   0xb   : > { %p374_p2 = scmp.eq.s32.totalorder %s1993_s19, 1  ;;  %p379_p3 = scmp.ne.s32.totalorder %s2421_s30, %s2417_s29 }
   0xc   : > { %s3000_s21 = smov (%p48_p0, %s46_s21), 0  ;;  %p380_p5 = scmp.eq.s32.totalorder %s1994_s20, 1 }
   0xd   : > { %2988 = sst [smem:[#allocation11_spill]] %s3000_s21  ;;  %p2573_p4 = por %p374_p2, %p373_p1 }
   0xe   : > { %s358_s24 = ssub.s32 %s2433_s17, %s3000_s21  ;;  %p1997_p6 = scmp.ge.s32.totalorder %s2437_s18, 1 }
   0xf   : > { %p361_p7 = scmp.eq.s32.totalorder %s358_s24, 0  ;;  %p2580_p8 = por %p380_p5, %p379_p3 }
  0x10   : > { %p454_p9 = scmp.lt.s32.totalorder %s2437_s18, 3 }
  0x11   : > { %s2586_s26 = scalar_select %p361_p7, %s2425_s15, %s363_s22  }
  0x12   : > { %p455_p10 = pnand %p1997_p6, %p454_p9 }
  0x13   : > { %p509_p11 = scmp.lt.s32.totalorder (!%p455_p10), %s2429_s16, 1  ;;  %vm530_vm0 = vcmask (!%p455_p10), 261120   ;;  %s2991_s0 = sld [smem:[#allocation12_spill]] (!%p455_p10)  ;;  %v559_v14 = vld [vmem:[%s2968_s2] sm:$0xff] (!%p455_p10)  ;;  %v560_v15 = vld [vmem:[%s2968_s2 + $0x8] sm:$0xff] (!%p455_p10)  ;;  %v2439_v17 = vmov (!%p455_p10), 0.0|0.0   ;;  %v756_v56 = vlaneseq (!%p455_p10) }
  0x14   : > { %458 = sbr.rel (%p455_p10) target bundleno = 2567 (0xa07), region = 76  ;;  %s2992_s1 = sld [smem:[#allocation13_spill]] (!%p455_p10)  ;;  %v2203_v16 = vpack.c.bf16 (!%p455_p10), %v560_v15, %v559_v14  ;;  %2202 = vmatprep.subr.bf16.mxu1 (!%p455_p10), %v2439_v17  ;;  %v561_v18 = vld [vmem:[%s2968_s2 + $0x10] sm:$0xff] (!%p455_p10)  ;;  %v562_v19 = vld [vmem:[%s2968_s2 + $0x18] sm:$0xff] (!%p455_p10)  ;;  %vm2440_vm1 = vmmov (!%p455_p10), 0   ;;  %v2441_v21 = vmov (!%p455_p10), 0.0  }
  0x15   : > { %v2206_v20 = vpack.c.bf16 (!%p455_p10), %v562_v19, %v561_v18  ;;  %2091 = vmatprep.mubr.msk.f32.mxu1 (!%p455_p10), %vm2440_vm1, %v2441_v21  ;;  %641 = vst.msk [vmem:[#allocation5] sm:$0xff] (!%p455_p10), %vm530_vm0, %v2441_v21  ;;  %2105 = vmatprep.subr.mxu0 (!%p455_p10), %v2441_v21  ;;  %v2001_v29 = vld [vmem:[%s2972_s6] ss:$0 sm:$0xff] (!%p455_p10)  ;;  %v679_v32 = vld [vmem:[%s2969_s3 + $0x8] sm:$0xff] (!%p455_p10)  ;;  %v680_v39 = vld [vmem:[%s2969_s3 + $0x10] sm:$0xff] (!%p455_p10)  ;;  %vm767_vm2 = vcmask (!%p455_p10), 64512  }
  0x16   : > { %2204 = vmatpush3.bf16.msra.mxu1 (!%p455_p10), %v2203_v16  ;;  %2107 = vmatprep.mubr.msk.f32.mxu0 (!%p455_p10), %vm2440_vm1, %v2441_v21  ;;  %v678_v31 = vld [vmem:[%s2969_s3] sm:$0xff] (!%p455_p10)  ;;  %v681_v40 = vld [vmem:[%s2969_s3 + $0x18] sm:$0xff] (!%p455_p10)  ;;  %s2443_s22 = smov (!%p455_p10), 104   ;;  %v757_v57 = vshrl.u32 (!%p455_p10), %v756_v56, 7  ;;  %v762_v58 = vand.u32 (!%p455_p10), 127, %v756_v56  ;;  %vm638_vm4 = vcmask (!%p455_p10), 31744  }
  0x17   : > { %2205 = vmatprep.subr.bf16.mxu1 (!%p455_p10), %v2439_v17  ;;  %v2002_v33 = vld [vmem:[%s2973_s7] ss:$0 sm:$0xff] (!%p455_p10)  ;;  %v2209_v36 = vpack.c.bf16 (!%p455_p10), %v679_v32, %v678_v31  ;;  %v2212_v41 = vpack.c.bf16 (!%p455_p10), %v681_v40, %v680_v39  ;;  %v2445_v63 = vmov (!%p455_p10), -1e+30   ;;  %640 = vst.msk [vmem:[#allocation4] sm:$0xff] (!%p455_p10), %vm638_vm4, %v2441_v21  ;;  %v2447_v14 = vmov (!%p455_p10), 1  }
  0x18   : > { %vm765_vm3 = vcmp.ge.s32.totalorder (!%p455_p10), %v757_v57, %v762_v58  ;;  %639 = vst.msk [vmem:[#allocation3] sm:$0xff] (!%p455_p10), %vm638_vm4, %v2445_v63  ;;  %2324 = vset.pattern.permute.xlu1 (!%p455_p10), %v2447_v14  ;;  %vm867_vm5 = vcmask (!%p455_p10), 7168   ;;  %vm1058_vm6 = vcmask (!%p455_p10), 15368   ;;  %vm1254_vm7 = vcmask (!%p455_p10), 23568   ;;  %s2451_s19 = smov (!%p455_p10), 88   ;;  %s2452_s20 = smov (!%p455_p10), 80  }
  0x19   : > { %vm1450_vm8 = vcmask (!%p455_p10), 31768   ;;  %s2453_s24 = smov (!%p455_p10), 72   ;;  %s2455_s17 = smov (!%p455_p10), 16   ;;  %vm1148_vm9 = vcmask (!%p455_p10), 130112   ;;  %vm1344_vm10 = vcmask (!%p455_p10), 195712   ;;  %vm1540_vm11 = vcmask (!%p455_p10), 261312  }
  0x1a   : > { %2207 = vmatpush3.bf16.msra.mxu1 (!%p455_p10), %v2206_v20 }
  0x1b   : > { %s510_s27 = scalar_select %p509_p11, %s2429_s16, 1  ;;  %2208 = vmatprep.subr.bf16.mxu1 %v2439_v17 }
  0x1d   : > { %s1999_s28 = sshll.u32 %s510_s27, 3  ;;  %s2444_s27 = smov 112  }
  0x1e   : > { %s515_s21 = scalar_lea.vmem %s2991_s0, %s1999_s28  ;;  %s522_s29 = scalar_lea.vmem %s2992_s1, %s1999_s28 }
  0x1f   : > { %v2596_v0 = vld [vmem:[%s515_s21] sm:$0xff]  ;;  %s2442_s21 = smov 120   ;;  %v2702_v15 = vld [vmem:[#allocation3] sm:$0xff]  ;;  %s2449_s28 = smov 96  }
  0x20   : > { %v646_v1 = vld [vmem:[%s522_s29] sm:$0xff]  ;;  %v531_v2 = vsel %vm530_vm0, %v2596_v0, 0.0  ;;  %s2454_s29 = smov 8   ;;  %s2027_s0 = sshll.u32 %s2429_s16, 7 }
  0x21   : > { %532 = vadd.xlane.f32.xlu0 %v531_v2  ;;  %v650_v3 = vsel %vm530_vm0, %v646_v1, 0.0 }
  0x25   : > { %651 = vadd.xlane.f32.xlu0 %v650_v3 }
  0xae   : > { %v533_v4 = vpop.xlane.xlu0 %532 }
  0xaf   : > { %v535_v5 = vmul.f32 0.03125, %v533_v4 }
  0xb1   : > { %v536_v6 = vsub.f32 %v2596_v0, %v535_v5 }
  0xb2   : > { %v652_v7 = vpop.xlane.xlu0 %651 }
  0xb3   : > { %v654_v8 = vmul.f32 0.03125, %v652_v7  ;;  %v537_v9 = vmul.f32 %v536_v6, %v536_v6 }
  0xb5   : > { %v655_v10 = vsub.f32 %v646_v1, %v654_v8  ;;  %v538_v11 = vsel %vm530_vm0, %v537_v9, 0.0  ;;  %v2446_v1 = vmov 0  }
  0xb6   : > { %539 = vadd.xlane.f32.xlu1 %v538_v11  ;;  %2323 = vset.pattern.permute.xlu0 %v2446_v1 }
  0xb7   : > { %v656_v12 = vmul.f32 %v655_v10, %v655_v10 }
  0xb9   : > { %v657_v13 = vsel %vm530_vm0, %v656_v12, 0.0 }
  0xba   : > { %658 = vadd.xlane.f32.xlu1 %v657_v13 }
 0x143   : > { %v540_v22 = vpop.xlane.xlu1 %539 }
 0x144   : > { %v541_v23 = vmul.f32 0.03125, %v540_v22 }
 0x146   : > { %v542_v24 = vadd.f32 1e-05, %v541_v23 }
 0x147   : > { %v659_v25 = vpop.xlane.xlu1 %658 }
 0x148   : > { %2335 = vrsqrt.f32 %v542_v24  ;;  %v660_v26 = vmul.f32 0.03125, %v659_v25  ;;  %v2448_v25 = vmov 2  }
 0x14a   : > { %v661_v27 = vadd.f32 1e-05, %v660_v26 }
 0x14c   : > { %2337 = vrsqrt.f32 %v661_v27 }
 0x152   : > { %v2336_v28 = vpop.eup %2335 }
 0x153   : > { %v544_v30 = vmul.f32 %v2336_v28, %v536_v6 }
 0x155   : > { %v551_v34 = vmul.f32 %v2001_v29, %v544_v30  ;;  %v2450_v30 = vmov 3  }
 0x156   : > { %v2338_v35 = vpop.eup %2337 }
 0x157   : > { %v663_v37 = vmul.f32 %v2338_v35, %v655_v10  ;;  %v558_v38 = vadd.f32 %v2002_v33, %v551_v34 }
 0x159   : > { %2092 = vmatmul.mubr.msk.f32.vlgmr.msra.gmra.mrb[0].mxu1 %vm530_vm0, %v558_v38  ;;  %v670_v42 = vmul.f32 %v2001_v29, %v663_v37 }
 0x15a   : > { %2210 = vmatpush3.bf16.msra.mxu1 %v2209_v36  ;;  %2102 = vmatprep.mubr.msk.f32.mxu1 %vm2440_vm1, %v2441_v21 }
 0x15b   : > { %2211 = vmatprep.subr.bf16.mxu1 %v2439_v17  ;;  %v677_v43 = vadd.f32 %v2002_v33, %v670_v42 }
 0x15e   : > { %2213 = vmatpush3.bf16.msra.mxu1 %v2212_v41 }
 0x15f   : > { %2110 = vmatprep.subr.mxu1 %v2441_v21 }
 0x161   : > { %2103 = vmatmul.mubr.msk.f32.vlgmr.msra.gmra.mrb[2].mxu1 %vm530_vm0, %v677_v43 }
 0x162   : > { %2112 = vmatprep.mubr.msk.f32.mxu1 %vm2440_vm1, %v2441_v21 }
 0x22c   : > { %v632_v44 = vpop.f32.mrb[0].mxu1 }
 0x22d   : > { %v636_v45 = vmul.f32 0.17677669, %v632_v44  ;;  %v2093_v46 = vpop.f32.mrb[1].mxu1 }
 0x22f   : > { %637 = vst.msk [vmem:[#allocation2] sm:$0xff] %vm530_vm0, %v636_v45 }
 0x234   : > { %v2653_v47 = vpop.f32.mrb[2].mxu1 }
 0x235   : > { %959 = vrot.lane.b32.xlu0 %v2653_v47, %s2442_s21  ;;  %v2104_v48 = vpop.f32.mrb[3].mxu1  ;;  %2106 = vmatpush3.xpose.msk.msra.mxu0 %vm767_vm2, %v2653_v47 }
 0x236   : > { %v955_v49 = vld [vmem:[#allocation2] sm:$0xff]  ;;  %2115 = vmatprep.subr.mxu0 %v2441_v21 }
 0x237   : > { %957 = vrot.lane.b32.xlu1 %v955_v49, %s2442_s21  ;;  %s2456_s21 = smov 24  }
 0x238   : > { %2108 = vmatmul.mubr.msk.f32.vlgmr.msra.gmra.mrb[0].mxu0 %vm767_vm2, %v955_v49 }
 0x239   : > { %1351 = vrot.lane.b32.xlu0 %v2653_v47, %s2443_s22  ;;  %2117 = vmatprep.mubr.msk.f32.mxu0 %vm2440_vm1, %v2441_v21 }
 0x23b   : > { %1155 = vrot.lane.b32.xlu1 %v2653_v47, %s2444_s27 }
 0x23f   : > { %1153 = vrot.lane.b32.xlu1 %v955_v49, %s2444_s27 }
 0x243   : > { %1349 = vrot.lane.b32.xlu1 %v955_v49, %s2443_s22 }
 0x2a7   : > { %v960_v50 = vpop.permute.xlu0 %959 }
 0x2a8   : > { %2116 = vmatpush3.xpose.msk.msra.mxu0 %vm767_vm2, %v960_v50 }
 0x2a9   : > { %v958_v51 = vpop.permute.xlu1 %957  ;;  %2125 = vmatprep.subr.mxu0 %v2441_v21 }
 0x2ab   : > { %2118 = vmatmul.mubr.msk.f32.vlgmr.msra.gmra.mrb[2].mxu0 %vm767_vm2, %v958_v51  ;;  %v1352_v54 = vpop.permute.xlu0 %1351 }
 0x2ac   : > { %2127 = vmatprep.mubr.msk.f32.mxu0 %vm2440_vm1, %v2441_v21 }
 0x2ad   : > { %v1156_v52 = vpop.permute.xlu1 %1155 }
 0x2ae   : > { %2126 = vmatpush3.xpose.msk.msra.mxu0 %vm767_vm2, %v1156_v52 }
 0x2af   : > { %2135 = vmatprep.subr.mxu0 %v2441_v21 }
 0x2b1   : > { %v1154_v53 = vpop.permute.xlu1 %1153 }
 0x2b2   : > { %2128 = vmatmul.mubr.msk.f32.vlgmr.msra.gmra.mrb[4].mxu0 %vm767_vm2, %v1154_v53 }
 0x2b3   : > { %2136 = vmatpush3.xpose.msk.msra.mxu0 %vm767_vm2, %v1352_v54  ;;  %2137 = vmatprep.mubr.msk.f32.mxu0 %vm2440_vm1, %v2441_v21 }
 0x2b4   : > { %2226 = vmatprep.subr.bf16.mxu0 %v2439_v17 }
 0x2b5   : > { %v1350_v55 = vpop.permute.xlu1 %1349 }
 0x2b6   : > { %2138 = vmatmul.mubr.msk.f32.vlgmr.msra.gmra.mrb[6].mxu0 %vm767_vm2, %v1350_v55 }
 0x2b7   : > { %2199 = vmatprep.mubr.msk.f32.mxu0 %vm2440_vm1, %v2441_v21 }
 0x30b   : > { %v840_v59 = vpop.f32.mrb[0].mxu0 }
 0x30c   : > { %v2680_v60 = vsel %vm765_vm3, %v840_v59, -1e+30  ;;  %v2109_v61 = vpop.f32.mrb[1].mxu0 }
 0x30d   : > { %v846_v62 = vsel %vm767_vm2, %v2680_v60, -inf }
 0x30e   : > { %847 = vmax.xlane.f32.xlu0 %v846_v62 }
 0x37e   : > { %v1031_v2 = vpop.f32.mrb[2].mxu0 }
 0x37f   : > { %v2687_v3 = vsel %vm765_vm3, %v1031_v2, -1e+30  ;;  %v2119_v4 = vpop.f32.mrb[3].mxu0 }
 0x380   : > { %v1037_v5 = vsel %vm767_vm2, %v2687_v3, -inf }
 0x381   : > { %1038 = vmax.xlane.f32.xlu1 %v1037_v5 }
 0x385   : > { %v1227_v6 = vpop.f32.mrb[4].mxu0 }
 0x386   : > { %v2692_v7 = vsel %vm765_vm3, %v1227_v6, -1e+30  ;;  %v2129_v8 = vpop.f32.mrb[5].mxu0 }
 0x387   : > { %v1233_v9 = vsel %vm767_vm2, %v2692_v7, -inf }
 0x388   : > { %1234 = vmax.xlane.f32.xlu0 %v1233_v9 }
 0x389   : > { %v1423_v10 = vpop.f32.mrb[6].mxu0 }
 0x38a   : > { %v2697_v11 = vsel %vm765_vm3, %v1423_v10, -1e+30  ;;  %v2139_v12 = vpop.f32.mrb[7].mxu0 }
 0x38b   : > { %v1429_v13 = vsel %vm767_vm2, %v2697_v11, -inf }
 0x38c   : > { %1430 = vmax.xlane.f32.xlu0 %v1429_v13 }
 0x39b   : > { %v848_v16 = vpop.xlane.xlu0 %847 }
 0x39c   : > { %v2705_v18 = vmax.f32 %v2702_v15, %v848_v16 }
 0x39e   : > { %v850_v19 = vsub.f32 %v2702_v15, %v2705_v18  ;;  %954 = vst.msk [vmem:[#allocation3] sm:$0xff] %vm867_vm5, %v2705_v18 }
 0x3a0   : > { %v851_v57 = vmul.f32 1.442695, %v850_v19 }
 0x3a2   : > { %855 = vperm.xlu0 %2323, %v2705_v18  }
 0x3a5   : > { %v2712_v20 = vld [vmem:[#allocation3] sm:$0xff] }
 0x40e   : > { %v1039_v22 = vpop.xlane.xlu1 %1038 }
 0x40f   : > { %v2715_v23 = vmax.f32 %v2712_v20, %v1039_v22 }
 0x411   : > { %v1041_v24 = vsub.f32 %v2712_v20, %v2715_v23  ;;  %1150 = vst.msk [vmem:[#allocation3] sm:$0xff] %vm1058_vm6, %v2715_v23  ;;  %1046 = vperm.xlu1 %2324, %v2715_v23   ;;  %v869_v23 = vld [vmem:[#allocation5] sm:$0xff] }
 0x413   : > { %v1042_v61 = vmul.f32 1.442695, %v1041_v24 }
 0x415   : > { %2325 = vset.pattern.permute.xlu1 %v2448_v25  ;;  %v1235_v26 = vpop.xlane.xlu0 %1234 }
 0x418   : > { %v2723_v27 = vld [vmem:[#allocation3] sm:$0xff] }
 0x419   : > { %v2726_v28 = vmax.f32 %v2723_v27, %v1235_v26  ;;  %v1431_v31 = vpop.xlane.xlu0 %1430 }
 0x41b   : > { %v1237_v29 = vsub.f32 %v2723_v27, %v2726_v28  ;;  %1346 = vst.msk [vmem:[#allocation3] sm:$0xff] %vm1254_vm7, %v2726_v28  ;;  %1242 = vperm.xlu1 %2325, %v2726_v28  }
 0x41f   : > { %876 = vrot.lane.b32.xlu1 %v2653_v47, %s2449_s28 }
 0x420   : > { %2326 = vset.pattern.permute.xlu1 %v2450_v30 }
 0x421   : > { %v856_v35 = vpop.permute.xlu0 %855 }
 0x422   : > { %v2735_v32 = vld [vmem:[#allocation3] sm:$0xff]  ;;  %v858_v36 = vsub.f32 %v2680_v60, %v856_v35  ;;  %v1238_v60 = vmul.f32 1.442695, %v1237_v29 }
 0x423   : > { %v2738_v33 = vmax.f32 %v2735_v32, %v1431_v31  ;;  %1067 = vrot.lane.b32.xlu1 %v2653_v47, %s2451_s19 }
 0x424   : > { %v859_v37 = vmul.f32 1.442695, %v858_v36 }
 0x425   : > { %v1433_v34 = vsub.f32 %v2735_v32, %v2738_v33  ;;  %1542 = vst.msk [vmem:[#allocation3] sm:$0xff] %vm1450_vm8, %v2738_v33 }
 0x426   : > { %2339 = vpow2.f32 %v859_v37 }
 0x427   : > { %1438 = vperm.xlu1 %2326, %v2738_v33  }
 0x42b   : > { %1263 = vrot.lane.b32.xlu1 %v2653_v47, %s2452_s20 }
 0x42c   : > { %2327 = vset.pattern.permute.xlu1 %v2447_v14 }
 0x42f   : > { %1459 = vrot.lane.b32.xlu1 %v2653_v47, %s2453_s24 }
 0x430   : > { %v2340_v38 = vpop.eup %2339 }
 0x431   : > { %v863_v39 = vsel %vm767_vm2, %v2340_v38, 0.0 }
 0x453   : > { %864 = vadd.xlane.f32.xlu1 %v863_v39  ;;  %v1593_v39 = vld [vmem:[%s2970_s4] sm:$0xff] }
 0x490   : > { %v1047_v40 = vpop.permute.xlu1 %1046 }
 0x491   : > { %v1049_v41 = vsub.f32 %v2687_v3, %v1047_v40  ;;  %v861_v3 = vld [vmem:[#allocation4] sm:$0xff] }
 0x493   : > { %v1050_v42 = vmul.f32 1.442695, %v1049_v41  ;;  %v1596_v41 = vld [vmem:[%s2970_s4 + $0x18] sm:$0xff] }
 0x495   : > { %2341 = vpow2.f32 %v1050_v42 }
 0x49a   : > { %v1243_v43 = vpop.permute.xlu1 %1242 }
 0x49b   : > { %v1245_v44 = vsub.f32 %v2692_v7, %v1243_v43 }
 0x49d   : > { %v1246_v45 = vmul.f32 1.442695, %v1245_v44 }
 0x49e   : > { %v877_v46 = vpop.permute.xlu1 %876 }
 0x49f   : > { %v2342_v47 = vpop.eup %2341  ;;  %2343 = vpow2.f32 %v1246_v45  ;;  %2111 = vmatpush3.msra.mxu1 %v877_v46 }
 0x4a0   : > { %2113 = vmatmul.mubr.msk.f32.vlgmr.msra.gmra.mrb[4].mxu1 %vm767_vm2, %v2340_v38  ;;  %v1054_v48 = vsel %vm767_vm2, %v2342_v47, 0.0  ;;  %2120 = vmatprep.subr.mxu1 %v2441_v21 }
 0x4a1   : > { %1055 = vadd.xlane.f32.xlu0 %v1054_v48  ;;  %2122 = vmatprep.mubr.msk.f32.mxu1 %vm2440_vm1, %v2441_v21 }
 0x4a2   : > { %v1068_v49 = vpop.permute.xlu1 %1067 }
 0x4a3   : > { %2121 = vmatpush3.msra.mxu1 %v1068_v49 }
 0x4a4   : > { %2123 = vmatmul.mubr.msk.f32.vlgmr.msra.gmra.mrb[6].mxu1 %vm767_vm2, %v2342_v47  ;;  %2130 = vmatprep.subr.mxu1 %v2441_v21 }
 0x4a5   : > { %2132 = vmatprep.mubr.msk.f32.mxu1 %vm2440_vm1, %v2441_v21 }
 0x4a6   : > { %v1439_v50 = vpop.permute.xlu1 %1438 }
 0x4a7   : > { %v1441_v51 = vsub.f32 %v2697_v11, %v1439_v50  ;;  %v1434_v11 = vmul.f32 1.442695, %v1433_v34 }
 0x4a9   : > { %v2344_v52 = vpop.eup %2343  ;;  %v1442_v53 = vmul.f32 1.442695, %v1441_v51 }
 0x4aa   : > { %v1264_v54 = vpop.permute.xlu1 %1263  ;;  %v1250_v55 = vsel %vm767_vm2, %v2344_v52, 0.0 }
 0x4ab   : > { %2345 = vpow2.f32 %v1442_v53  ;;  %1251 = vadd.xlane.f32.xlu0 %v1250_v55  ;;  %2131 = vmatpush3.msra.mxu1 %v1264_v54 }
 0x4ac   : > { %2133 = vmatmul.mubr.msk.f32.vlgmr.msra.gmra.mrb[8].mxu1 %vm767_vm2, %v2344_v52  ;;  %2140 = vmatprep.subr.mxu1 %v2441_v21  ;;  %2347 = vpow2.f32 %v851_v57 }
 0x4ad   : > { %2142 = vmatprep.mubr.msk.f32.mxu1 %vm2440_vm1, %v2441_v21  ;;  %2349 = vpow2.f32 %v1238_v60 }
 0x4ae   : > { %v1460_v56 = vpop.permute.xlu1 %1459  ;;  %2351 = vpow2.f32 %v1042_v61 }
 0x4af   : > { %2141 = vmatpush3.msra.mxu1 %v1460_v56  ;;  %2353 = vpow2.f32 %v1434_v11 }
 0x4b0   : > { %2214 = vmatprep.subr.bf16.mxu1 %v2439_v17 }
 0x4b5   : > { %v2346_v58 = vpop.eup %2345 }
 0x4b6   : > { %2143 = vmatmul.mubr.msk.f32.vlgmr.msra.gmra.mrb[10].mxu1 %vm767_vm2, %v2346_v58  ;;  %v1446_v59 = vsel %vm767_vm2, %v2346_v58, 0.0  ;;  %v2348_v62 = vpop.eup %2347 }
 0x4b7   : > { %1447 = vadd.xlane.f32.xlu1 %v1446_v59  ;;  %2153 = vmatprep.mubr.msk.f32.mxu1 %vm2440_vm1, %v2441_v21  ;;  %v2350_v63 = vpop.eup %2349  ;;  %v862_v4 = vmul.f32 %v2348_v62, %v861_v3 }
 0x4b8   : > { %v2352_v2 = vpop.eup %2351 }
 0x4b9   : > { %v2354_v16 = vpop.eup %2353 }
 0x4c1   : > { %872 = vperm.xlu0 %2323, %v2348_v62  }
 0x4c5   : > { %2328 = vset.pattern.permute.xlu0 %v2448_v25 }
 0x4c6   : > { %1259 = vperm.xlu0 %2328, %v2350_v63  }
 0x4c8   : > { %1063 = vperm.xlu1 %2327, %v2352_v2  }
 0x4ca   : > { %2331 = vset.pattern.permute.xlu0 %v2447_v14 }
 0x4cc   : > { %2329 = vset.pattern.permute.xlu1 %v2450_v30 }
 0x4e0   : > { %v865_v5 = vpop.xlane.xlu1 %864 }
 0x4e1   : > { %v866_v6 = vadd.f32 %v865_v5, %v862_v4 }
 0x4e3   : > { %868 = vst.msk [vmem:[#allocation4] sm:$0xff] %vm867_vm5, %v866_v6 }
 0x4ea   : > { %v1052_v7 = vld [vmem:[#allocation4] sm:$0xff] }
 0x4eb   : > { %v1053_v8 = vmul.f32 %v2352_v2, %v1052_v7 }
 0x52e   : > { %v1056_v9 = vpop.xlane.xlu0 %1055 }
 0x52f   : > { %v1057_v10 = vadd.f32 %v1056_v9, %v1053_v8  ;;  %v2019_v8 = vld [vmem:[%s2971_s5] ss:$0 sm:$0xff] }
 0x531   : > { %1059 = vst.msk [vmem:[#allocation4] sm:$0xff] %vm1058_vm6, %v1057_v10 }
 0x538   : > { %v1248_v12 = vld [vmem:[#allocation4] sm:$0xff]  ;;  %v1252_v14 = vpop.xlane.xlu0 %1251 }
 0x539   : > { %v1249_v13 = vmul.f32 %v2350_v63, %v1248_v12 }
 0x53b   : > { %v1253_v15 = vadd.f32 %v1252_v14, %v1249_v13 }
 0x53d   : > { %1255 = vst.msk [vmem:[#allocation4] sm:$0xff] %vm1254_vm7, %v1253_v15 }
 0x540   : > { %v873_v24 = vpop.permute.xlu0 %872 }
 0x541   : > { %v875_v26 = vmul.f32 %v873_v24, %v869_v23  ;;  %v1712_v23 = vld [vmem:[%s2976_s10 + $0x18] sm:$0xff] }
 0x544   : > { %v1444_v18 = vld [vmem:[#allocation4] sm:$0xff]  ;;  %v1448_v20 = vpop.xlane.xlu1 %1447 }
 0x545   : > { %v1445_v19 = vmul.f32 %v2354_v16, %v1444_v18  ;;  %v1260_v47 = vpop.permute.xlu0 %1259 }
 0x547   : > { %v1449_v22 = vadd.f32 %v1448_v20, %v1445_v19  ;;  %v1709_v19 = vld [vmem:[%s2976_s10] sm:$0xff] }
 0x548   : > { %v1064_v42 = vpop.permute.xlu1 %1063 }
 0x549   : > { %1451 = vst.msk [vmem:[#allocation4] sm:$0xff] %vm1450_vm8, %v1449_v22  ;;  %v1711_v22 = vld [vmem:[%s2976_s10 + $0x10] sm:$0xff] }
 0x54a   : > { %v2224_v24 = vpack.c.bf16 %v1712_v23, %v1711_v22 }
 0x550   : > { %v1549_v33 = vld [vmem:[#allocation4] sm:$0xff] }
 0x551   : > { %2355 = vrcp.f32 %v1549_v33  ;;  %v1798_v33 = vld [vmem:[%s2978_s12 + $0x20] sm:$0xff] }
 0x55b   : > { %v2356_v36 = vpop.eup %2355 }
 0x573   : > { %v948_v27 = vpop.f32.mrb[4].mxu1 }
 0x574   : > { %v952_v28 = vadd.f32 %v948_v27, %v875_v26  ;;  %v2114_v29 = vpop.f32.mrb[5].mxu1  ;;  %v1794_v26 = vld [vmem:[%s2978_s12] sm:$0xff]  ;;  %v1795_v27 = vld [vmem:[%s2978_s12 + $0x8] sm:$0xff] }
 0x575   : > { %v2227_v29 = vpack.c.bf16 %v1795_v27, %v1794_v26 }
 0x576   : > { %953 = vst.msk [vmem:[#allocation5] sm:$0xff] %vm767_vm2, %v952_v28  ;;  %v1796_v28 = vld [vmem:[%s2978_s12 + $0x10] sm:$0xff] }
 0x577   : > { %v1139_v31 = vpop.f32.mrb[6].mxu1  ;;  %2228 = vmatpush3.bf16.msra.mxu0 %v2227_v29 }
 0x578   : > { %v2124_v32 = vpop.f32.mrb[7].mxu1  ;;  %1144 = vrot.lane.b32.xlu1 %v1139_v31, %s2454_s29  ;;  %v1797_v31 = vld [vmem:[%s2978_s12 + $0x18] sm:$0xff]  ;;  %2229 = vmatprep.subr.bf16.mxu0 %v2439_v17  ;;  %s2918_s29 = scalar_lea.hbm %s2980_s14, %s2027_s0 }
 0x579   : > { %v2230_v32 = vpack.c.bf16 %v1797_v31, %v1796_v28 }
 0x57b   : > { %2231 = vmatpush3.bf16.msra.mxu0 %v2230_v32 }
 0x57c   : > { %2232 = vmatprep.subr.bf16.mxu0 %v2439_v17 }
 0x57d   : > { %v1060_v43 = vld [vmem:[#allocation5] sm:$0xff] }
 0x57e   : > { %v1066_v44 = vmul.f32 %v1064_v42, %v1060_v43  ;;  %v1806_v42 = vld [vmem:[%s2978_s12 + $0x60] sm:$0xff]  ;;  %v1807_v43 = vld [vmem:[%s2978_s12 + $0x68] sm:$0xff] }
 0x57f   : > { %v1335_v34 = vpop.f32.mrb[8].mxu1 }
 0x580   : > { %v2134_v35 = vpop.f32.mrb[9].mxu1  ;;  %1340 = vrot.lane.b32.xlu1 %v1335_v34, %s2455_s17  ;;  %v1799_v34 = vld [vmem:[%s2978_s12 + $0x28] sm:$0xff]  ;;  %s506_s17 = sand.u32 1, %s2421_s30  }
 0x581   : > { %v2233_v35 = vpack.c.bf16 %v1799_v34, %v1798_v33  ;;  %s1890_s22 = scalar_lea.sflag [#allocation7], %s506_s17 }
 0x583   : > { %2234 = vmatpush3.bf16.msra.mxu0 %v2233_v35 }
 0x584   : > { %1455 = vperm.xlu1 %2329, %v2354_v16   ;;  %2235 = vmatprep.subr.bf16.mxu0 %v2439_v17 }
 0x588   : > { %2330 = vset.pattern.permute.xlu1 %v2446_v1  ;;  %v1594_v1 = vld [vmem:[%s2970_s4 + $0x8] sm:$0xff] }
 0x589   : > { %v1531_v37 = vpop.f32.mrb[10].mxu1  ;;  %1553 = vperm.xlu1 %2330, %v2356_v36   ;;  %v2215_v40 = vpack.c.bf16 %v1594_v1, %v1593_v39  ;;  %v1802_v39 = vld [vmem:[%s2978_s12 + $0x40] sm:$0xff]  ;;  %v1803_v1 = vld [vmem:[%s2978_s12 + $0x48] sm:$0xff] }
 0x58a   : > { %v2144_v38 = vpop.f32.mrb[11].mxu1  ;;  %1536 = vrot.lane.b32.xlu0 %v1531_v37, %s2456_s21  ;;  %v1801_v37 = vld [vmem:[%s2978_s12 + $0x38] sm:$0xff]  ;;  %s1998_s21 = sshll.u32 %s506_s17, 3 }
 0x58b   : > { %2216 = vmatpush3.bf16.msra.mxu1 %v2215_v40  ;;  %v2239_v40 = vpack.c.bf16 %v1803_v1, %v1802_v39  ;;  %s508_s28 = scalar_lea.vmem [#allocation6], %s1998_s21  ;;  %s2457_s21 = smov [#allocation6]  }
 0x58c   : > { %2217 = vmatprep.subr.bf16.mxu1 %v2439_v17  ;;  %s1904_s19 = sshll.u32 %s508_s28, 4  ;;  %s2363_s27 = sshll.u32 %s2457_s21, 4  ;;  %s2920_s19 = int_to_ptr.vmem [resolvable:$true] %s1904_s19  ;;  %s2364_s27 = int_to_ptr.vmem [resolvable:$false] %s2363_s27 }
 0x58d   : > { %2332 = vset.pattern.permute.xlu1 %v2448_v25  ;;  %v1595_v25 = vld [vmem:[%s2970_s4 + $0x10] sm:$0xff]  ;;  %s2359_s16 = scalar_lea.vmem %s2920_s19, 128  ;;  %s2365_s1 = scalar_lea.vmem %s2364_s27, 256 }
 0x58e   : > { %1564 = vperm.xlu0 %2331, %v2356_v36   ;;  %1575 = vperm.xlu1 %2332, %v2356_v36   ;;  %p2360_p12 = scmp.ne.s32.totalorder %s2920_s19, %s2359_s16  ;;  %p2366_p1 = scmp.lt.s32.totalorder %s2920_s19, %s2364_s27 }
 0x58f   : > { %p2367_p2 = scmp.lt.s32.totalorder %s2365_s1, %s2359_s16 }
 0x590   : > { %p2361_p13 = pnand %p2360_p12, %p2573_p4 }
 0x591   : > { %p2368_p3 = por %p2367_p2, %p2366_p1 }
 0x592   : > { %2333 = vset.pattern.permute.xlu1 %v2450_v30  ;;  %2334 = vset.pattern.permute.xlu0 %v2450_v30  ;;  %v2218_v30 = vpack.c.bf16 %v1596_v41, %v1595_v25  ;;  %v1804_v25 = vld [vmem:[%s2978_s12 + $0x50] sm:$0xff]  ;;  %v1805_v41 = vld [vmem:[%s2978_s12 + $0x58] sm:$0xff]  ;;  %p2362_p0 = pneg %p2361_p13 }
 0x593   : > { %1586 = vperm.xlu1 %2333, %v2356_v36   ;;  %v1800_v36 = vld [vmem:[%s2978_s12 + $0x30] sm:$0xff] }
 0x594   : > { %2219 = vmatpush3.bf16.msra.mxu1 %v2218_v30  ;;  %v2236_v38 = vpack.c.bf16 %v1801_v37, %v1800_v36  ;;  %v2242_v30 = vpack.c.bf16 %v1805_v41, %v1804_v25  ;;  %p2369_p5 = pnand %p2368_p3, %p2362_p0 }
 0x595   : > { %2220 = vmatprep.subr.bf16.mxu1 %v2439_v17 }
 0x596   : > { %2237 = vmatpush3.bf16.msra.mxu0 %v2236_v38 }
 0x597   : > { %2238 = vmatprep.subr.bf16.mxu0 %v2439_v17 }
 0x59a   : > { %2240 = vmatpush3.bf16.msra.mxu0 %v2239_v40 }
 0x59b   : > { %2241 = vmatprep.subr.bf16.mxu0 %v2439_v17 }
 0x59e   : > { %2243 = vmatpush3.bf16.msra.mxu0 %v2242_v30 }
 0x59f   : > { %2244 = vmatprep.subr.bf16.mxu0 %v2439_v17 }
 0x5ea   : > { %v1145_v45 = vpop.permute.xlu1 %1144 }
 0x5eb   : > { %v1147_v46 = vadd.f32 %v1145_v45, %v1066_v44  ;;  %v2245_v44 = vpack.c.bf16 %v1807_v43, %v1806_v42 }
 0x5ed   : > { %1149 = vst.msk [vmem:[#allocation5] sm:$0xff] %vm1148_vm9, %v1147_v46  ;;  %2246 = vmatpush3.bf16.msra.mxu0 %v2245_v44 }
 0x5ee   : > { %2247 = vmatprep.subr.bf16.mxu0 %v2439_v17 }
 0x5f2   : > { %v1341_v50 = vpop.permute.xlu1 %1340 }
 0x5f4   : > { %v1256_v48 = vld [vmem:[#allocation5] sm:$0xff] }
 0x5f5   : > { %v1262_v49 = vmul.f32 %v1260_v47, %v1256_v48 }
 0x5f7   : > { %v1343_v51 = vadd.f32 %v1341_v50, %v1262_v49  ;;  %v2021_v49 = vld [vmem:[%s2974_s8] ss:$0 sm:$0xff] }
 0x5f9   : > { %1345 = vst.msk [vmem:[#allocation5] sm:$0xff] %vm1344_vm10, %v1343_v51  ;;  %v2022_v51 = vld [vmem:[%s2975_s9] ss:$0 sm:$0xff] }
 0x5fc   : > { %v1537_v55 = vpop.permute.xlu0 %1536 }
 0x600   : > { %v1452_v52 = vld [vmem:[#allocation5] sm:$0xff] }
 0x603   : > { %v1456_v53 = vpop.permute.xlu1 %1455 }
 0x604   : > { %v1458_v54 = vmul.f32 %v1456_v53, %v1452_v52 }
 0x606   : > { %v1539_v56 = vadd.f32 %v1537_v55, %v1458_v54  ;;  %v1809_v54 = vld [vmem:[%s2978_s12 + $0x78] sm:$0xff] }
 0x608   : > { %1541 = vst.msk [vmem:[#allocation5] sm:$0xff] %vm1540_vm11, %v1539_v56  ;;  %v1554_v58 = vpop.permute.xlu1 %1553  ;;  %v2023_v56 = vld [vmem:[%s2977_s11] ss:$0 sm:$0xff] }
 0x60d   : > { %v1565_v60 = vpop.permute.xlu0 %1564  ;;  %v1576_v2 = vpop.permute.xlu1 %1575 }
 0x60f   : > { %v1548_v57 = vld [vmem:[#allocation5] sm:$0xff] }
 0x610   : > { %v1556_v59 = vmul.f32 %v1554_v58, %v1548_v57 }
 0x612   : > { %1558 = vst.msk [vmem:[#allocation5] sm:$0xff] %vm767_vm2, %v1556_v59  ;;  %v1587_v5 = vpop.permute.xlu1 %1586 }
 0x619   : > { %v1559_v61 = vld [vmem:[#allocation5] sm:$0xff] }
 0x61a   : > { %v1567_v62 = vmul.f32 %v1565_v60, %v1559_v61  ;;  %v2025_v61 = vld [vmem:[%s2979_s13] ss:$0 sm:$0xff] }
 0x61c   : > { %1569 = vst.msk [vmem:[#allocation5] sm:$0xff] %vm1148_vm9, %v1567_v62 }
 0x623   : > { %v1570_v63 = vld [vmem:[#allocation5] sm:$0xff] }
 0x624   : > { %v1578_v3 = vmul.f32 %v1576_v2, %v1570_v63 }
 0x626   : > { %1580 = vst.msk [vmem:[#allocation5] sm:$0xff] %vm1344_vm10, %v1578_v3 }
 0x62d   : > { %v1581_v4 = vld [vmem:[#allocation5] sm:$0xff] }
 0x62e   : > { %v1589_v6 = vmul.f32 %v1587_v5, %v1581_v4 }
 0x630   : > { %1591 = vst.msk [vmem:[#allocation5] sm:$0xff] %vm1540_vm11, %v1589_v6 }
 0x637   : > { %v1592_v7 = vld [vmem:[#allocation5] sm:$0xff] }
 0x638   : > { %2154 = vmatmul.mubr.msk.f32.vlgmr.msra.gmra.mrb[12].mxu1 %vm530_vm0, %v1592_v7 }
 0x639   : > { %2164 = vmatprep.mubr.msk.f32.mxu1 %vm2440_vm1, %v2441_v21 }
 0x70b   : > { %v1674_v9 = vpop.f32.mrb[12].mxu1 }
 0x70c   : > { %v1675_v10 = vadd.f32 %v2019_v8, %v1674_v9  ;;  %v2155_v11 = vpop.f32.mrb[13].mxu1 }
 0x70e   : > { %v2825_v12 = vadd.f32 %v1675_v10, %v2596_v0  ;;  %v1710_v0 = vld [vmem:[%s2976_s10 + $0x8] sm:$0xff] }
 0x70f   : > { %v2221_v20 = vpack.c.bf16 %v1710_v0, %v1709_v19 }
 0x710   : > { %v1681_v13 = vsel %vm530_vm0, %v2825_v12, 0.0 }
 0x711   : > { %1682 = vadd.xlane.f32.xlu0 %v1681_v13  ;;  %2222 = vmatpush3.bf16.msra.mxu1 %v2221_v20 }
 0x712   : > { %2223 = vmatprep.subr.bf16.mxu1 %v2439_v17  ;;  %v1808_v17 = vld [vmem:[%s2978_s12 + $0x70] sm:$0xff] }
 0x713   : > { %v2248_v55 = vpack.c.bf16 %v1809_v54, %v1808_v17 }
 0x715   : > { %2225 = vmatpush3.bf16.msra.mxu1 %v2224_v24  ;;  %2249 = vmatpush3.bf16.msra.mxu0 %v2248_v55 }
 0x79e   : > { %v1683_v14 = vpop.xlane.xlu0 %1682 }
 0x79f   : > { %v1685_v15 = vmul.f32 0.03125, %v1683_v14 }
 0x7a1   : > { %v1686_v16 = vsub.f32 %v2825_v12, %v1685_v15 }
 0x7a3   : > { %v1687_v18 = vmul.f32 %v1686_v16, %v1686_v16 }
 0x7a5   : > { %v1688_v21 = vsel %vm530_vm0, %v1687_v18, 0.0 }
 0x7a6   : > { %1689 = vadd.xlane.f32.xlu1 %v1688_v21 }
 0x833   : > { %v1690_v45 = vpop.xlane.xlu1 %1689 }
 0x834   : > { %v1691_v46 = vmul.f32 0.03125, %v1690_v45 }
 0x836   : > { %v1692_v47 = vadd.f32 1e-05, %v1691_v46 }
 0x838   : > { %2357 = vrsqrt.f32 %v1692_v47 }
 0x842   : > { %v2358_v48 = vpop.eup %2357 }
 0x843   : > { %v1694_v50 = vmul.f32 %v2358_v48, %v1686_v16 }
 0x845   : > { %v1701_v52 = vmul.f32 %v2021_v49, %v1694_v50 }
 0x847   : > { %v1708_v53 = vadd.f32 %v2022_v51, %v1701_v52 }
 0x849   : > { %2165 = vmatmul.mubr.msk.f32.vlgmr.msra.gmra.mrb[14].mxu1 %vm530_vm0, %v1708_v53 }
 0x91c   : > { %v1789_v57 = vpop.f32.mrb[14].mxu1 }
 0x91d   : > { %v1790_v58 = vadd.f32 %v2023_v56, %v1789_v57  ;;  %v2166_v59 = vpop.f32.mrb[15].mxu1 }
 0x91f   : > { %v1793_v60 = vmax.f32 %v1790_v58, 0.0 }
 0x921   : > { %2200 = vmatmul.mubr.f32.vlgmr.msra.gmra.mrb[8].mxu0 %v1793_v60 }
 0x9f4   : > { %v1883_v62 = vpop.f32.mrb[8].mxu0 }
 0x9f5   : > { %v1884_v63 = vadd.f32 %v2025_v61, %v1883_v62  ;;  %v2201_v2 = vpop.f32.mrb[9].mxu0 }
 0x9f7   : > { %v1887_v3 = vadd.f32 %v1884_v63, %v2825_v12 }
 0x9f9   : > { %1888 = vst.msk [vmem:[%s508_s28] sm:$0xff] %vm530_vm0, %v1887_v3 }
 0x9fa   : > { %2372 = shalt.err (!%p2369_p5)
}
 0x9fb   : > { %s2373_s17 = scalar_lea.hbm %s2918_s29, 128  ;;  %s2377_s20 = scalar_lea.hbm %s2980_s14, 256 }
 0x9fc   : > { %p2374_p6 = scmp.ne.s32.totalorder %s2918_s29, %s2373_s17  ;;  %p2378_p10 = scmp.lt.u32.totalorder %s2918_s29, %s2980_s14 }
 0x9fd   : > { %p2379_p11 = scmp.lt.u32.totalorder %s2377_s20, %s2373_s17  ;;  %p2381_p13 = scmp.lt.u32.totalorder %s2373_s17, %s2918_s29 }
 0x9fe   : > { %p2375_p7 = pnand %p2374_p6, %p2573_p4 }
 0x9ff   : > { %p2380_p12 = por %p2379_p11, %p2378_p10 }
 0xa00   : > { %p2376_p9 = pneg %p2375_p7 }
 0xa01   : > { %p2382_p0 = por %p2381_p13, %p2380_p12 }
 0xa03   : > { %p2383_p1 = pnand %p2382_p0, %p2376_p9 }
 0xa05   : > { %2386 = shalt.err (!%p2383_p1)
}
 0xa06   : > { %2250 = dma.vmem_to_hbm [thread:$0]  (%p2573_p4), %s2920_s19, 128, %s2918_s29, %s1890_s22  }
 0xa07 PF: > { %s2993_s1 = sld [smem:[#allocation9_spill]]  ;;  %p2256_p2 = scmp.ge.s32.totalorder %s2437_s18, 2 }
 0xa09   : > { %p2253_p3 = pnand %p2256_p2, %p2580_p8 }
 0xa0d   : > { %s1916_s16 = sand.u32 1, %s2993_s1  }
 0xa0e   : > { %s1917_s27 = scalar_lea.sflag [#allocation7], %s1916_s16 }
 0xa0f   : > { %2412 = dma.done.wait (!%p2253_p3), %s1917_s27, 128  }
 0xa10   : > { %2414 = vsyncadd (!%p2253_p3), %s1917_s27, 4294967168  ;;  %s27_s18 = sadd.s32 1, %s2437_s18   ;;  %s2994_s16 = sld [smem:[#allocation10_spill]] }
 0xa11   : > { %p24_p5 = scmp.ge.s32.totalorder %s27_s18, 4   ;;  %s2995_s17 = sld [smem:[#allocation11_spill]] }
 0xa12   : > { %s2996_s29 = smov %s2421_s30  ;;  %s2997_s30 = smov %s2425_s15 }
 0xa13   : > { %s2998_s15 = smov %s2586_s26  ;;  %26 = sbr.rel (!%p24_p5) target bundleno = 7 (0x7), region = 126 }
 0xa1a   :  { %1922 = vsyncpa [#allocation7], 1 }
 0xa1b   :  { %1924 = vsyncpa [#allocation7 + $0x1], 1 }

// kernel: tpu_custom_call.1
= control target key start
LH: loop header
LB: loop body
LE: loop exit
PB: predicated region body
PF: predicated region fallthrough
CT: control target
= control target key end

     0   :  { %s2966_s0 = inlined_call_operand.vmem [shape: f32[2,8,32], index: 0, kind: input, shape index: {}]   ;;  %s2967_s1 = inlined_call_operand.vmem [shape: f32[2,8,32], index: 1, kind: input, shape index: {}]   ;;  %s2968_s2 = inlined_call_operand.vmem [shape: f32[32,32], index: 2, kind: input, shape index: {}]   ;;  %s2969_s3 = inlined_call_operand.vmem [shape: f32[32,64], index: 3, kind: input, shape index: {}]   ;;  %s2970_s4 = inlined_call_operand.vmem [shape: f32[32,32], index: 4, kind: input, shape index: {}]   ;;  %s2971_s5 = inlined_call_operand.vmem [shape: f32[1,32], index: 5, kind: input, shape index: {}]   ;;  %s2972_s6 = inlined_call_operand.vmem [shape: f32[1,32], index: 6, kind: input, shape index: {}]   ;;  %s2973_s7 = inlined_call_operand.vmem [shape: f32[1,32], index: 7, kind: input, shape index: {}]   ;;  %s2974_s8 = inlined_call_operand.vmem [shape: f32[1,32], index: 8, kind: input, shape index: {}]   ;;  %s2975_s9 = inlined_call_operand.vmem [shape: f32[1,32], index: 9, kind: input, shape index: {}]   ;;  %s2976_s10 = inlined_call_operand.vmem [shape: f32[32,128], index: 10, kind: input, shape index: {}]   ;;  %s2977_s11 = inlined_call_operand.vmem [shape: f32[1,128], index: 11, kind: input, shape index: {}]   ;;  %s2978_s12 = inlined_call_operand.vmem [shape: f32[128,32], index: 12, kind: input, shape index: {}]   ;;  %s2979_s13 = inlined_call_operand.vmem [shape: f32[1,32], index: 13, kind: input, shape index: {}]   ;;  %s2980_s14 = inlined_call_operand.hbm [shape: f32[2,8,32], index: 14, kind: output, shape index: {}]  }
   0x1   :  { %2984 = sst [smem:[#allocation12_spill]] %s2966_s0 }
   0x2   :  { %2985 = sst [smem:[#allocation13_spill]] %s2967_s1 }
   0x3   :  { %19 = vsyncpa [#allocation7], 0 }
   0x4   :  { %21 = vsyncpa [#allocation7 + $0x1], 0  ;;  %s2533_s29 = smov 0   ;;  %s2535_s30 = smov 0  }
   0x5   :  { %s2537_s15 = smov 0   ;;  %s2539_s16 = smov 0  }
   0x6   :  { %s2541_s17 = smov 0   ;;  %s2543_s18 = smov 0  }
   0x7 LB: > { %2986 = sst [smem:[#allocation9_spill]] %s2417_s29  ;;  %s1993_s19 = sadd.s32 4294967295, %s2437_s18   ;;  %s2437_s18 = sphi %s2543_s18, %s27_s18   ;;  %s2433_s17 = sphi %s2541_s17, %s2995_s17   ;;  %s2429_s16 = sphi %s2539_s16, %s2994_s16   ;;  %s2425_s15 = sphi %s2537_s15, %s2998_s15   ;;  %s2421_s30 = sphi %s2535_s30, %s2997_s30   ;;  %s2417_s29 = sphi %s2533_s29, %s2996_s29  }
   0x8   : > { %2987 = sst [smem:[#allocation10_spill]] %s2433_s17  ;;  %s1994_s20 = sadd.s32 4294967294, %s2437_s18  }
   0x9   : > { %s46_s21 = sadd.s32 1, %s2433_s17  ;;  %s363_s22 = sadd.s32 1, %s2425_s15 }
   0xa   : > { %p48_p0 = scmp.ge.s32.totalorder %s46_s21, 2  ;;  %p373_p1 = scmp.ne.s32.totalorder %s2425_s15, %s2421_s30 }
   0xb   : > { %p374_p2 = scmp.eq.s32.totalorder %s1993_s19, 1  ;;  %p379_p3 = scmp.ne.s32.totalorder %s2421_s30, %s2417_s29 }
   0xc   : > { %s3000_s21 = smov (%p48_p0, %s46_s21), 0  ;;  %p380_p5 = scmp.eq.s32.totalorder %s1994_s20, 1 }
   0xd   : > { %2988 = sst [smem:[#allocation11_spill]] %s3000_s21  ;;  %p2573_p4 = por %p374_p2, %p373_p1 }
   0xe   : > { %s358_s24 = ssub.s32 %s2433_s17, %s3000_s21  ;;  %p1997_p6 = scmp.ge.s32.totalorder %s2437_s18, 1 }
   0xf   : > { %p361_p7 = scmp.eq.s32.totalorder %s358_s24, 0  ;;  %p2580_p8 = por %p380_p5, %p379_p3 }
  0x10   : > { %p454_p9 = scmp.lt.s32.totalorder %s2437_s18, 3 }
  0x11   : > { %s2586_s26 = scalar_select %p361_p7, %s2425_s15, %s363_s22  }
  0x12   : > { %p455_p10 = pnand %p1997_p6, %p454_p9 }
  0x13   : > { %p509_p11 = scmp.lt.s32.totalorder (!%p455_p10), %s2429_s16, 1  ;;  %vm530_vm0 = vcmask (!%p455_p10), 261120   ;;  %s2991_s0 = sld [smem:[#allocation12_spill]] (!%p455_p10)  ;;  %v559_v14 = vld [vmem:[%s2968_s2] sm:$0xff] (!%p455_p10)  ;;  %v560_v15 = vld [vmem:[%s2968_s2 + $0x8] sm:$0xff] (!%p455_p10)  ;;  %v2439_v17 = vmov (!%p455_p10), 0.0|0.0   ;;  %v756_v56 = vlaneseq (!%p455_p10) }
  0x14   : > { %458 = sbr.rel (%p455_p10) target bundleno = 2567 (0xa07), region = 76  ;;  %s2992_s1 = sld [smem:[#allocation13_spill]] (!%p455_p10)  ;;  %v2203_v16 = vpack.c.bf16 (!%p455_p10), %v560_v15, %v559_v14  ;;  %2202 = vmatprep.subr.bf16.mxu1 (!%p455_p10), %v2439_v17  ;;  %v561_v18 = vld [vmem:[%s2968_s2 + $0x10] sm:$0xff] (!%p455_p10)  ;;  %v562_v19 = vld [vmem:[%s2968_s2 + $0x18] sm:$0xff] (!%p455_p10)  ;;  %vm2440_vm1 = vmmov (!%p455_p10), 0   ;;  %v2441_v21 = vmov (!%p455_p10), 0.0  }
  0x15   : > { %v2206_v20 = vpack.c.bf16 (!%p455_p10), %v562_v19, %v561_v18  ;;  %2091 = vmatprep.mubr.msk.f32.mxu1 (!%p455_p10), %vm2440_vm1, %v2441_v21  ;;  %641 = vst.msk [vmem:[#allocation5] sm:$0xff] (!%p455_p10), %vm530_vm0, %v2441_v21  ;;  %2105 = vmatprep.subr.mxu0 (!%p455_p10), %v2441_v21  ;;  %v2001_v29 = vld [vmem:[%s2972_s6] ss:$0 sm:$0xff] (!%p455_p10)  ;;  %v679_v32 = vld [vmem:[%s2969_s3 + $0x8] sm:$0xff] (!%p455_p10)  ;;  %v680_v39 = vld [vmem:[%s2969_s3 + $0x10] sm:$0xff] (!%p455_p10)  ;;  %vm767_vm2 = vcmask (!%p455_p10), 64512  }
  0x16   : > { %2204 = vmatpush3.bf16.msra.mxu1 (!%p455_p10), %v2203_v16  ;;  %2107 = vmatprep.mubr.msk.f32.mxu0 (!%p455_p10), %vm2440_vm1, %v2441_v21  ;;  %v678_v31 = vld [vmem:[%s2969_s3] sm:$0xff] (!%p455_p10)  ;;  %v681_v40 = vld [vmem:[%s2969_s3 + $0x18] sm:$0xff] (!%p455_p10)  ;;  %s2443_s22 = smov (!%p455_p10), 104   ;;  %v757_v57 = vshrl.u32 (!%p455_p10), %v756_v56, 7  ;;  %v762_v58 = vand.u32 (!%p455_p10), 127, %v756_v56  ;;  %vm638_vm4 = vcmask (!%p455_p10), 31744  }
  0x17   : > { %2205 = vmatprep.subr.bf16.mxu1 (!%p455_p10), %v2439_v17  ;;  %v2002_v33 = vld [vmem:[%s2973_s7] ss:$0 sm:$0xff] (!%p455_p10)  ;;  %v2209_v36 = vpack.c.bf16 (!%p455_p10), %v679_v32, %v678_v31  ;;  %v2212_v41 = vpack.c.bf16 (!%p455_p10), %v681_v40, %v680_v39  ;;  %v2445_v63 = vmov (!%p455_p10), -1e+30   ;;  %640 = vst.msk [vmem:[#allocation4] sm:$0xff] (!%p455_p10), %vm638_vm4, %v2441_v21  ;;  %v2447_v14 = vmov (!%p455_p10), 1  }
  0x18   : > { %vm765_vm3 = vcmp.ge.s32.totalorder (!%p455_p10), %v757_v57, %v762_v58  ;;  %639 = vst.msk [vmem:[#allocation3] sm:$0xff] (!%p455_p10), %vm638_vm4, %v2445_v63  ;;  %2324 = vset.pattern.permute.xlu1 (!%p455_p10), %v2447_v14  ;;  %vm867_vm5 = vcmask (!%p455_p10), 7168   ;;  %vm1058_vm6 = vcmask (!%p455_p10), 15368   ;;  %vm1254_vm7 = vcmask (!%p455_p10), 23568   ;;  %s2451_s19 = smov (!%p455_p10), 88   ;;  %s2452_s20 = smov (!%p455_p10), 80  }
  0x19   : > { %vm1450_vm8 = vcmask (!%p455_p10), 31768   ;;  %s2453_s24 = smov (!%p455_p10), 72   ;;  %s2455_s17 = smov (!%p455_p10), 16   ;;  %vm1148_vm9 = vcmask (!%p455_p10), 130112   ;;  %vm1344_vm10 = vcmask (!%p455_p10), 195712   ;;  %vm1540_vm11 = vcmask (!%p455_p10), 261312  }
  0x1a   : > { %2207 = vmatpush3.bf16.msra.mxu1 (!%p455_p10), %v2206_v20 }
  0x1b   : > { %s510_s27 = scalar_select %p509_p11, %s2429_s16, 1  ;;  %2208 = vmatprep.subr.bf16.mxu1 %v2439_v17 }
  0x1d   : > { %s1999_s28 = sshll.u32 %s510_s27, 3  ;;  %s2444_s27 = smov 112  }
  0x1e   : > { %s515_s21 = scalar_lea.vmem %s2991_s0, %s1999_s28  ;;  %s522_s29 = scalar_lea.vmem %s2992_s1, %s1999_s28 }
  0x1f   : > { %v2596_v0 = vld [vmem:[%s515_s21] sm:$0xff]  ;;  %s2442_s21 = smov 120   ;;  %v2702_v15 = vld [vmem:[#allocation3] sm:$0xff]  ;;  %s2449_s28 = smov 96  }
  0x20   : > { %v646_v1 = vld [vmem:[%s522_s29] sm:$0xff]  ;;  %v531_v2 = vsel %vm530_vm0, %v2596_v0, 0.0  ;;  %s2454_s29 = smov 8   ;;  %s2027_s0 = sshll.u32 %s2429_s16, 7 }
  0x21   : > { %532 = vadd.xlane.f32.xlu0 %v531_v2  ;;  %v650_v3 = vsel %vm530_vm0, %v646_v1, 0.0 }
  0x25   : > { %651 = vadd.xlane.f32.xlu0 %v650_v3 }
  0xae   : > { %v533_v4 = vpop.xlane.xlu0 %532 }
  0xaf   : > { %v535_v5 = vmul.f32 0.03125, %v533_v4 }
  0xb1   : > { %v536_v6 = vsub.f32 %v2596_v0, %v535_v5 }
  0xb2   : > { %v652_v7 = vpop.xlane.xlu0 %651 }
  0xb3   : > { %v654_v8 = vmul.f32 0.03125, %v652_v7  ;;  %v537_v9 = vmul.f32 %v536_v6, %v536_v6 }
  0xb5   : > { %v655_v10 = vsub.f32 %v646_v1, %v654_v8  ;;  %v538_v11 = vsel %vm530_vm0, %v537_v9, 0.0  ;;  %v2446_v1 = vmov 0  }
  0xb6   : > { %539 = vadd.xlane.f32.xlu1 %v538_v11  ;;  %2323 = vset.pattern.permute.xlu0 %v2446_v1 }
  0xb7   : > { %v656_v12 = vmul.f32 %v655_v10, %v655_v10 }
  0xb9   : > { %v657_v13 = vsel %vm530_vm0, %v656_v12, 0.0 }
  0xba   : > { %658 = vadd.xlane.f32.xlu1 %v657_v13 }
 0x143   : > { %v540_v22 = vpop.xlane.xlu1 %539 }
 0x144   : > { %v541_v23 = vmul.f32 0.03125, %v540_v22 }
 0x146   : > { %v542_v24 = vadd.f32 1e-05, %v541_v23 }
 0x147   : > { %v659_v25 = vpop.xlane.xlu1 %658 }
 0x148   : > { %2335 = vrsqrt.f32 %v542_v24  ;;  %v660_v26 = vmul.f32 0.03125, %v659_v25  ;;  %v2448_v25 = vmov 2  }
 0x14a   : > { %v661_v27 = vadd.f32 1e-05, %v660_v26 }
 0x14c   : > { %2337 = vrsqrt.f32 %v661_v27 }
 0x152   : > { %v2336_v28 = vpop.eup %2335 }
 0x153   : > { %v544_v30 = vmul.f32 %v2336_v28, %v536_v6 }
 0x155   : > { %v551_v34 = vmul.f32 %v2001_v29, %v544_v30  ;;  %v2450_v30 = vmov 3  }
 0x156   : > { %v2338_v35 = vpop.eup %2337 }
 0x157   : > { %v663_v37 = vmul.f32 %v2338_v35, %v655_v10  ;;  %v558_v38 = vadd.f32 %v2002_v33, %v551_v34 }
 0x159   : > { %2092 = vmatmul.mubr.msk.f32.vlgmr.msra.gmra.mrb[0].mxu1 %vm530_vm0, %v558_v38  ;;  %v670_v42 = vmul.f32 %v2001_v29, %v663_v37 }
 0x15a   : > { %2210 = vmatpush3.bf16.msra.mxu1 %v2209_v36  ;;  %2102 = vmatprep.mubr.msk.f32.mxu1 %vm2440_vm1, %v2441_v21 }
 0x15b   : > { %2211 = vmatprep.subr.bf16.mxu1 %v2439_v17  ;;  %v677_v43 = vadd.f32 %v2002_v33, %v670_v42 }
 0x15e   : > { %2213 = vmatpush3.bf16.msra.mxu1 %v2212_v41 }
 0x15f   : > { %2110 = vmatprep.subr.mxu1 %v2441_v21 }
 0x161   : > { %2103 = vmatmul.mubr.msk.f32.vlgmr.msra.gmra.mrb[2].mxu1 %vm530_vm0, %v677_v43 }
 0x162   : > { %2112 = vmatprep.mubr.msk.f32.mxu1 %vm2440_vm1, %v2441_v21 }
 0x22c   : > { %v632_v44 = vpop.f32.mrb[0].mxu1 }
 0x22d   : > { %v636_v45 = vmul.f32 0.17677669, %v632_v44  ;;  %v2093_v46 = vpop.f32.mrb[1].mxu1 }
 0x22f   : > { %637 = vst.msk [vmem:[#allocation2] sm:$0xff] %vm530_vm0, %v636_v45 }
 0x234   : > { %v2653_v47 = vpop.f32.mrb[2].mxu1 }
 0x235   : > { %959 = vrot.lane.b32.xlu0 %v2653_v47, %s2442_s21  ;;  %v2104_v48 = vpop.f32.mrb[3].mxu1  ;;  %2106 = vmatpush3.xpose.msk.msra.mxu0 %vm767_vm2, %v2653_v47 }
 0x236   : > { %v955_v49 = vld [vmem:[#allocation2] sm:$0xff]  ;;  %2115 = vmatprep.subr.mxu0 %v2441_v21 }
 0x237   : > { %957 = vrot.lane.b32.xlu1 %v955_v49, %s2442_s21  ;;  %s2456_s21 = smov 24  }
 0x238   : > { %2108 = vmatmul.mubr.msk.f32.vlgmr.msra.gmra.mrb[0].mxu0 %vm767_vm2, %v955_v49 }
 0x239   : > { %1351 = vrot.lane.b32.xlu0 %v2653_v47, %s2443_s22  ;;  %2117 = vmatprep.mubr.msk.f32.mxu0 %vm2440_vm1, %v2441_v21 }
 0x23b   : > { %1155 = vrot.lane.b32.xlu1 %v2653_v47, %s2444_s27 }
 0x23f   : > { %1153 = vrot.lane.b32.xlu1 %v955_v49, %s2444_s27 }
 0x243   : > { %1349 = vrot.lane.b32.xlu1 %v955_v49, %s2443_s22 }
 0x2a7   : > { %v960_v50 = vpop.permute.xlu0 %959 }
 0x2a8   : > { %2116 = vmatpush3.xpose.msk.msra.mxu0 %vm767_vm2, %v960_v50 }
 0x2a9   : > { %v958_v51 = vpop.permute.xlu1 %957  ;;  %2125 = vmatprep.subr.mxu0 %v2441_v21 }
 0x2ab   : > { %2118 = vmatmul.mubr.msk.f32.vlgmr.msra.gmra.mrb[2].mxu0 %vm767_vm2, %v958_v51  ;;  %v1352_v54 = vpop.permute.xlu0 %1351 }
 0x2ac   : > { %2127 = vmatprep.mubr.msk.f32.mxu0 %vm2440_vm1, %v2441_v21 }
 0x2ad   : > { %v1156_v52 = vpop.permute.xlu1 %1155 }
 0x2ae   : > { %2126 = vmatpush3.xpose.msk.msra.mxu0 %vm767_vm2, %v1156_v52 }
 0x2af   : > { %2135 = vmatprep.subr.mxu0 %v2441_v21 }
 0x2b1   : > { %v1154_v53 = vpop.permute.xlu1 %1153 }
 0x2b2   : > { %2128 = vmatmul.mubr.msk.f32.vlgmr.msra.gmra.mrb[4].mxu0 %vm767_vm2, %v1154_v53 }
 0x2b3   : > { %2136 = vmatpush3.xpose.msk.msra.mxu0 %vm767_vm2, %v1352_v54  ;;  %2137 = vmatprep.mubr.msk.f32.mxu0 %vm2440_vm1, %v2441_v21 }
 0x2b4   : > { %2226 = vmatprep.subr.bf16.mxu0 %v2439_v17 }
 0x2b5   : > { %v1350_v55 = vpop.permute.xlu1 %1349 }
 0x2b6   : > { %2138 = vmatmul.mubr.msk.f32.vlgmr.msra.gmra.mrb[6].mxu0 %vm767_vm2, %v1350_v55 }
 0x2b7   : > { %2199 = vmatprep.mubr.msk.f32.mxu0 %vm2440_vm1, %v2441_v21 }
 0x30b   : > { %v840_v59 = vpop.f32.mrb[0].mxu0 }
 0x30c   : > { %v2680_v60 = vsel %vm765_vm3, %v840_v59, -1e+30  ;;  %v2109_v61 = vpop.f32.mrb[1].mxu0 }
 0x30d   : > { %v846_v62 = vsel %vm767_vm2, %v2680_v60, -inf }
 0x30e   : > { %847 = vmax.xlane.f32.xlu0 %v846_v62 }
 0x37e   : > { %v1031_v2 = vpop.f32.mrb[2].mxu0 }
 0x37f   : > { %v2687_v3 = vsel %vm765_vm3, %v1031_v2, -1e+30  ;;  %v2119_v4 = vpop.f32.mrb[3].mxu0 }
 0x380   : > { %v1037_v5 = vsel %vm767_vm2, %v2687_v3, -inf }
 0x381   : > { %1038 = vmax.xlane.f32.xlu1 %v1037_v5 }
 0x385   : > { %v1227_v6 = vpop.f32.mrb[4].mxu0 }
 0x386   : > { %v2692_v7 = vsel %vm765_vm3, %v1227_v6, -1e+30  ;;  %v2129_v8 = vpop.f32.mrb[5].mxu0 }
 0x387   : > { %v1233_v9 = vsel %vm767_vm2, %v2692_v7, -inf }
 0x388   : > { %1234 = vmax.xlane.f32.xlu0 %v1233_v9 }
 0x389   : > { %v1423_v10 = vpop.f32.mrb[6].mxu0 }
 0x38a   : > { %v2697_v11 = vsel %vm765_vm3, %v1423_v10, -1e+30  ;;  %v2139_v12 = vpop.f32.mrb[7].mxu0 }
 0x38b   : > { %v1429_v13 = vsel %vm767_vm2, %v2697_v11, -inf }
 0x38c   : > { %1430 = vmax.xlane.f32.xlu0 %v1429_v13 }
 0x39b   : > { %v848_v16 = vpop.xlane.xlu0 %847 }
 0x39c   : > { %v2705_v18 = vmax.f32 %v2702_v15, %v848_v16 }
 0x39e   : > { %v850_v19 = vsub.f32 %v2702_v15, %v2705_v18  ;;  %954 = vst.msk [vmem:[#allocation3] sm:$0xff] %vm867_vm5, %v2705_v18 }
 0x3a0   : > { %v851_v57 = vmul.f32 1.442695, %v850_v19 }
 0x3a2   : > { %855 = vperm.xlu0 %2323, %v2705_v18  }
 0x3a5   : > { %v2712_v20 = vld [vmem:[#allocation3] sm:$0xff] }
 0x40e   : > { %v1039_v22 = vpop.xlane.xlu1 %1038 }
 0x40f   : > { %v2715_v23 = vmax.f32 %v2712_v20, %v1039_v22 }
 0x411   : > { %v1041_v24 = vsub.f32 %v2712_v20, %v2715_v23  ;;  %1150 = vst.msk [vmem:[#allocation3] sm:$0xff] %vm1058_vm6, %v2715_v23  ;;  %1046 = vperm.xlu1 %2324, %v2715_v23   ;;  %v869_v23 = vld [vmem:[#allocation5] sm:$0xff] }
 0x413   : > { %v1042_v61 = vmul.f32 1.442695, %v1041_v24 }
 0x415   : > { %2325 = vset.pattern.permute.xlu1 %v2448_v25  ;;  %v1235_v26 = vpop.xlane.xlu0 %1234 }
 0x418   : > { %v2723_v27 = vld [vmem:[#allocation3] sm:$0xff] }
 0x419   : > { %v2726_v28 = vmax.f32 %v2723_v27, %v1235_v26  ;;  %v1431_v31 = vpop.xlane.xlu0 %1430 }
 0x41b   : > { %v1237_v29 = vsub.f32 %v2723_v27, %v2726_v28  ;;  %1346 = vst.msk [vmem:[#allocation3] sm:$0xff] %vm1254_vm7, %v2726_v28  ;;  %1242 = vperm.xlu1 %2325, %v2726_v28  }
 0x41f   : > { %876 = vrot.lane.b32.xlu1 %v2653_v47, %s2449_s28 }
 0x420   : > { %2326 = vset.pattern.permute.xlu1 %v2450_v30 }
 0x421   : > { %v856_v35 = vpop.permute.xlu0 %855 }
 0x422   : > { %v2735_v32 = vld [vmem:[#allocation3] sm:$0xff]  ;;  %v858_v36 = vsub.f32 %v2680_v60, %v856_v35  ;;  %v1238_v60 = vmul.f32 1.442695, %v1237_v29 }
 0x423   : > { %v2738_v33 = vmax.f32 %v2735_v32, %v1431_v31  ;;  %1067 = vrot.lane.b32.xlu1 %v2653_v47, %s2451_s19 }
 0x424   : > { %v859_v37 = vmul.f32 1.442695, %v858_v36 }
 0x425   : > { %v1433_v34 = vsub.f32 %v2735_v32, %v2738_v33  ;;  %1542 = vst.msk [vmem:[#allocation3] sm:$0xff] %vm1450_vm8, %v2738_v33 }
 0x426   : > { %2339 = vpow2.f32 %v859_v37 }
 0x427   : > { %1438 = vperm.xlu1 %2326, %v2738_v33  }
 0x42b   : > { %1263 = vrot.lane.b32.xlu1 %v2653_v47, %s2452_s20 }
 0x42c   : > { %2327 = vset.pattern.permute.xlu1 %v2447_v14 }
 0x42f   : > { %1459 = vrot.lane.b32.xlu1 %v2653_v47, %s2453_s24 }
 0x430   : > { %v2340_v38 = vpop.eup %2339 }
 0x431   : > { %v863_v39 = vsel %vm767_vm2, %v2340_v38, 0.0 }
 0x453   : > { %864 = vadd.xlane.f32.xlu1 %v863_v39  ;;  %v1593_v39 = vld [vmem:[%s2970_s4] sm:$0xff] }
 0x490   : > { %v1047_v40 = vpop.permute.xlu1 %1046 }
 0x491   : > { %v1049_v41 = vsub.f32 %v2687_v3, %v1047_v40  ;;  %v861_v3 = vld [vmem:[#allocation4] sm:$0xff] }
 0x493   : > { %v1050_v42 = vmul.f32 1.442695, %v1049_v41  ;;  %v1596_v41 = vld [vmem:[%s2970_s4 + $0x18] sm:$0xff] }
 0x495   : > { %2341 = vpow2.f32 %v1050_v42 }
 0x49a   : > { %v1243_v43 = vpop.permute.xlu1 %1242 }
 0x49b   : > { %v1245_v44 = vsub.f32 %v2692_v7, %v1243_v43 }
 0x49d   : > { %v1246_v45 = vmul.f32 1.442695, %v1245_v44 }
 0x49e   : > { %v877_v46 = vpop.permute.xlu1 %876 }
 0x49f   : > { %v2342_v47 = vpop.eup %2341  ;;  %2343 = vpow2.f32 %v1246_v45  ;;  %2111 = vmatpush3.msra.mxu1 %v877_v46 }
 0x4a0   : > { %2113 = vmatmul.mubr.msk.f32.vlgmr.msra.gmra.mrb[4].mxu1 %vm767_vm2, %v2340_v38  ;;  %v1054_v48 = vsel %vm767_vm2, %v2342_v47, 0.0  ;;  %2120 = vmatprep.subr.mxu1 %v2441_v21 }
 0x4a1   : > { %1055 = vadd.xlane.f32.xlu0 %v1054_v48  ;;  %2122 = vmatprep.mubr.msk.f32.mxu1 %vm2440_vm1, %v2441_v21 }
 0x4a2   : > { %v1068_v49 = vpop.permute.xlu1 %1067 }
 0x4a3   : > { %2121 = vmatpush3.msra.mxu1 %v1068_v49 }
 0x4a4   : > { %2123 = vmatmul.mubr.msk.f32.vlgmr.msra.gmra.mrb[6].mxu1 %vm767_vm2, %v2342_v47  ;;  %2130 = vmatprep.subr.mxu1 %v2441_v21 }
 0x4a5   : > { %2132 = vmatprep.mubr.msk.f32.mxu1 %vm2440_vm1, %v2441_v21 }
 0x4a6   : > { %v1439_v50 = vpop.permute.xlu1 %1438 }
 0x4a7   : > { %v1441_v51 = vsub.f32 %v2697_v11, %v1439_v50  ;;  %v1434_v11 = vmul.f32 1.442695, %v1433_v34 }
 0x4a9   : > { %v2344_v52 = vpop.eup %2343  ;;  %v1442_v53 = vmul.f32 1.442695, %v1441_v51 }
 0x4aa   : > { %v1264_v54 = vpop.permute.xlu1 %1263  ;;  %v1250_v55 = vsel %vm767_vm2, %v2344_v52, 0.0 }
 0x4ab   : > { %2345 = vpow2.f32 %v1442_v53  ;;  %1251 = vadd.xlane.f32.xlu0 %v1250_v55  ;;  %2131 = vmatpush3.msra.mxu1 %v1264_v54 }
 0x4ac   : > { %2133 = vmatmul.mubr.msk.f32.vlgmr.msra.gmra.mrb[8].mxu1 %vm767_vm2, %v2344_v52  ;;  %2140 = vmatprep.subr.mxu1 %v2441_v21  ;;  %2347 = vpow2.f32 %v851_v57 }
 0x4ad   : > { %2142 = vmatprep.mubr.msk.f32.mxu1 %vm2440_vm1, %v2441_v21  ;;  %2349 = vpow2.f32 %v1238_v60 }
 0x4ae   : > { %v1460_v56 = vpop.permute.xlu1 %1459  ;;  %2351 = vpow2.f32 %v1042_v61 }
 0x4af   : > { %2141 = vmatpush3.msra.mxu1 %v1460_v56  ;;  %2353 = vpow2.f32 %v1434_v11 }
 0x4b0   : > { %2214 = vmatprep.subr.bf16.mxu1 %v2439_v17 }
 0x4b5   : > { %v2346_v58 = vpop.eup %2345 }
 0x4b6   : > { %2143 = vmatmul.mubr.msk.f32.vlgmr.msra.gmra.mrb[10].mxu1 %vm767_vm2, %v2346_v58  ;;  %v1446_v59 = vsel %vm767_vm2, %v2346_v58, 0.0  ;;  %v2348_v62 = vpop.eup %2347 }
 0x4b7   : > { %1447 = vadd.xlane.f32.xlu1 %v1446_v59  ;;  %2153 = vmatprep.mubr.msk.f32.mxu1 %vm2440_vm1, %v2441_v21  ;;  %v2350_v63 = vpop.eup %2349  ;;  %v862_v4 = vmul.f32 %v2348_v62, %v861_v3 }
 0x4b8   : > { %v2352_v2 = vpop.eup %2351 }
 0x4b9   : > { %v2354_v16 = vpop.eup %2353 }
 0x4c1   : > { %872 = vperm.xlu0 %2323, %v2348_v62  }
 0x4c5   : > { %2328 = vset.pattern.permute.xlu0 %v2448_v25 }
 0x4c6   : > { %1259 = vperm.xlu0 %2328, %v2350_v63  }
 0x4c8   : > { %1063 = vperm.xlu1 %2327, %v2352_v2  }
 0x4ca   : > { %2331 = vset.pattern.permute.xlu0 %v2447_v14 }
 0x4cc   : > { %2329 = vset.pattern.permute.xlu1 %v2450_v30 }
 0x4e0   : > { %v865_v5 = vpop.xlane.xlu1 %864 }
 0x4e1   : > { %v866_v6 = vadd.f32 %v865_v5, %v862_v4 }
 0x4e3   : > { %868 = vst.msk [vmem:[#allocation4] sm:$0xff] %vm867_vm5, %v866_v6 }
 0x4ea   : > { %v1052_v7 = vld [vmem:[#allocation4] sm:$0xff] }
 0x4eb   : > { %v1053_v8 = vmul.f32 %v2352_v2, %v1052_v7 }
 0x52e   : > { %v1056_v9 = vpop.xlane.xlu0 %1055 }
 0x52f   : > { %v1057_v10 = vadd.f32 %v1056_v9, %v1053_v8  ;;  %v2019_v8 = vld [vmem:[%s2971_s5] ss:$0 sm:$0xff] }
 0x531   : > { %1059 = vst.msk [vmem:[#allocation4] sm:$0xff] %vm1058_vm6, %v1057_v10 }
 0x538   : > { %v1248_v12 = vld [vmem:[#allocation4] sm:$0xff]  ;;  %v1252_v14 = vpop.xlane.xlu0 %1251 }
 0x539   : > { %v1249_v13 = vmul.f32 %v2350_v63, %v1248_v12 }
 0x53b   : > { %v1253_v15 = vadd.f32 %v1252_v14, %v1249_v13 }
 0x53d   : > { %1255 = vst.msk [vmem:[#allocation4] sm:$0xff] %vm1254_vm7, %v1253_v15 }
 0x540   : > { %v873_v24 = vpop.permute.xlu0 %872 }
 0x541   : > { %v875_v26 = vmul.f32 %v873_v24, %v869_v23  ;;  %v1712_v23 = vld [vmem:[%s2976_s10 + $0x18] sm:$0xff] }
 0x544   : > { %v1444_v18 = vld [vmem:[#allocation4] sm:$0xff]  ;;  %v1448_v20 = vpop.xlane.xlu1 %1447 }
 0x545   : > { %v1445_v19 = vmul.f32 %v2354_v16, %v1444_v18  ;;  %v1260_v47 = vpop.permute.xlu0 %1259 }
 0x547   : > { %v1449_v22 = vadd.f32 %v1448_v20, %v1445_v19  ;;  %v1709_v19 = vld [vmem:[%s2976_s10] sm:$0xff] }
 0x548   : > { %v1064_v42 = vpop.permute.xlu1 %1063 }
 0x549   : > { %1451 = vst.msk [vmem:[#allocation4] sm:$0xff] %vm1450_vm8, %v1449_v22  ;;  %v1711_v22 = vld [vmem:[%s2976_s10 + $0x10] sm:$0xff] }
 0x54a   : > { %v2224_v24 = vpack.c.bf16 %v1712_v23, %v1711_v22 }
 0x550   : > { %v1549_v33 = vld [vmem:[#allocation4] sm:$0xff] }
 0x551   : > { %2355 = vrcp.f32 %v1549_v33  ;;  %v1798_v33 = vld [vmem:[%s2978_s12 + $0x20] sm:$0xff] }
 0x55b   : > { %v2356_v36 = vpop.eup %2355 }
 0x573   : > { %v948_v27 = vpop.f32.mrb[4].mxu1 }
 0x574   : > { %v952_v28 = vadd.f32 %v948_v27, %v875_v26  ;;  %v2114_v29 = vpop.f32.mrb[5].mxu1  ;;  %v1794_v26 = vld [vmem:[%s2978_s12] sm:$0xff]  ;;  %v1795_v27 = vld [vmem:[%s2978_s12 + $0x8] sm:$0xff] }
 0x575   : > { %v2227_v29 = vpack.c.bf16 %v1795_v27, %v1794_v26 }
 0x576   : > { %953 = vst.msk [vmem:[#allocation5] sm:$0xff] %vm767_vm2, %v952_v28  ;;  %v1796_v28 = vld [vmem:[%s2978_s12 + $0x10] sm:$0xff] }
 0x577   : > { %v1139_v31 = vpop.f32.mrb[6].mxu1  ;;  %2228 = vmatpush3.bf16.msra.mxu0 %v2227_v29 }
 0x578   : > { %v2124_v32 = vpop.f32.mrb[7].mxu1  ;;  %1144 = vrot.lane.b32.xlu1 %v1139_v31, %s2454_s29  ;;  %v1797_v31 = vld [vmem:[%s2978_s12 + $0x18] sm:$0xff]  ;;  %2229 = vmatprep.subr.bf16.mxu0 %v2439_v17  ;;  %s2918_s29 = scalar_lea.hbm %s2980_s14, %s2027_s0 }
 0x579   : > { %v2230_v32 = vpack.c.bf16 %v1797_v31, %v1796_v28 }
 0x57b   : > { %2231 = vmatpush3.bf16.msra.mxu0 %v2230_v32 }
 0x57c   : > { %2232 = vmatprep.subr.bf16.mxu0 %v2439_v17 }
 0x57d   : > { %v1060_v43 = vld [vmem:[#allocation5] sm:$0xff] }
 0x57e   : > { %v1066_v44 = vmul.f32 %v1064_v42, %v1060_v43  ;;  %v1806_v42 = vld [vmem:[%s2978_s12 + $0x60] sm:$0xff]  ;;  %v1807_v43 = vld [vmem:[%s2978_s12 + $0x68] sm:$0xff] }
 0x57f   : > { %v1335_v34 = vpop.f32.mrb[8].mxu1 }
 0x580   : > { %v2134_v35 = vpop.f32.mrb[9].mxu1  ;;  %1340 = vrot.lane.b32.xlu1 %v1335_v34, %s2455_s17  ;;  %v1799_v34 = vld [vmem:[%s2978_s12 + $0x28] sm:$0xff]  ;;  %s506_s17 = sand.u32 1, %s2421_s30  }
 0x581   : > { %v2233_v35 = vpack.c.bf16 %v1799_v34, %v1798_v33  ;;  %s1890_s22 = scalar_lea.sflag [#allocation7], %s506_s17 }
 0x583   : > { %2234 = vmatpush3.bf16.msra.mxu0 %v2233_v35 }
 0x584   : > { %1455 = vperm.xlu1 %2329, %v2354_v16   ;;  %2235 = vmatprep.subr.bf16.mxu0 %v2439_v17 }
 0x588   : > { %2330 = vset.pattern.permute.xlu1 %v2446_v1  ;;  %v1594_v1 = vld [vmem:[%s2970_s4 + $0x8] sm:$0xff] }
 0x589   : > { %v1531_v37 = vpop.f32.mrb[10].mxu1  ;;  %1553 = vperm.xlu1 %2330, %v2356_v36   ;;  %v2215_v40 = vpack.c.bf16 %v1594_v1, %v1593_v39  ;;  %v1802_v39 = vld [vmem:[%s2978_s12 + $0x40] sm:$0xff]  ;;  %v1803_v1 = vld [vmem:[%s2978_s12 + $0x48] sm:$0xff] }
 0x58a   : > { %v2144_v38 = vpop.f32.mrb[11].mxu1  ;;  %1536 = vrot.lane.b32.xlu0 %v1531_v37, %s2456_s21  ;;  %v1801_v37 = vld [vmem:[%s2978_s12 + $0x38] sm:$0xff]  ;;  %s1998_s21 = sshll.u32 %s506_s17, 3 }
 0x58b   : > { %2216 = vmatpush3.bf16.msra.mxu1 %v2215_v40  ;;  %v2239_v40 = vpack.c.bf16 %v1803_v1, %v1802_v39  ;;  %s508_s28 = scalar_lea.vmem [#allocation6], %s1998_s21  ;;  %s2457_s21 = smov [#allocation6]  }
 0x58c   : > { %2217 = vmatprep.subr.bf16.mxu1 %v2439_v17  ;;  %s1904_s19 = sshll.u32 %s508_s28, 4  ;;  %s2363_s27 = sshll.u32 %s2457_s21, 4  ;;  %s2920_s19 = int_to_ptr.vmem [resolvable:$true] %s1904_s19  ;;  %s2364_s27 = int_to_ptr.vmem [resolvable:$false] %s2363_s27 }
 0x58d   : > { %2332 = vset.pattern.permute.xlu1 %v2448_v25  ;;  %v1595_v25 = vld [vmem:[%s2970_s4 + $0x10] sm:$0xff]  ;;  %s2359_s16 = scalar_lea.vmem %s2920_s19, 128  ;;  %s2365_s1 = scalar_lea.vmem %s2364_s27, 256 }
 0x58e   : > { %1564 = vperm.xlu0 %2331, %v2356_v36   ;;  %1575 = vperm.xlu1 %2332, %v2356_v36   ;;  %p2360_p12 = scmp.ne.s32.totalorder %s2920_s19, %s2359_s16  ;;  %p2366_p1 = scmp.lt.s32.totalorder %s2920_s19, %s2364_s27 }
 0x58f   : > { %p2367_p2 = scmp.lt.s32.totalorder %s2365_s1, %s2359_s16 }
 0x590   : > { %p2361_p13 = pnand %p2360_p12, %p2573_p4 }
 0x591   : > { %p2368_p3 = por %p2367_p2, %p2366_p1 }
 0x592   : > { %2333 = vset.pattern.permute.xlu1 %v2450_v30  ;;  %2334 = vset.pattern.permute.xlu0 %v2450_v30  ;;  %v2218_v30 = vpack.c.bf16 %v1596_v41, %v1595_v25  ;;  %v1804_v25 = vld [vmem:[%s2978_s12 + $0x50] sm:$0xff]  ;;  %v1805_v41 = vld [vmem:[%s2978_s12 + $0x58] sm:$0xff]  ;;  %p2362_p0 = pneg %p2361_p13 }
 0x593   : > { %1586 = vperm.xlu1 %2333, %v2356_v36   ;;  %v1800_v36 = vld [vmem:[%s2978_s12 + $0x30] sm:$0xff] }
 0x594   : > { %2219 = vmatpush3.bf16.msra.mxu1 %v2218_v30  ;;  %v2236_v38 = vpack.c.bf16 %v1801_v37, %v1800_v36  ;;  %v2242_v30 = vpack.c.bf16 %v1805_v41, %v1804_v25  ;;  %p2369_p5 = pnand %p2368_p3, %p2362_p0 }
 0x595   : > { %2220 = vmatprep.subr.bf16.mxu1 %v2439_v17 }
 0x596   : > { %2237 = vmatpush3.bf16.msra.mxu0 %v2236_v38 }
 0x597   : > { %2238 = vmatprep.subr.bf16.mxu0 %v2439_v17 }
 0x59a   : > { %2240 = vmatpush3.bf16.msra.mxu0 %v2239_v40 }
 0x59b   : > { %2241 = vmatprep.subr.bf16.mxu0 %v2439_v17 }
 0x59e   : > { %2243 = vmatpush3.bf16.msra.mxu0 %v2242_v30 }
 0x59f   : > { %2244 = vmatprep.subr.bf16.mxu0 %v2439_v17 }
 0x5ea   : > { %v1145_v45 = vpop.permute.xlu1 %1144 }
 0x5eb   : > { %v1147_v46 = vadd.f32 %v1145_v45, %v1066_v44  ;;  %v2245_v44 = vpack.c.bf16 %v1807_v43, %v1806_v42 }
 0x5ed   : > { %1149 = vst.msk [vmem:[#allocation5] sm:$0xff] %vm1148_vm9, %v1147_v46  ;;  %2246 = vmatpush3.bf16.msra.mxu0 %v2245_v44 }
 0x5ee   : > { %2247 = vmatprep.subr.bf16.mxu0 %v2439_v17 }
 0x5f2   : > { %v1341_v50 = vpop.permute.xlu1 %1340 }
 0x5f4   : > { %v1256_v48 = vld [vmem:[#allocation5] sm:$0xff] }
 0x5f5   : > { %v1262_v49 = vmul.f32 %v1260_v47, %v1256_v48 }
 0x5f7   : > { %v1343_v51 = vadd.f32 %v1341_v50, %v1262_v49  ;;  %v2021_v49 = vld [vmem:[%s2974_s8] ss:$0 sm:$0xff] }
 0x5f9   : > { %1345 = vst.msk [vmem:[#allocation5] sm:$0xff] %vm1344_vm10, %v1343_v51  ;;  %v2022_v51 = vld [vmem:[%s2975_s9] ss:$0 sm:$0xff] }
 0x5fc   : > { %v1537_v55 = vpop.permute.xlu0 %1536 }
 0x600   : > { %v1452_v52 = vld [vmem:[#allocation5] sm:$0xff] }
 0x603   : > { %v1456_v53 = vpop.permute.xlu1 %1455 }
 0x604   : > { %v1458_v54 = vmul.f32 %v1456_v53, %v1452_v52 }
 0x606   : > { %v1539_v56 = vadd.f32 %v1537_v55, %v1458_v54  ;;  %v1809_v54 = vld [vmem:[%s2978_s12 + $0x78] sm:$0xff] }
 0x608   : > { %1541 = vst.msk [vmem:[#allocation5] sm:$0xff] %vm1540_vm11, %v1539_v56  ;;  %v1554_v58 = vpop.permute.xlu1 %1553  ;;  %v2023_v56 = vld [vmem:[%s2977_s11] ss:$0 sm:$0xff] }
 0x60d   : > { %v1565_v60 = vpop.permute.xlu0 %1564  ;;  %v1576_v2 = vpop.permute.xlu1 %1575 }
 0x60f   : > { %v1548_v57 = vld [vmem:[#allocation5] sm:$0xff] }
 0x610   : > { %v1556_v59 = vmul.f32 %v1554_v58, %v1548_v57 }
 0x612   : > { %1558 = vst.msk [vmem:[#allocation5] sm:$0xff] %vm767_vm2, %v1556_v59  ;;  %v1587_v5 = vpop.permute.xlu1 %1586 }
 0x619   : > { %v1559_v61 = vld [vmem:[#allocation5] sm:$0xff] }
 0x61a   : > { %v1567_v62 = vmul.f32 %v1565_v60, %v1559_v61  ;;  %v2025_v61 = vld [vmem:[%s2979_s13] ss:$0 sm:$0xff] }
 0x61c   : > { %1569 = vst.msk [vmem:[#allocation5] sm:$0xff] %vm1148_vm9, %v1567_v62 }
 0x623   : > { %v1570_v63 = vld [vmem:[#allocation5] sm:$0xff] }
 0x624   : > { %v1578_v3 = vmul.f32 %v1576_v2, %v1570_v63 }
 0x626   : > { %1580 = vst.msk [vmem:[#allocation5] sm:$0xff] %vm1344_vm10, %v1578_v3 }
 0x62d   : > { %v1581_v4 = vld [vmem:[#allocation5] sm:$0xff] }
 0x62e   : > { %v1589_v6 = vmul.f32 %v1587_v5, %v1581_v4 }
 0x630   : > { %1591 = vst.msk [vmem:[#allocation5] sm:$0xff] %vm1540_vm11, %v1589_v6 }
 0x637   : > { %v1592_v7 = vld [vmem:[#allocation5] sm:$0xff] }
 0x638   : > { %2154 = vmatmul.mubr.msk.f32.vlgmr.msra.gmra.mrb[12].mxu1 %vm530_vm0, %v1592_v7 }
 0x639   : > { %2164 = vmatprep.mubr.msk.f32.mxu1 %vm2440_vm1, %v2441_v21 }
 0x70b   : > { %v1674_v9 = vpop.f32.mrb[12].mxu1 }
 0x70c   : > { %v1675_v10 = vadd.f32 %v2019_v8, %v1674_v9  ;;  %v2155_v11 = vpop.f32.mrb[13].mxu1 }
 0x70e   : > { %v2825_v12 = vadd.f32 %v1675_v10, %v2596_v0  ;;  %v1710_v0 = vld [vmem:[%s2976_s10 + $0x8] sm:$0xff] }
 0x70f   : > { %v2221_v20 = vpack.c.bf16 %v1710_v0, %v1709_v19 }
 0x710   : > { %v1681_v13 = vsel %vm530_vm0, %v2825_v12, 0.0 }
 0x711   : > { %1682 = vadd.xlane.f32.xlu0 %v1681_v13  ;;  %2222 = vmatpush3.bf16.msra.mxu1 %v2221_v20 }
 0x712   : > { %2223 = vmatprep.subr.bf16.mxu1 %v2439_v17  ;;  %v1808_v17 = vld [vmem:[%s2978_s12 + $0x70] sm:$0xff] }
 0x713   : > { %v2248_v55 = vpack.c.bf16 %v1809_v54, %v1808_v17 }
 0x715   : > { %2225 = vmatpush3.bf16.msra.mxu1 %v2224_v24  ;;  %2249 = vmatpush3.bf16.msra.mxu0 %v2248_v55 }
 0x79e   : > { %v1683_v14 = vpop.xlane.xlu0 %1682 }
 0x79f   : > { %v1685_v15 = vmul.f32 0.03125, %v1683_v14 }
 0x7a1   : > { %v1686_v16 = vsub.f32 %v2825_v12, %v1685_v15 }
 0x7a3   : > { %v1687_v18 = vmul.f32 %v1686_v16, %v1686_v16 }
 0x7a5   : > { %v1688_v21 = vsel %vm530_vm0, %v1687_v18, 0.0 }
 0x7a6   : > { %1689 = vadd.xlane.f32.xlu1 %v1688_v21 }
 0x833   : > { %v1690_v45 = vpop.xlane.xlu1 %1689 }
 0x834   : > { %v1691_v46 = vmul.f32 0.03125, %v1690_v45 }
 0x836   : > { %v1692_v47 = vadd.f32 1e-05, %v1691_v46 }
 0x838   : > { %2357 = vrsqrt.f32 %v1692_v47 }
 0x842   : > { %v2358_v48 = vpop.eup %2357 }
 0x843   : > { %v1694_v50 = vmul.f32 %v2358_v48, %v1686_v16 }
 0x845   : > { %v1701_v52 = vmul.f32 %v2021_v49, %v1694_v50 }
 0x847   : > { %v1708_v53 = vadd.f32 %v2022_v51, %v1701_v52 }
 0x849   : > { %2165 = vmatmul.mubr.msk.f32.vlgmr.msra.gmra.mrb[14].mxu1 %vm530_vm0, %v1708_v53 }
 0x91c   : > { %v1789_v57 = vpop.f32.mrb[14].mxu1 }
 0x91d   : > { %v1790_v58 = vadd.f32 %v2023_v56, %v1789_v57  ;;  %v2166_v59 = vpop.f32.mrb[15].mxu1 }
 0x91f   : > { %v1793_v60 = vmax.f32 %v1790_v58, 0.0 }
 0x921   : > { %2200 = vmatmul.mubr.f32.vlgmr.msra.gmra.mrb[8].mxu0 %v1793_v60 }
 0x9f4   : > { %v1883_v62 = vpop.f32.mrb[8].mxu0 }
 0x9f5   : > { %v1884_v63 = vadd.f32 %v2025_v61, %v1883_v62  ;;  %v2201_v2 = vpop.f32.mrb[9].mxu0 }
 0x9f7   : > { %v1887_v3 = vadd.f32 %v1884_v63, %v2825_v12 }
 0x9f9   : > { %1888 = vst.msk [vmem:[%s508_s28] sm:$0xff] %vm530_vm0, %v1887_v3 }
 0x9fa   : > { %2372 = shalt.err (!%p2369_p5)
}
 0x9fb   : > { %s2373_s17 = scalar_lea.hbm %s2918_s29, 128  ;;  %s2377_s20 = scalar_lea.hbm %s2980_s14, 256 }
 0x9fc   : > { %p2374_p6 = scmp.ne.s32.totalorder %s2918_s29, %s2373_s17  ;;  %p2378_p10 = scmp.lt.u32.totalorder %s2918_s29, %s2980_s14 }
 0x9fd   : > { %p2379_p11 = scmp.lt.u32.totalorder %s2377_s20, %s2373_s17  ;;  %p2381_p13 = scmp.lt.u32.totalorder %s2373_s17, %s2918_s29 }
 0x9fe   : > { %p2375_p7 = pnand %p2374_p6, %p2573_p4 }
 0x9ff   : > { %p2380_p12 = por %p2379_p11, %p2378_p10 }
 0xa00   : > { %p2376_p9 = pneg %p2375_p7 }
 0xa01   : > { %p2382_p0 = por %p2381_p13, %p2380_p12 }
 0xa03   : > { %p2383_p1 = pnand %p2382_p0, %p2376_p9 }
 0xa05   : > { %2386 = shalt.err (!%p2383_p1)
}
 0xa06   : > { %2250 = dma.vmem_to_hbm [thread:$0]  (%p2573_p4), %s2920_s19, 128, %s2918_s29, %s1890_s22  }
 0xa07 PF: > { %s2993_s1 = sld [smem:[#allocation9_spill]]  ;;  %p2256_p2 = scmp.ge.s32.totalorder %s2437_s18, 2 }
 0xa09   : > { %p2253_p3 = pnand %p2256_p2, %p2580_p8 }
 0xa0d   : > { %s1916_s16 = sand.u32 1, %s2993_s1  }
 0xa0e   : > { %s1917_s27 = scalar_lea.sflag [#allocation7], %s1916_s16 }
 0xa0f   : > { %2412 = dma.done.wait (!%p2253_p3), %s1917_s27, 128  }
 0xa10   : > { %2414 = vsyncadd (!%p2253_p3), %s1917_s27, 4294967168  ;;  %s27_s18 = sadd.s32 1, %s2437_s18   ;;  %s2994_s16 = sld [smem:[#allocation10_spill]] }
 0xa11   : > { %p24_p5 = scmp.ge.s32.totalorder %s27_s18, 4   ;;  %s2995_s17 = sld [smem:[#allocation11_spill]] }
 0xa12   : > { %s2996_s29 = smov %s2421_s30  ;;  %s2997_s30 = smov %s2425_s15 }
 0xa13   : > { %s2998_s15 = smov %s2586_s26  ;;  %26 = sbr.rel (!%p24_p5) target bundleno = 7 (0x7), region = 126 }
 0xa1a   :  { %1922 = vsyncpa [#allocation7], 1 }
 0xa1b   :  { %1924 = vsyncpa [#allocation7 + $0x1], 1 }

</bundles_post_ra>
